<compile_context>
chip_gen: v7x
topology: tpu7x:2x2x1
jax: 0.10.0
libtpu: 0.0.40
codegen_flags: <defaults>
</compile_context>

<pallas_src>
from functools import partial

import jax
import jax.numpy as jnp
from jax.experimental import pallas as pl
from jax.experimental.pallas import tpu as pltpu


def _resnet_block_kernel(
    x_ref, t_ref,
    w1_ref, b1_ref, g1_ref, be1_ref,
    w2_ref, b2_ref, g2_ref, be2_ref,
    ws_ref, bs_ref, wsh_ref, bsh_ref,
    gmat_ref, cmask_ref,
    *rest,
    W, S, PAD, C_out, T, CPG, HAS_RES):
  if HAS_RES:
    wr_ref, br_ref, o_ref, xpad_ref, hpad_ref = rest
  else:
    o_ref, xpad_ref, hpad_ref = rest

  f32 = jnp.float32
  bf16 = jnp.bfloat16

  def silu(v):
    # exp and approx reciprocal both run on the EUP slot; VALU stays free.
    return v * pl.reciprocal(1.0 + jnp.exp(-v), approx=True)

  def conv3x3(src_pad_ref, wk_ref, b_ref):
    # src_pad_ref: (c_in, S + 2*PAD) bf16 zero-haloed flattened image
    # wk_ref     : (9, C_out, c_in)  bf16 taps in (ky, kx) row-major order
    acc = jnp.zeros((C_out, S), f32)
    for dx in (-1, 0, 1):
      part = jnp.zeros((C_out, S), f32)
      for dy in (-1, 0, 1):
        k = (dy + 1) * 3 + (dx + 1)
        start = PAD + dy * W + dx
        win = src_pad_ref[:, start:start + S]          # (c_in, S) shifted window
        part = part + jnp.dot(wk_ref[k], win, preferred_element_type=f32)
      if dx == -1:
        part = part * cmask_ref[0:1, :]                # zero out w == 0 columns
      elif dx == 1:
        part = part * cmask_ref[1:2, :]                # zero out w == W-1 columns
      acc = acc + part
    return acc + b_ref[...]

  inv_cnt = 1.0 / float(CPG * S)

  def group_norm(h, gamma_ref, beta_ref):
    # lane (XLU) reduction per channel first, then a tiny same-group mix.
    s1 = jnp.sum(h, axis=1, keepdims=True)             # (C_out, 1)
    s2 = jnp.sum(h * h, axis=1, keepdims=True)         # (C_out, 1)
    gm = gmat_ref[...]                                 # (C_out, C_out) one-hot groups
    mean = jnp.dot(gm, s1, preferred_element_type=f32) * inv_cnt
    ex2 = jnp.dot(gm, s2, preferred_element_type=f32) * inv_cnt
    inv = jax.lax.rsqrt(ex2 - mean * mean + 1e-5)
    a = inv * gamma_ref[...]
    b = beta_ref[...] - mean * a
    return h * a + b

  # Keep only the halo columns zero (interior is fully overwritten every step).
  zx = jnp.zeros((xpad_ref.shape[0], PAD), xpad_ref.dtype)
  xpad_ref[:, :PAD] = zx
  xpad_ref[:, PAD + S:] = zx
  zh = jnp.zeros((hpad_ref.shape[0], PAD), hpad_ref.dtype)
  hpad_ref[:, :PAD] = zh
  hpad_ref[:, PAD + S:] = zh

  x = x_ref[0]                                         # (C_in_p, S), input dtype
  xpad_ref[:, PAD:PAD + S] = x.astype(bf16)

  # ---- fused time-embedding MLP: SiLU(t) -> Linear, as (C_out,1) vectors ----
  t_row = silu(t_ref[0].astype(f32))                   # (1, T)
  scale = jnp.sum(ws_ref[...] * t_row, axis=1, keepdims=True) + bs_ref[...]
  shift = jnp.sum(wsh_ref[...] * t_row, axis=1, keepdims=True) + bsh_ref[...]

  # ---- block1: WSConv3x3 -> GroupNorm -> (scale+1, shift) -> SiLU -----------
  h = conv3x3(xpad_ref, w1_ref, b1_ref)
  h = group_norm(h, g1_ref, be1_ref)
  h = silu(h * (scale + 1.0) + shift)

  # ---- block2: WSConv3x3 -> GroupNorm -> SiLU -------------------------------
  hpad_ref[:, PAD:PAD + S] = h.astype(bf16)
  h2 = conv3x3(hpad_ref, w2_ref, b2_ref)
  h2 = silu(group_norm(h2, g2_ref, be2_ref))

  # ---- residual: 1x1 conv, or plain add when dim == dim_out -----------------
  if HAS_RES:
    xb = xpad_ref[:, PAD:PAD + S]                      # bf16 copy of x
    res = jnp.dot(wr_ref[...], xb, preferred_element_type=f32) + br_ref[...]
  else:
    res = x[:C_out].astype(f32)
  o_ref[0] = (h2 + res).astype(o_ref.dtype)


def resnet_block_forward(x, time_emb, params, *, groups=8):
  """ResnetBlock forward (NCHW in, NCHW out) via a single fused Pallas kernel."""
  N, C_in, H, W = x.shape
  C_out = params["w1"].shape[0]
  T = params["w_mlp"].shape[1]
  assert C_out % groups == 0, "GroupNorm requires dim_out % groups == 0"
  S = H * W
  PAD = W + 1            # halo covering any 3x3 tap shift in flat coordinates
  dtype = x.dtype
  has_res = "w_res" in params
  f32 = jnp.float32
  bf16 = jnp.bfloat16

  # ---- weight-only preprocessing (tiny; plain JAX) --------------------------
  def weight_standardize(w, eps=1e-5):  # WeightStandardizedConv2d
    m = jnp.mean(w, axis=(1, 2, 3), keepdims=True)
    v = jnp.var(w, axis=(1, 2, 3), keepdims=True)
    return (w - m) * jax.lax.rsqrt(v + eps)

  def to_taps(w):                       # (Co, Ci, 3, 3) -> (9, Co, Ci)
    co, ci = w.shape[0], w.shape[1]
    return jnp.transpose(w, (2, 3, 0, 1)).reshape(9, co, ci)

  w1k = to_taps(weight_standardize(params["w1"].astype(f32))).astype(bf16)
  w2k = to_taps(weight_standardize(params["w2"].astype(f32))).astype(bf16)

  w_scale = params["w_mlp"][:C_out].astype(f32)           # (C_out, T)
  w_shift = params["w_mlp"][C_out:].astype(f32)
  b_scale = params["b_mlp"][:C_out].reshape(C_out, 1).astype(f32)
  b_shift = params["b_mlp"][C_out:].reshape(C_out, 1).astype(f32)

  col = lambda a: a.reshape(C_out, 1).astype(f32)
  b1, g1, be1 = col(params["b1"]), col(params["gn1_g"]), col(params["gn1_b"])
  b2, g2, be2 = col(params["b2"]), col(params["gn2_g"]), col(params["gn2_b"])

  gidx = jnp.arange(C_out) // (C_out // groups)
  gmat = (gidx[:, None] == gidx[None, :]).astype(f32)      # (C_out, C_out)

  wpos = jnp.arange(S, dtype=jnp.int32) % W
  cmask = jnp.stack([wpos >= 1, wpos <= W - 2]).astype(f32)   # (2, S)

  # NCHW -> (N, C, H*W): pure reshape, no transpose / no extra HBM pass
  x_flat = x.reshape(N, C_in, S)
  t3 = time_emb.reshape(N, 1, T)

  # pad the contracted channel axis to a bf16 sublane multiple (cheap, exact)
  cpad = (-C_in) % 16
  if cpad:
    x_flat = jnp.concatenate([x_flat, jnp.zeros((N, cpad, S), dtype)], axis=1)
    w1k = jnp.concatenate([w1k, jnp.zeros((9, C_out, cpad), bf16)], axis=2)
  C_in_p = C_in + cpad

  if has_res:
    w_res = params["w_res"].reshape(C_out, C_in).astype(bf16)
    if cpad:
      w_res = jnp.concatenate([w_res, jnp.zeros((C_out, cpad), bf16)], axis=1)
    b_res = params["b_res"].reshape(C_out, 1).astype(f32)
  else:
    assert C_in == C_out, "identity residual requires dim == dim_out"

  kernel = partial(_resnet_block_kernel, W=W, S=S, PAD=PAD, C_out=C_out,
                   T=T, CPG=C_out // groups, HAS_RES=has_res)

  rep2 = lambda n: (0, 0)
  rep3 = lambda n: (0, 0, 0)
  img3 = lambda n: (n, 0, 0)

  # advisory cost estimate: the two 3x3 convs (+ optional 1x1 residual) dominate
  mxu_flops = N * S * (2 * 9 * C_in_p * C_out + 2 * 9 * C_out * C_out
                       + (2 * C_in_p * C_out if has_res else 0))
  vpu_flops = N * S * (12 * C_out) + N * (4 * C_out * T)
  transcendentals = N * (4 * C_out * S + 2 * T)
  bytes_accessed = int(
      N * (C_in_p * S + C_out * S) * jnp.dtype(dtype).itemsize
      + N * T * 4
      + 2 * (9 * C_out * (C_in_p + C_out) + (C_out * C_in_p if has_res else 0))
      + 4 * (2 * C_out * T + 12 * C_out + C_out * C_out + 2 * S))

  # per-generation VMEM budget (~100 MiB on v5e/v6e, ~54 MiB on v7x)
  try:
    vmem_cap = pltpu.get_tpu_info().vmem_capacity_bytes
  except Exception:
    vmem_cap = 64 * 1024 * 1024
  vmem_limit = min(int(vmem_cap * 0.85), 100 * 1024 * 1024)

  def build_and_run(single_buffer_consts):
    def cspec(shape, index_map):
      # constant operands never change across grid steps -> single-buffer them
      if single_buffer_consts:
        return pl.BlockSpec(shape, index_map, pipeline_mode=pl.Buffered(1))
      return pl.BlockSpec(shape, index_map)

    in_specs = [
        pl.BlockSpec((1, C_in_p, S), img3),        # x (one image / step)
        pl.BlockSpec((1, 1, T), img3),             # time_emb
        cspec((9, C_out, C_in_p), rep3),           # conv1 taps (standardized, bf16)
        cspec((C_out, 1), rep2),                   # conv1 bias
        cspec((C_out, 1), rep2),                   # gn1 gamma
        cspec((C_out, 1), rep2),                   # gn1 beta
        cspec((9, C_out, C_out), rep3),            # conv2 taps (standardized, bf16)
        cspec((C_out, 1), rep2),                   # conv2 bias
        cspec((C_out, 1), rep2),                   # gn2 gamma
        cspec((C_out, 1), rep2),                   # gn2 beta
        cspec((C_out, T), rep2),                   # time-MLP W (scale half)
        cspec((C_out, 1), rep2),                   # time-MLP b (scale half)
        cspec((C_out, T), rep2),                   # time-MLP W (shift half)
        cspec((C_out, 1), rep2),                   # time-MLP b (shift half)
        cspec((C_out, C_out), rep2),               # same-group one-hot
        cspec((2, S), rep2),                       # conv W-padding column masks
    ]
    operands = [x_flat, t3, w1k, b1, g1, be1, w2k, b2, g2, be2,
                w_scale, b_scale, w_shift, b_shift, gmat, cmask]
    if has_res:
      in_specs += [cspec((C_out, C_in_p), rep2),   # residual 1x1 conv W (bf16)
                   cspec((C_out, 1), rep2)]        # residual 1x1 conv b
      operands += [w_res, b_res]

    call = pl.pallas_call(
        kernel,
        out_shape=jax.ShapeDtypeStruct((N, C_out, S), dtype),
        grid_spec=pltpu.PrefetchScalarGridSpec(
            num_scalar_prefetch=0,
            grid=(N,),
            in_specs=in_specs,
            out_specs=pl.BlockSpec((1, C_out, S), img3),
            scratch_shapes=[
                pltpu.VMEM((C_in_p, S + 2 * PAD), bf16),   # zero-haloed x
                pltpu.VMEM((C_out, S + 2 * PAD), bf16),    # zero-haloed h
            ],
        ),
        compiler_params=pltpu.CompilerParams(
            dimension_semantics=("parallel",),
            vmem_limit_bytes=vmem_limit,
        ),
        cost_estimate=pl.CostEstimate(
            flops=mxu_flops + vpu_flops, transcendentals=transcendentals,
            bytes_accessed=bytes_accessed),
    )
    return call(*operands)

  try:
    out_flat = build_and_run(single_buffer_consts=True)
  except Exception:
    # pipeline_mode=pl.Buffered(1) is a pure VMEM optimization; fall back if the
    # installed jax/pallas version rejects it.
    out_flat = build_and_run(single_buffer_consts=False)

  return out_flat.reshape(N, C_out, H, W)


if __name__ == "__main__":
  key = jax.random.PRNGKey(0)
  ks = jax.random.split(key, 14)

  N, DIM, DIM_OUT, H, W = 2, 4, 8, 16, 16
  TIME_DIM, GROUPS = 32, 4

  x = jax.random.normal(ks[0], (N, DIM, H, W), jnp.float32)
  t = jax.random.normal(ks[1], (N, TIME_DIM), jnp.float32)

  params = {
      "w1": 0.2 * jax.random.normal(ks[2], (DIM_OUT, DIM, 3, 3), jnp.float32),
      "b1": 0.1 * jax.random.normal(ks[3], (DIM_OUT,), jnp.float32),
      "gn1_g": 1.0 + 0.1 * jax.random.normal(ks[4], (DIM_OUT,), jnp.float32),
      "gn1_b": 0.1 * jax.random.normal(ks[5], (DIM_OUT,), jnp.float32),
      "w2": 0.2 * jax.random.normal(ks[6], (DIM_OUT, DIM_OUT, 3, 3), jnp.float32),
      "b2": 0.1 * jax.random.normal(ks[7], (DIM_OUT,), jnp.float32),
      "gn2_g": 1.0 + 0.1 * jax.random.normal(ks[8], (DIM_OUT,), jnp.float32),
      "gn2_b": 0.1 * jax.random.normal(ks[9], (DIM_OUT,), jnp.float32),
      "w_mlp": 0.1 * jax.random.normal(ks[10], (2 * DIM_OUT, TIME_DIM), jnp.float32),
      "b_mlp": 0.1 * jax.random.normal(ks[11], (2 * DIM_OUT,), jnp.float32),
      "w_res": 0.3 * jax.random.normal(ks[12], (DIM_OUT, DIM, 1, 1), jnp.float32),
      "b_res": 0.1 * jax.random.normal(ks[13], (DIM_OUT,), jnp.float32),
  }

  out = resnet_block_forward(x, t, params, groups=GROUPS)
  out = jax.block_until_ready(out)

  # ---- pure-JAX reference (mirrors the PyTorch module exactly, f32 HIGHEST) --
  def ws_std(w, eps=1e-5):
    m = jnp.mean(w, axis=(1, 2, 3), keepdims=True)
    v = jnp.var(w, axis=(1, 2, 3), keepdims=True)
    return (w - m) * jax.lax.rsqrt(v + eps)

  def conv2d(xx, w, b, pad):
    y = jax.lax.conv_general_dilated(
        xx, w, window_strides=(1, 1), padding=pad,
        dimension_numbers=("NCHW", "OIHW", "NCHW"),
        precision=jax.lax.Precision.HIGHEST)
    return y + b.reshape(1, -1, 1, 1)

  def gnorm(h, g, b, eps=1e-5):
    n, c, hh, ww = h.shape
    hg = h.reshape(n, GROUPS, c // GROUPS, hh, ww)
    m = hg.mean(axis=(2, 3, 4), keepdims=True)
    v = hg.var(axis=(2, 3, 4), keepdims=True)
    hg = (hg - m) * jax.lax.rsqrt(v + eps)
    return hg.reshape(n, c, hh, ww) * g.reshape(1, c, 1, 1) + b.reshape(1, c, 1, 1)

  te = jnp.dot(jax.nn.silu(t), params["w_mlp"].T,
               precision=jax.lax.Precision.HIGHEST) + params["b_mlp"]
  scale, shift = te[:, :DIM_OUT], te[:, DIM_OUT:]
  h = conv2d(x, ws_std(params["w1"]), params["b1"], ((1, 1), (1, 1)))
  h = gnorm(h, params["gn1_g"], params["gn1_b"])
  h = h * (scale[:, :, None, None] + 1.0) + shift[:, :, None, None]
  h = jax.nn.silu(h)
  h = conv2d(h, ws_std(params["w2"]), params["b2"], ((1, 1), (1, 1)))
  h = gnorm(h, params["gn2_g"], params["gn2_b"])
  h = jax.nn.silu(h)
  ref = h + conv2d(x, params["w_res"], params["b_res"], ((0, 0), (0, 0)))

  assert out.shape == (N, DIM_OUT, H, W) and out.dtype == x.dtype
  # bf16 MXU operands (with f32 accumulation) -> slightly looser tolerance
  assert jnp.allclose(out, ref, atol=3e-2, rtol=3e-2), (
      "mismatch vs reference: max abs diff "
      f"{float(jnp.max(jnp.abs(out - ref)))}")

  print("KERNEL_OK")
</pallas_src>

<mosaic_0001>
module attributes {stable_mosaic.version = 11 : i64} {
  func.func @_resnet_block_kernel(%arg0: i32, %arg1: memref<1x16x256xf32, #tpu.memory_space<vmem>>, %arg2: memref<1x1x32xf32, #tpu.memory_space<vmem>>, %arg3: memref<9x8x16xbf16, #tpu.memory_space<vmem>>, %arg4: memref<8x1xf32, #tpu.memory_space<vmem>>, %arg5: memref<8x1xf32, #tpu.memory_space<vmem>>, %arg6: memref<8x1xf32, #tpu.memory_space<vmem>>, %arg7: memref<9x8x8xbf16, #tpu.memory_space<vmem>>, %arg8: memref<8x1xf32, #tpu.memory_space<vmem>>, %arg9: memref<8x1xf32, #tpu.memory_space<vmem>>, %arg10: memref<8x1xf32, #tpu.memory_space<vmem>>, %arg11: memref<8x32xf32, #tpu.memory_space<vmem>>, %arg12: memref<8x1xf32, #tpu.memory_space<vmem>>, %arg13: memref<8x32xf32, #tpu.memory_space<vmem>>, %arg14: memref<8x1xf32, #tpu.memory_space<vmem>>, %arg15: memref<8x8xf32, #tpu.memory_space<vmem>>, %arg16: memref<2x256xf32, #tpu.memory_space<vmem>>, %arg17: memref<8x16xbf16, #tpu.memory_space<vmem>>, %arg18: memref<8x1xf32, #tpu.memory_space<vmem>>, %arg19: memref<1x8x256xf32, #tpu.memory_space<vmem>>, %arg20: memref<16x290xbf16, #tpu.memory_space<vmem>>, %arg21: memref<8x290xbf16, #tpu.memory_space<vmem>>) attributes {dimension_semantics = [#tpu.dimension_semantics<parallel>], iteration_bounds = array<i64: 2>, scalar_prefetch = 0 : i64, scratch_operands = 2 : i64, tpu.core_type = #tpu.core_type<tc>, window_params = [{transform_indices = @transform_0, window_bounds = array<i64: 1, 16, 256>}, {transform_indices = @transform_1, window_bounds = array<i64: 1, 1, 32>}, {pipeline_mode = #tpu.pipeline_mode<synchronous>, transform_indices = @transform_2, window_bounds = array<i64: 9, 8, 16>}, {pipeline_mode = #tpu.pipeline_mode<synchronous>, transform_indices = @transform_3, window_bounds = array<i64: 8, 1>}, {pipeline_mode = #tpu.pipeline_mode<synchronous>, transform_indices = @transform_4, window_bounds = array<i64: 8, 1>}, {pipeline_mode = #tpu.pipeline_mode<synchronous>, transform_indices = @transform_5, window_bounds = array<i64: 8, 1>}, {pipeline_mode = #tpu.pipeline_mode<synchronous>, transform_indices = @transform_6, window_bounds = array<i64: 9, 8, 8>}, {pipeline_mode = #tpu.pipeline_mode<synchronous>, transform_indices = @transform_7, window_bounds = array<i64: 8, 1>}, {pipeline_mode = #tpu.pipeline_mode<synchronous>, transform_indices = @transform_8, window_bounds = array<i64: 8, 1>}, {pipeline_mode = #tpu.pipeline_mode<synchronous>, transform_indices = @transform_9, window_bounds = array<i64: 8, 1>}, {pipeline_mode = #tpu.pipeline_mode<synchronous>, transform_indices = @transform_10, window_bounds = array<i64: 8, 32>}, {pipeline_mode = #tpu.pipeline_mode<synchronous>, transform_indices = @transform_11, window_bounds = array<i64: 8, 1>}, {pipeline_mode = #tpu.pipeline_mode<synchronous>, transform_indices = @transform_12, window_bounds = array<i64: 8, 32>}, {pipeline_mode = #tpu.pipeline_mode<synchronous>, transform_indices = @transform_13, window_bounds = array<i64: 8, 1>}, {pipeline_mode = #tpu.pipeline_mode<synchronous>, transform_indices = @transform_14, window_bounds = array<i64: 8, 8>}, {pipeline_mode = #tpu.pipeline_mode<synchronous>, transform_indices = @transform_15, window_bounds = array<i64: 2, 256>}, {pipeline_mode = #tpu.pipeline_mode<synchronous>, transform_indices = @transform_16, window_bounds = array<i64: 8, 16>}, {pipeline_mode = #tpu.pipeline_mode<synchronous>, transform_indices = @transform_17, window_bounds = array<i64: 8, 1>}, {transform_indices = @transform_18, window_bounds = array<i64: 1, 8, 256>}]} {
    %cst = arith.constant 0.000000e+00 : bf16
    %0 = vector.broadcast %cst : bf16 to vector<16x17xbf16>
    %c0 = arith.constant 0 : index
    %c0_0 = arith.constant 0 : index
    %1 = vector.load %arg20[%c0, %c0_0] : memref<16x290xbf16, #tpu.memory_space<vmem>>, vector<16x17xbf16>
    tpu.vector_store %arg20[%c0, %c0_0], %0 {strides = array<i32>} : memref<16x290xbf16, #tpu.memory_space<vmem>>, vector<16x17xbf16>,
    %c0_1 = arith.constant 0 : index
    %c273 = arith.constant 273 : index
    %2 = vector.load %arg20[%c0_1, %c273] : memref<16x290xbf16, #tpu.memory_space<vmem>>, vector<16x17xbf16>
    tpu.vector_store %arg20[%c0_1, %c273], %0 {strides = array<i32>} : memref<16x290xbf16, #tpu.memory_space<vmem>>, vector<16x17xbf16>,
    %cst_2 = arith.constant 0.000000e+00 : bf16
    %3 = vector.broadcast %cst_2 : bf16 to vector<8x17xbf16>
    %c0_3 = arith.constant 0 : index
    %c0_4 = arith.constant 0 : index
    %4 = vector.load %arg21[%c0_3, %c0_4] : memref<8x290xbf16, #tpu.memory_space<vmem>>, vector<8x17xbf16>
    tpu.vector_store %arg21[%c0_3, %c0_4], %3 {strides = array<i32>} : memref<8x290xbf16, #tpu.memory_space<vmem>>, vector<8x17xbf16>,
    %c0_5 = arith.constant 0 : index
    %c273_6 = arith.constant 273 : index
    %5 = vector.load %arg21[%c0_5, %c273_6] : memref<8x290xbf16, #tpu.memory_space<vmem>>, vector<8x17xbf16>
    tpu.vector_store %arg21[%c0_5, %c273_6], %3 {strides = array<i32>} : memref<8x290xbf16, #tpu.memory_space<vmem>>, vector<8x17xbf16>,
    %c0_7 = arith.constant 0 : index
    %c0_8 = arith.constant 0 : index
    %c0_9 = arith.constant 0 : index
    %6 = vector.load %arg1[%c0_7, %c0_8, %c0_9] : memref<1x16x256xf32, #tpu.memory_space<vmem>>, vector<1x16x256xf32>
    %7 = vector.shape_cast %6 : vector<1x16x256xf32> to vector<16x256xf32>
    %8 = arith.truncf %7 : vector<16x256xf32> to vector<16x256xbf16>
    %c0_10 = arith.constant 0 : index
    %c17 = arith.constant 17 : index
    %9 = vector.load %arg20[%c0_10, %c17] : memref<16x290xbf16, #tpu.memory_space<vmem>>, vector<16x256xbf16>
    tpu.vector_store %arg20[%c0_10, %c17], %8 {strides = array<i32>} : memref<16x290xbf16, #tpu.memory_space<vmem>>, vector<16x256xbf16>,
    %c0_11 = arith.constant 0 : index
    %c0_12 = arith.constant 0 : index
    %c0_13 = arith.constant 0 : index
    %10 = vector.load %arg2[%c0_11, %c0_12, %c0_13] : memref<1x1x32xf32, #tpu.memory_space<vmem>>, vector<1x1x32xf32>
    %11 = vector.shape_cast %10 : vector<1x1x32xf32> to vector<1x32xf32>
    %cst_14 = arith.constant 0.000000e+00 : f32
    %12 = vector.broadcast %cst_14 : f32 to vector<1x32xf32>
    %13 = arith.subf %12, %11 : vector<1x32xf32>
    %14 = math.exp %13 : vector<1x32xf32>
    %cst_15 = arith.constant 1.000000e+00 : f32
    %15 = vector.broadcast %cst_15 : f32 to vector<1x32xf32>
    %16 = arith.addf %15, %14 : vector<1x32xf32>
    %17 = tpu.reciprocal %16 {approx = true} : vector<1x32xf32> -> vector<1x32xf32>
    %18 = arith.mulf %11, %17 : vector<1x32xf32>
    %c0_16 = arith.constant 0 : index
    %c0_17 = arith.constant 0 : index
    %19 = vector.load %arg11[%c0_16, %c0_17] : memref<8x32xf32, #tpu.memory_space<vmem>>, vector<8x32xf32>
    %20 = vector.broadcast %18 : vector<1x32xf32> to vector<8x32xf32>
    %21 = arith.mulf %19, %20 : vector<8x32xf32>
    %cst_18 = arith.constant dense<0.000000e+00> : vector<8xf32>
    %22 = vector.multi_reduction <add>, %21, %cst_18 [1] : vector<8x32xf32> to vector<8xf32>
    %23 = vector.shape_cast %22 : vector<8xf32> to vector<8x1xf32>
    %c0_19 = arith.constant 0 : index
    %c0_20 = arith.constant 0 : index
    %24 = vector.load %arg12[%c0_19, %c0_20] : memref<8x1xf32, #tpu.memory_space<vmem>>, vector<8x1xf32>
    %25 = arith.addf %23, %24 : vector<8x1xf32>
    %c0_21 = arith.constant 0 : index
    %c0_22 = arith.constant 0 : index
    %26 = vector.load %arg13[%c0_21, %c0_22] : memref<8x32xf32, #tpu.memory_space<vmem>>, vector<8x32xf32>
    %27 = vector.broadcast %18 : vector<1x32xf32> to vector<8x32xf32>
    %28 = arith.mulf %26, %27 : vector<8x32xf32>
    %cst_23 = arith.constant dense<0.000000e+00> : vector<8xf32>
    %29 = vector.multi_reduction <add>, %28, %cst_23 [1] : vector<8x32xf32> to vector<8xf32>
    %30 = vector.shape_cast %29 : vector<8xf32> to vector<8x1xf32>
    %c0_24 = arith.constant 0 : index
    %c0_25 = arith.constant 0 : index
    %31 = vector.load %arg14[%c0_24, %c0_25] : memref<8x1xf32, #tpu.memory_space<vmem>>, vector<8x1xf32>
    %32 = arith.addf %30, %31 : vector<8x1xf32>
    %cst_26 = arith.constant 0.000000e+00 : f32
    %33 = vector.broadcast %cst_26 : f32 to vector<8x256xf32>
    %cst_27 = arith.constant 0.000000e+00 : f32
    %34 = vector.broadcast %cst_27 : f32 to vector<8x256xf32>
    %c0_28 = arith.constant 0 : index
    %c0_29 = arith.constant 0 : index
    %35 = vector.load %arg20[%c0_28, %c0_29] : memref<16x290xbf16, #tpu.memory_space<vmem>>, vector<16x256xbf16>
    %c0_30 = arith.constant 0 : index
    %c0_31 = arith.constant 0 : index
    %c0_32 = arith.constant 0 : index
    %36 = vector.load %arg3[%c0_30, %c0_31, %c0_32] : memref<9x8x16xbf16, #tpu.memory_space<vmem>>, vector<1x8x16xbf16>
    %37 = vector.shape_cast %36 : vector<1x8x16xbf16> to vector<8x16xbf16>
    %cst_33 = arith.constant dense<0.000000e+00> : vector<8x256xf32>
    %38 = tpu.matmul %37, %35, %cst_33 {dimension_numbers = #tpu.dot_dimension_numbers<[1], [0], [0], [1], [0, 0, 1, 1], [], []>} : vector<8x16xbf16>, vector<16x256xbf16>, vector<8x256xf32> -> vector<8x256xf32>
    %39 = arith.addf %34, %38 : vector<8x256xf32>
    %c0_34 = arith.constant 0 : index
    %c16 = arith.constant 16 : index
    %40 = vector.load %arg20[%c0_34, %c16] : memref<16x290xbf16, #tpu.memory_space<vmem>>, vector<16x256xbf16>
    %c3 = arith.constant 3 : index
    %c0_35 = arith.constant 0 : index
    %c0_36 = arith.constant 0 : index
    %41 = vector.load %arg3[%c3, %c0_35, %c0_36] : memref<9x8x16xbf16, #tpu.memory_space<vmem>>, vector<1x8x16xbf16>
    %42 = vector.shape_cast %41 : vector<1x8x16xbf16> to vector<8x16xbf16>
    %cst_37 = arith.constant dense<0.000000e+00> : vector<8x256xf32>
    %43 = tpu.matmul %42, %40, %cst_37 {dimension_numbers = #tpu.dot_dimension_numbers<[1], [0], [0], [1], [0, 0, 1, 1], [], []>} : vector<8x16xbf16>, vector<16x256xbf16>, vector<8x256xf32> -> vector<8x256xf32>
    %44 = arith.addf %39, %43 : vector<8x256xf32>
    %c0_38 = arith.constant 0 : index
    %c32 = arith.constant 32 : index
    %45 = vector.load %arg20[%c0_38, %c32] : memref<16x290xbf16, #tpu.memory_space<vmem>>, vector<16x256xbf16>
    %c6 = arith.constant 6 : index
    %c0_39 = arith.constant 0 : index
    %c0_40 = arith.constant 0 : index
    %46 = vector.load %arg3[%c6, %c0_39, %c0_40] : memref<9x8x16xbf16, #tpu.memory_space<vmem>>, vector<1x8x16xbf16>
    %47 = vector.shape_cast %46 : vector<1x8x16xbf16> to vector<8x16xbf16>
    %cst_41 = arith.constant dense<0.000000e+00> : vector<8x256xf32>
    %48 = tpu.matmul %47, %45, %cst_41 {dimension_numbers = #tpu.dot_dimension_numbers<[1], [0], [0], [1], [0, 0, 1, 1], [], []>} : vector<8x16xbf16>, vector<16x256xbf16>, vector<8x256xf32> -> vector<8x256xf32>
    %49 = arith.addf %44, %48 : vector<8x256xf32>
    %c0_42 = arith.constant 0 : index
    %c0_43 = arith.constant 0 : index
    %50 = vector.load %arg16[%c0_42, %c0_43] : memref<2x256xf32, #tpu.memory_space<vmem>>, vector<1x256xf32>
    %51 = vector.broadcast %50 : vector<1x256xf32> to vector<8x256xf32>
    %52 = arith.mulf %49, %51 : vector<8x256xf32>
    %53 = arith.addf %33, %52 : vector<8x256xf32>
    %cst_44 = arith.constant 0.000000e+00 : f32
    %54 = vector.broadcast %cst_44 : f32 to vector<8x256xf32>
    %c0_45 = arith.constant 0 : index
    %c1 = arith.constant 1 : index
    %55 = vector.load %arg20[%c0_45, %c1] : memref<16x290xbf16, #tpu.memory_space<vmem>>, vector<16x256xbf16>
    %c1_46 = arith.constant 1 : index
    %c0_47 = arith.constant 0 : index
    %c0_48 = arith.constant 0 : index
    %56 = vector.load %arg3[%c1_46, %c0_47, %c0_48] : memref<9x8x16xbf16, #tpu.memory_space<vmem>>, vector<1x8x16xbf16>
    %57 = vector.shape_cast %56 : vector<1x8x16xbf16> to vector<8x16xbf16>
    %cst_49 = arith.constant dense<0.000000e+00> : vector<8x256xf32>
    %58 = tpu.matmul %57, %55, %cst_49 {dimension_numbers = #tpu.dot_dimension_numbers<[1], [0], [0], [1], [0, 0, 1, 1], [], []>} : vector<8x16xbf16>, vector<16x256xbf16>, vector<8x256xf32> -> vector<8x256xf32>
    %59 = arith.addf %54, %58 : vector<8x256xf32>
    %c0_50 = arith.constant 0 : index
    %c17_51 = arith.constant 17 : index
    %60 = vector.load %arg20[%c0_50, %c17_51] : memref<16x290xbf16, #tpu.memory_space<vmem>>, vector<16x256xbf16>
    %c4 = arith.constant 4 : index
    %c0_52 = arith.constant 0 : index
    %c0_53 = arith.constant 0 : index
    %61 = vector.load %arg3[%c4, %c0_52, %c0_53] : memref<9x8x16xbf16, #tpu.memory_space<vmem>>, vector<1x8x16xbf16>
    %62 = vector.shape_cast %61 : vector<1x8x16xbf16> to vector<8x16xbf16>
    %cst_54 = arith.constant dense<0.000000e+00> : vector<8x256xf32>
    %63 = tpu.matmul %62, %60, %cst_54 {dimension_numbers = #tpu.dot_dimension_numbers<[1], [0], [0], [1], [0, 0, 1, 1], [], []>} : vector<8x16xbf16>, vector<16x256xbf16>, vector<8x256xf32> -> vector<8x256xf32>
    %64 = arith.addf %59, %63 : vector<8x256xf32>
    %c0_55 = arith.constant 0 : index
    %c33 = arith.constant 33 : index
    %65 = vector.load %arg20[%c0_55, %c33] : memref<16x290xbf16, #tpu.memory_space<vmem>>, vector<16x256xbf16>
    %c7 = arith.constant 7 : index
    %c0_56 = arith.constant 0 : index
    %c0_57 = arith.constant 0 : index
    %66 = vector.load %arg3[%c7, %c0_56, %c0_57] : memref<9x8x16xbf16, #tpu.memory_space<vmem>>, vector<1x8x16xbf16>
    %67 = vector.shape_cast %66 : vector<1x8x16xbf16> to vector<8x16xbf16>
    %cst_58 = arith.constant dense<0.000000e+00> : vector<8x256xf32>
    %68 = tpu.matmul %67, %65, %cst_58 {dimension_numbers = #tpu.dot_dimension_numbers<[1], [0], [0], [1], [0, 0, 1, 1], [], []>} : vector<8x16xbf16>, vector<16x256xbf16>, vector<8x256xf32> -> vector<8x256xf32>
    %69 = arith.addf %64, %68 : vector<8x256xf32>
    %70 = arith.addf %53, %69 : vector<8x256xf32>
    %cst_59 = arith.constant 0.000000e+00 : f32
    %71 = vector.broadcast %cst_59 : f32 to vector<8x256xf32>
    %c0_60 = arith.constant 0 : index
    %c2 = arith.constant 2 : index
    %72 = vector.load %arg20[%c0_60, %c2] : memref<16x290xbf16, #tpu.memory_space<vmem>>, vector<16x256xbf16>
    %c2_61 = arith.constant 2 : index
    %c0_62 = arith.constant 0 : index
    %c0_63 = arith.constant 0 : index
    %73 = vector.load %arg3[%c2_61, %c0_62, %c0_63] : memref<9x8x16xbf16, #tpu.memory_space<vmem>>, vector<1x8x16xbf16>
    %74 = vector.shape_cast %73 : vector<1x8x16xbf16> to vector<8x16xbf16>
    %cst_64 = arith.constant dense<0.000000e+00> : vector<8x256xf32>
    %75 = tpu.matmul %74, %72, %cst_64 {dimension_numbers = #tpu.dot_dimension_numbers<[1], [0], [0], [1], [0, 0, 1, 1], [], []>} : vector<8x16xbf16>, vector<16x256xbf16>, vector<8x256xf32> -> vector<8x256xf32>
    %76 = arith.addf %71, %75 : vector<8x256xf32>
    %c0_65 = arith.constant 0 : index
    %c18 = arith.constant 18 : index
    %77 = vector.load %arg20[%c0_65, %c18] : memref<16x290xbf16, #tpu.memory_space<vmem>>, vector<16x256xbf16>
    %c5 = arith.constant 5 : index
    %c0_66 = arith.constant 0 : index
    %c0_67 = arith.constant 0 : index
    %78 = vector.load %arg3[%c5, %c0_66, %c0_67] : memref<9x8x16xbf16, #tpu.memory_space<vmem>>, vector<1x8x16xbf16>
    %79 = vector.shape_cast %78 : vector<1x8x16xbf16> to vector<8x16xbf16>
    %cst_68 = arith.constant dense<0.000000e+00> : vector<8x256xf32>
    %80 = tpu.matmul %79, %77, %cst_68 {dimension_numbers = #tpu.dot_dimension_numbers<[1], [0], [0], [1], [0, 0, 1, 1], [], []>} : vector<8x16xbf16>, vector<16x256xbf16>, vector<8x256xf32> -> vector<8x256xf32>
    %81 = arith.addf %76, %80 : vector<8x256xf32>
    %c0_69 = arith.constant 0 : index
    %c34 = arith.constant 34 : index
    %82 = vector.load %arg20[%c0_69, %c34] : memref<16x290xbf16, #tpu.memory_space<vmem>>, vector<16x256xbf16>
    %c8 = arith.constant 8 : index
    %c0_70 = arith.constant 0 : index
    %c0_71 = arith.constant 0 : index
    %83 = vector.load %arg3[%c8, %c0_70, %c0_71] : memref<9x8x16xbf16, #tpu.memory_space<vmem>>, vector<1x8x16xbf16>
    %84 = vector.shape_cast %83 : vector<1x8x16xbf16> to vector<8x16xbf16>
    %cst_72 = arith.constant dense<0.000000e+00> : vector<8x256xf32>
    %85 = tpu.matmul %84, %82, %cst_72 {dimension_numbers = #tpu.dot_dimension_numbers<[1], [0], [0], [1], [0, 0, 1, 1], [], []>} : vector<8x16xbf16>, vector<16x256xbf16>, vector<8x256xf32> -> vector<8x256xf32>
    %86 = arith.addf %81, %85 : vector<8x256xf32>
    %c1_73 = arith.constant 1 : index
    %c0_74 = arith.constant 0 : index
    %87 = vector.load %arg16[%c1_73, %c0_74] : memref<2x256xf32, #tpu.memory_space<vmem>>, vector<1x256xf32>
    %88 = vector.broadcast %87 : vector<1x256xf32> to vector<8x256xf32>
    %89 = arith.mulf %86, %88 : vector<8x256xf32>
    %90 = arith.addf %70, %89 : vector<8x256xf32>
    %c0_75 = arith.constant 0 : index
    %c0_76 = arith.constant 0 : index
    %91 = vector.load %arg4[%c0_75, %c0_76] : memref<8x1xf32, #tpu.memory_space<vmem>>, vector<8x1xf32>
    %92 = vector.broadcast %91 : vector<8x1xf32> to vector<8x256xf32>
    %93 = arith.addf %90, %92 : vector<8x256xf32>
    %cst_77 = arith.constant dense<0.000000e+00> : vector<8xf32>
    %94 = vector.multi_reduction <add>, %93, %cst_77 [1] : vector<8x256xf32> to vector<8xf32>
    %95 = vector.shape_cast %94 : vector<8xf32> to vector<8x1xf32>
    %96 = arith.mulf %93, %93 : vector<8x256xf32>
    %cst_78 = arith.constant dense<0.000000e+00> : vector<8xf32>
    %97 = vector.multi_reduction <add>, %96, %cst_78 [1] : vector<8x256xf32> to vector<8xf32>
    %98 = vector.shape_cast %97 : vector<8xf32> to vector<8x1xf32>
    %c0_79 = arith.constant 0 : index
    %c0_80 = arith.constant 0 : index
    %99 = vector.load %arg15[%c0_79, %c0_80] : memref<8x8xf32, #tpu.memory_space<vmem>>, vector<8x8xf32>
    %cst_81 = arith.constant dense<0.000000e+00> : vector<8x1xf32>
    %100 = tpu.matmul %99, %95, %cst_81 {dimension_numbers = #tpu.dot_dimension_numbers<[1], [0], [0], [1], [0, 0, 1, 1], [], []>} : vector<8x8xf32>, vector<8x1xf32>, vector<8x1xf32> -> vector<8x1xf32>
    %cst_82 = arith.constant 0.001953125 : f32
    %101 = vector.broadcast %cst_82 : f32 to vector<8x1xf32>
    %102 = arith.mulf %100, %101 : vector<8x1xf32>
    %cst_83 = arith.constant dense<0.000000e+00> : vector<8x1xf32>
    %103 = tpu.matmul %99, %98, %cst_83 {dimension_numbers = #tpu.dot_dimension_numbers<[1], [0], [0], [1], [0, 0, 1, 1], [], []>} : vector<8x8xf32>, vector<8x1xf32>, vector<8x1xf32> -> vector<8x1xf32>
    %cst_84 = arith.constant 0.001953125 : f32
    %104 = vector.broadcast %cst_84 : f32 to vector<8x1xf32>
    %105 = arith.mulf %103, %104 : vector<8x1xf32>
    %106 = arith.mulf %102, %102 : vector<8x1xf32>
    %107 = arith.subf %105, %106 : vector<8x1xf32>
    %cst_85 = arith.constant 9.99999974E-6 : f32
    %108 = vector.broadcast %cst_85 : f32 to vector<8x1xf32>
    %109 = arith.addf %107, %108 : vector<8x1xf32>
    %110 = math.rsqrt %109 : vector<8x1xf32>
    %c0_86 = arith.constant 0 : index
    %c0_87 = arith.constant 0 : index
    %111 = vector.load %arg5[%c0_86, %c0_87] : memref<8x1xf32, #tpu.memory_space<vmem>>, vector<8x1xf32>
    %112 = arith.mulf %110, %111 : vector<8x1xf32>
    %c0_88 = arith.constant 0 : index
    %c0_89 = arith.constant 0 : index
    %113 = vector.load %arg6[%c0_88, %c0_89] : memref<8x1xf32, #tpu.memory_space<vmem>>, vector<8x1xf32>
    %114 = arith.mulf %102, %112 : vector<8x1xf32>
    %115 = arith.subf %113, %114 : vector<8x1xf32>
    %116 = vector.broadcast %112 : vector<8x1xf32> to vector<8x256xf32>
    %117 = arith.mulf %93, %116 : vector<8x256xf32>
    %118 = vector.broadcast %115 : vector<8x1xf32> to vector<8x256xf32>
    %119 = arith.addf %117, %118 : vector<8x256xf32>
    %cst_90 = arith.constant 1.000000e+00 : f32
    %120 = vector.broadcast %cst_90 : f32 to vector<8x1xf32>
    %121 = arith.addf %25, %120 : vector<8x1xf32>
    %122 = vector.broadcast %121 : vector<8x1xf32> to vector<8x256xf32>
    %123 = arith.mulf %119, %122 : vector<8x256xf32>
    %124 = vector.broadcast %32 : vector<8x1xf32> to vector<8x256xf32>
    %125 = arith.addf %123, %124 : vector<8x256xf32>
    %cst_91 = arith.constant 0.000000e+00 : f32
    %126 = vector.broadcast %cst_91 : f32 to vector<8x256xf32>
    %127 = arith.subf %126, %125 : vector<8x256xf32>
    %128 = math.exp %127 : vector<8x256xf32>
    %cst_92 = arith.constant 1.000000e+00 : f32
    %129 = vector.broadcast %cst_92 : f32 to vector<8x256xf32>
    %130 = arith.addf %129, %128 : vector<8x256xf32>
    %131 = tpu.reciprocal %130 {approx = true} : vector<8x256xf32> -> vector<8x256xf32>
    %132 = arith.mulf %125, %131 : vector<8x256xf32>
    %133 = arith.truncf %132 : vector<8x256xf32> to vector<8x256xbf16>
    %c0_93 = arith.constant 0 : index
    %c17_94 = arith.constant 17 : index
    %134 = vector.load %arg21[%c0_93, %c17_94] : memref<8x290xbf16, #tpu.memory_space<vmem>>, vector<8x256xbf16>
    tpu.vector_store %arg21[%c0_93, %c17_94], %133 {strides = array<i32>} : memref<8x290xbf16, #tpu.memory_space<vmem>>, vector<8x256xbf16>,
    %cst_95 = arith.constant 0.000000e+00 : f32
    %135 = vector.broadcast %cst_95 : f32 to vector<8x256xf32>
    %cst_96 = arith.constant 0.000000e+00 : f32
    %136 = vector.broadcast %cst_96 : f32 to vector<8x256xf32>
    %c0_97 = arith.constant 0 : index
    %c0_98 = arith.constant 0 : index
    %137 = vector.load %arg21[%c0_97, %c0_98] : memref<8x290xbf16, #tpu.memory_space<vmem>>, vector<8x256xbf16>
    %c0_99 = arith.constant 0 : index
    %c0_100 = arith.constant 0 : index
    %c0_101 = arith.constant 0 : index
    %138 = vector.load %arg7[%c0_99, %c0_100, %c0_101] : memref<9x8x8xbf16, #tpu.memory_space<vmem>>, vector<1x8x8xbf16>
    %139 = vector.shape_cast %138 : vector<1x8x8xbf16> to vector<8x8xbf16>
    %cst_102 = arith.constant dense<0.000000e+00> : vector<8x256xf32>
    %140 = tpu.matmul %139, %137, %cst_102 {dimension_numbers = #tpu.dot_dimension_numbers<[1], [0], [0], [1], [0, 0, 1, 1], [], []>} : vector<8x8xbf16>, vector<8x256xbf16>, vector<8x256xf32> -> vector<8x256xf32>
    %141 = arith.addf %136, %140 : vector<8x256xf32>
    %c0_103 = arith.constant 0 : index
    %c16_104 = arith.constant 16 : index
    %142 = vector.load %arg21[%c0_103, %c16_104] : memref<8x290xbf16, #tpu.memory_space<vmem>>, vector<8x256xbf16>
    %c3_105 = arith.constant 3 : index
    %c0_106 = arith.constant 0 : index
    %c0_107 = arith.constant 0 : index
    %143 = vector.load %arg7[%c3_105, %c0_106, %c0_107] : memref<9x8x8xbf16, #tpu.memory_space<vmem>>, vector<1x8x8xbf16>
    %144 = vector.shape_cast %143 : vector<1x8x8xbf16> to vector<8x8xbf16>
    %cst_108 = arith.constant dense<0.000000e+00> : vector<8x256xf32>
    %145 = tpu.matmul %144, %142, %cst_108 {dimension_numbers = #tpu.dot_dimension_numbers<[1], [0], [0], [1], [0, 0, 1, 1], [], []>} : vector<8x8xbf16>, vector<8x256xbf16>, vector<8x256xf32> -> vector<8x256xf32>
    %146 = arith.addf %141, %145 : vector<8x256xf32>
    %c0_109 = arith.constant 0 : index
    %c32_110 = arith.constant 32 : index
    %147 = vector.load %arg21[%c0_109, %c32_110] : memref<8x290xbf16, #tpu.memory_space<vmem>>, vector<8x256xbf16>
    %c6_111 = arith.constant 6 : index
    %c0_112 = arith.constant 0 : index
    %c0_113 = arith.constant 0 : index
    %148 = vector.load %arg7[%c6_111, %c0_112, %c0_113] : memref<9x8x8xbf16, #tpu.memory_space<vmem>>, vector<1x8x8xbf16>
    %149 = vector.shape_cast %148 : vector<1x8x8xbf16> to vector<8x8xbf16>
    %cst_114 = arith.constant dense<0.000000e+00> : vector<8x256xf32>
    %150 = tpu.matmul %149, %147, %cst_114 {dimension_numbers = #tpu.dot_dimension_numbers<[1], [0], [0], [1], [0, 0, 1, 1], [], []>} : vector<8x8xbf16>, vector<8x256xbf16>, vector<8x256xf32> -> vector<8x256xf32>
    %151 = arith.addf %146, %150 : vector<8x256xf32>
    %c0_115 = arith.constant 0 : index
    %c0_116 = arith.constant 0 : index
    %152 = vector.load %arg16[%c0_115, %c0_116] : memref<2x256xf32, #tpu.memory_space<vmem>>, vector<1x256xf32>
    %153 = vector.broadcast %152 : vector<1x256xf32> to vector<8x256xf32>
    %154 = arith.mulf %151, %153 : vector<8x256xf32>
    %155 = arith.addf %135, %154 : vector<8x256xf32>
    %cst_117 = arith.constant 0.000000e+00 : f32
    %156 = vector.broadcast %cst_117 : f32 to vector<8x256xf32>
    %c0_118 = arith.constant 0 : index
    %c1_119 = arith.constant 1 : index
    %157 = vector.load %arg21[%c0_118, %c1_119] : memref<8x290xbf16, #tpu.memory_space<vmem>>, vector<8x256xbf16>
    %c1_120 = arith.constant 1 : index
    %c0_121 = arith.constant 0 : index
    %c0_122 = arith.constant 0 : index
    %158 = vector.load %arg7[%c1_120, %c0_121, %c0_122] : memref<9x8x8xbf16, #tpu.memory_space<vmem>>, vector<1x8x8xbf16>
    %159 = vector.shape_cast %158 : vector<1x8x8xbf16> to vector<8x8xbf16>
    %cst_123 = arith.constant dense<0.000000e+00> : vector<8x256xf32>
    %160 = tpu.matmul %159, %157, %cst_123 {dimension_numbers = #tpu.dot_dimension_numbers<[1], [0], [0], [1], [0, 0, 1, 1], [], []>} : vector<8x8xbf16>, vector<8x256xbf16>, vector<8x256xf32> -> vector<8x256xf32>
    %161 = arith.addf %156, %160 : vector<8x256xf32>
    %c0_124 = arith.constant 0 : index
    %c17_125 = arith.constant 17 : index
    %162 = vector.load %arg21[%c0_124, %c17_125] : memref<8x290xbf16, #tpu.memory_space<vmem>>, vector<8x256xbf16>
    %c4_126 = arith.constant 4 : index
    %c0_127 = arith.constant 0 : index
    %c0_128 = arith.constant 0 : index
    %163 = vector.load %arg7[%c4_126, %c0_127, %c0_128] : memref<9x8x8xbf16, #tpu.memory_space<vmem>>, vector<1x8x8xbf16>
    %164 = vector.shape_cast %163 : vector<1x8x8xbf16> to vector<8x8xbf16>
    %cst_129 = arith.constant dense<0.000000e+00> : vector<8x256xf32>
    %165 = tpu.matmul %164, %162, %cst_129 {dimension_numbers = #tpu.dot_dimension_numbers<[1], [0], [0], [1], [0, 0, 1, 1], [], []>} : vector<8x8xbf16>, vector<8x256xbf16>, vector<8x256xf32> -> vector<8x256xf32>
    %166 = arith.addf %161, %165 : vector<8x256xf32>
    %c0_130 = arith.constant 0 : index
    %c33_131 = arith.constant 33 : index
    %167 = vector.load %arg21[%c0_130, %c33_131] : memref<8x290xbf16, #tpu.memory_space<vmem>>, vector<8x256xbf16>
    %c7_132 = arith.constant 7 : index
    %c0_133 = arith.constant 0 : index
    %c0_134 = arith.constant 0 : index
    %168 = vector.load %arg7[%c7_132, %c0_133, %c0_134] : memref<9x8x8xbf16, #tpu.memory_space<vmem>>, vector<1x8x8xbf16>
    %169 = vector.shape_cast %168 : vector<1x8x8xbf16> to vector<8x8xbf16>
    %cst_135 = arith.constant dense<0.000000e+00> : vector<8x256xf32>
    %170 = tpu.matmul %169, %167, %cst_135 {dimension_numbers = #tpu.dot_dimension_numbers<[1], [0], [0], [1], [0, 0, 1, 1], [], []>} : vector<8x8xbf16>, vector<8x256xbf16>, vector<8x256xf32> -> vector<8x256xf32>
    %171 = arith.addf %166, %170 : vector<8x256xf32>
    %172 = arith.addf %155, %171 : vector<8x256xf32>
    %cst_136 = arith.constant 0.000000e+00 : f32
    %173 = vector.broadcast %cst_136 : f32 to vector<8x256xf32>
    %c0_137 = arith.constant 0 : index
    %c2_138 = arith.constant 2 : index
    %174 = vector.load %arg21[%c0_137, %c2_138] : memref<8x290xbf16, #tpu.memory_space<vmem>>, vector<8x256xbf16>
    %c2_139 = arith.constant 2 : index
    %c0_140 = arith.constant 0 : index
    %c0_141 = arith.constant 0 : index
    %175 = vector.load %arg7[%c2_139, %c0_140, %c0_141] : memref<9x8x8xbf16, #tpu.memory_space<vmem>>, vector<1x8x8xbf16>
    %176 = vector.shape_cast %175 : vector<1x8x8xbf16> to vector<8x8xbf16>
    %cst_142 = arith.constant dense<0.000000e+00> : vector<8x256xf32>
    %177 = tpu.matmul %176, %174, %cst_142 {dimension_numbers = #tpu.dot_dimension_numbers<[1], [0], [0], [1], [0, 0, 1, 1], [], []>} : vector<8x8xbf16>, vector<8x256xbf16>, vector<8x256xf32> -> vector<8x256xf32>
    %178 = arith.addf %173, %177 : vector<8x256xf32>
    %c0_143 = arith.constant 0 : index
    %c18_144 = arith.constant 18 : index
    %179 = vector.load %arg21[%c0_143, %c18_144] : memref<8x290xbf16, #tpu.memory_space<vmem>>, vector<8x256xbf16>
    %c5_145 = arith.constant 5 : index
    %c0_146 = arith.constant 0 : index
    %c0_147 = arith.constant 0 : index
    %180 = vector.load %arg7[%c5_145, %c0_146, %c0_147] : memref<9x8x8xbf16, #tpu.memory_space<vmem>>, vector<1x8x8xbf16>
    %181 = vector.shape_cast %180 : vector<1x8x8xbf16> to vector<8x8xbf16>
    %cst_148 = arith.constant dense<0.000000e+00> : vector<8x256xf32>
    %182 = tpu.matmul %181, %179, %cst_148 {dimension_numbers = #tpu.dot_dimension_numbers<[1], [0], [0], [1], [0, 0, 1, 1], [], []>} : vector<8x8xbf16>, vector<8x256xbf16>, vector<8x256xf32> -> vector<8x256xf32>
    %183 = arith.addf %178, %182 : vector<8x256xf32>
    %c0_149 = arith.constant 0 : index
    %c34_150 = arith.constant 34 : index
    %184 = vector.load %arg21[%c0_149, %c34_150] : memref<8x290xbf16, #tpu.memory_space<vmem>>, vector<8x256xbf16>
    %c8_151 = arith.constant 8 : index
    %c0_152 = arith.constant 0 : index
    %c0_153 = arith.constant 0 : index
    %185 = vector.load %arg7[%c8_151, %c0_152, %c0_153] : memref<9x8x8xbf16, #tpu.memory_space<vmem>>, vector<1x8x8xbf16>
    %186 = vector.shape_cast %185 : vector<1x8x8xbf16> to vector<8x8xbf16>
    %cst_154 = arith.constant dense<0.000000e+00> : vector<8x256xf32>
    %187 = tpu.matmul %186, %184, %cst_154 {dimension_numbers = #tpu.dot_dimension_numbers<[1], [0], [0], [1], [0, 0, 1, 1], [], []>} : vector<8x8xbf16>, vector<8x256xbf16>, vector<8x256xf32> -> vector<8x256xf32>
    %188 = arith.addf %183, %187 : vector<8x256xf32>
    %c1_155 = arith.constant 1 : index
    %c0_156 = arith.constant 0 : index
    %189 = vector.load %arg16[%c1_155, %c0_156] : memref<2x256xf32, #tpu.memory_space<vmem>>, vector<1x256xf32>
    %190 = vector.broadcast %189 : vector<1x256xf32> to vector<8x256xf32>
    %191 = arith.mulf %188, %190 : vector<8x256xf32>
    %192 = arith.addf %172, %191 : vector<8x256xf32>
    %c0_157 = arith.constant 0 : index
    %c0_158 = arith.constant 0 : index
    %193 = vector.load %arg8[%c0_157, %c0_158] : memref<8x1xf32, #tpu.memory_space<vmem>>, vector<8x1xf32>
    %194 = vector.broadcast %193 : vector<8x1xf32> to vector<8x256xf32>
    %195 = arith.addf %192, %194 : vector<8x256xf32>
    %cst_159 = arith.constant dense<0.000000e+00> : vector<8xf32>
    %196 = vector.multi_reduction <add>, %195, %cst_159 [1] : vector<8x256xf32> to vector<8xf32>
    %197 = vector.shape_cast %196 : vector<8xf32> to vector<8x1xf32>
    %198 = arith.mulf %195, %195 : vector<8x256xf32>
    %cst_160 = arith.constant dense<0.000000e+00> : vector<8xf32>
    %199 = vector.multi_reduction <add>, %198, %cst_160 [1] : vector<8x256xf32> to vector<8xf32>
    %200 = vector.shape_cast %199 : vector<8xf32> to vector<8x1xf32>
    %c0_161 = arith.constant 0 : index
    %c0_162 = arith.constant 0 : index
    %201 = vector.load %arg15[%c0_161, %c0_162] : memref<8x8xf32, #tpu.memory_space<vmem>>, vector<8x8xf32>
    %cst_163 = arith.constant dense<0.000000e+00> : vector<8x1xf32>
    %202 = tpu.matmul %201, %197, %cst_163 {dimension_numbers = #tpu.dot_dimension_numbers<[1], [0], [0], [1], [0, 0, 1, 1], [], []>} : vector<8x8xf32>, vector<8x1xf32>, vector<8x1xf32> -> vector<8x1xf32>
    %cst_164 = arith.constant 0.001953125 : f32
    %203 = vector.broadcast %cst_164 : f32 to vector<8x1xf32>
    %204 = arith.mulf %202, %203 : vector<8x1xf32>
    %cst_165 = arith.constant dense<0.000000e+00> : vector<8x1xf32>
    %205 = tpu.matmul %201, %200, %cst_165 {dimension_numbers = #tpu.dot_dimension_numbers<[1], [0], [0], [1], [0, 0, 1, 1], [], []>} : vector<8x8xf32>, vector<8x1xf32>, vector<8x1xf32> -> vector<8x1xf32>
    %cst_166 = arith.constant 0.001953125 : f32
    %206 = vector.broadcast %cst_166 : f32 to vector<8x1xf32>
    %207 = arith.mulf %205, %206 : vector<8x1xf32>
    %208 = arith.mulf %204, %204 : vector<8x1xf32>
    %209 = arith.subf %207, %208 : vector<8x1xf32>
    %cst_167 = arith.constant 9.99999974E-6 : f32
    %210 = vector.broadcast %cst_167 : f32 to vector<8x1xf32>
    %211 = arith.addf %209, %210 : vector<8x1xf32>
    %212 = math.rsqrt %211 : vector<8x1xf32>
    %c0_168 = arith.constant 0 : index
    %c0_169 = arith.constant 0 : index
    %213 = vector.load %arg9[%c0_168, %c0_169] : memref<8x1xf32, #tpu.memory_space<vmem>>, vector<8x1xf32>
    %214 = arith.mulf %212, %213 : vector<8x1xf32>
    %c0_170 = arith.constant 0 : index
    %c0_171 = arith.constant 0 : index
    %215 = vector.load %arg10[%c0_170, %c0_171] : memref<8x1xf32, #tpu.memory_space<vmem>>, vector<8x1xf32>
    %216 = arith.mulf %204, %214 : vector<8x1xf32>
    %217 = arith.subf %215, %216 : vector<8x1xf32>
    %218 = vector.broadcast %214 : vector<8x1xf32> to vector<8x256xf32>
    %219 = arith.mulf %195, %218 : vector<8x256xf32>
    %220 = vector.broadcast %217 : vector<8x1xf32> to vector<8x256xf32>
    %221 = arith.addf %219, %220 : vector<8x256xf32>
    %cst_172 = arith.constant 0.000000e+00 : f32
    %222 = vector.broadcast %cst_172 : f32 to vector<8x256xf32>
    %223 = arith.subf %222, %221 : vector<8x256xf32>
    %224 = math.exp %223 : vector<8x256xf32>
    %cst_173 = arith.constant 1.000000e+00 : f32
    %225 = vector.broadcast %cst_173 : f32 to vector<8x256xf32>
    %226 = arith.addf %225, %224 : vector<8x256xf32>
    %227 = tpu.reciprocal %226 {approx = true} : vector<8x256xf32> -> vector<8x256xf32>
    %228 = arith.mulf %221, %227 : vector<8x256xf32>
    %c0_174 = arith.constant 0 : index
    %c17_175 = arith.constant 17 : index
    %229 = vector.load %arg20[%c0_174, %c17_175] : memref<16x290xbf16, #tpu.memory_space<vmem>>, vector<16x256xbf16>
    %c0_176 = arith.constant 0 : index
    %c0_177 = arith.constant 0 : index
    %230 = vector.load %arg17[%c0_176, %c0_177] : memref<8x16xbf16, #tpu.memory_space<vmem>>, vector<8x16xbf16>
    %cst_178 = arith.constant dense<0.000000e+00> : vector<8x256xf32>
    %231 = tpu.matmul %230, %229, %cst_178 {dimension_numbers = #tpu.dot_dimension_numbers<[1], [0], [0], [1], [0, 0, 1, 1], [], []>} : vector<8x16xbf16>, vector<16x256xbf16>, vector<8x256xf32> -> vector<8x256xf32>
    %c0_179 = arith.constant 0 : index
    %c0_180 = arith.constant 0 : index
    %232 = vector.load %arg18[%c0_179, %c0_180] : memref<8x1xf32, #tpu.memory_space<vmem>>, vector<8x1xf32>
    %233 = vector.broadcast %232 : vector<8x1xf32> to vector<8x256xf32>
    %234 = arith.addf %231, %233 : vector<8x256xf32>
    %235 = arith.addf %228, %234 : vector<8x256xf32>
    %c0_181 = arith.constant 0 : index
    %c0_182 = arith.constant 0 : index
    %c0_183 = arith.constant 0 : index
    %236 = vector.load %arg19[%c0_181, %c0_182, %c0_183] : memref<1x8x256xf32, #tpu.memory_space<vmem>>, vector<1x8x256xf32>
    %237 = vector.shape_cast %236 : vector<1x8x256xf32> to vector<8x256xf32>
    %238 = vector.shape_cast %235 : vector<8x256xf32> to vector<1x8x256xf32>
    tpu.vector_store %arg19[%c0_181, %c0_182, %c0_183], %238 {strides = array<i32>} : memref<1x8x256xf32, #tpu.memory_space<vmem>>, vector<1x8x256xf32>,
    return
  }
  func.func @transform_0(%arg0: i32) -> (i32, i32, i32) {
    %c0_i32 = arith.constant 0 : i32
    %c0_i32_0 = arith.constant 0 : i32
    %c0_i32_1 = arith.constant 0 : i32
    return %arg0, %c0_i32, %c0_i32_0 : i32, i32, i32
  }
  func.func @transform_1(%arg0: i32) -> (i32, i32, i32) {
    %c0_i32 = arith.constant 0 : i32
    %c0_i32_0 = arith.constant 0 : i32
    %c0_i32_1 = arith.constant 0 : i32
    return %arg0, %c0_i32, %c0_i32_0 : i32, i32, i32
  }
  func.func @transform_2(%arg0: i32) -> (i32, i32, i32) {
    %c0_i32 = arith.constant 0 : i32
    %c0_i32_0 = arith.constant 0 : i32
    %c0_i32_1 = arith.constant 0 : i32
    %c0_i32_2 = arith.constant 0 : i32
    return %c0_i32, %c0_i32_0, %c0_i32_1 : i32, i32, i32
  }
  func.func @transform_3(%arg0: i32) -> (i32, i32) {
    %c0_i32 = arith.constant 0 : i32
    %c0_i32_0 = arith.constant 0 : i32
    %c0_i32_1 = arith.constant 0 : i32
    return %c0_i32, %c0_i32_0 : i32, i32
  }
  func.func @transform_4(%arg0: i32) -> (i32, i32) {
    %c0_i32 = arith.constant 0 : i32
    %c0_i32_0 = arith.constant 0 : i32
    %c0_i32_1 = arith.constant 0 : i32
    return %c0_i32, %c0_i32_0 : i32, i32
  }
  func.func @transform_5(%arg0: i32) -> (i32, i32) {
    %c0_i32 = arith.constant 0 : i32
    %c0_i32_0 = arith.constant 0 : i32
    %c0_i32_1 = arith.constant 0 : i32
    return %c0_i32, %c0_i32_0 : i32, i32
  }
  func.func @transform_6(%arg0: i32) -> (i32, i32, i32) {
    %c0_i32 = arith.constant 0 : i32
    %c0_i32_0 = arith.constant 0 : i32
    %c0_i32_1 = arith.constant 0 : i32
    %c0_i32_2 = arith.constant 0 : i32
    return %c0_i32, %c0_i32_0, %c0_i32_1 : i32, i32, i32
  }
  func.func @transform_7(%arg0: i32) -> (i32, i32) {
    %c0_i32 = arith.constant 0 : i32
    %c0_i32_0 = arith.constant 0 : i32
    %c0_i32_1 = arith.constant 0 : i32
    return %c0_i32, %c0_i32_0 : i32, i32
  }
  func.func @transform_8(%arg0: i32) -> (i32, i32) {
    %c0_i32 = arith.constant 0 : i32
    %c0_i32_0 = arith.constant 0 : i32
    %c0_i32_1 = arith.constant 0 : i32
    return %c0_i32, %c0_i32_0 : i32, i32
  }
  func.func @transform_9(%arg0: i32) -> (i32, i32) {
    %c0_i32 = arith.constant 0 : i32
    %c0_i32_0 = arith.constant 0 : i32
    %c0_i32_1 = arith.constant 0 : i32
    return %c0_i32, %c0_i32_0 : i32, i32
  }
  func.func @transform_10(%arg0: i32) -> (i32, i32) {
    %c0_i32 = arith.constant 0 : i32
    %c0_i32_0 = arith.constant 0 : i32
    %c0_i32_1 = arith.constant 0 : i32
    return %c0_i32, %c0_i32_0 : i32, i32
  }
  func.func @transform_11(%arg0: i32) -> (i32, i32) {
    %c0_i32 = arith.constant 0 : i32
    %c0_i32_0 = arith.constant 0 : i32
    %c0_i32_1 = arith.constant 0 : i32
    return %c0_i32, %c0_i32_0 : i32, i32
  }
  func.func @transform_12(%arg0: i32) -> (i32, i32) {
    %c0_i32 = arith.constant 0 : i32
    %c0_i32_0 = arith.constant 0 : i32
    %c0_i32_1 = arith.constant 0 : i32
    return %c0_i32, %c0_i32_0 : i32, i32
  }
  func.func @transform_13(%arg0: i32) -> (i32, i32) {
    %c0_i32 = arith.constant 0 : i32
    %c0_i32_0 = arith.constant 0 : i32
    %c0_i32_1 = arith.constant 0 : i32
    return %c0_i32, %c0_i32_0 : i32, i32
  }
  func.func @transform_14(%arg0: i32) -> (i32, i32) {
    %c0_i32 = arith.constant 0 : i32
    %c0_i32_0 = arith.constant 0 : i32
    %c0_i32_1 = arith.constant 0 : i32
    return %c0_i32, %c0_i32_0 : i32, i32
  }
  func.func @transform_15(%arg0: i32) -> (i32, i32) {
    %c0_i32 = arith.constant 0 : i32
    %c0_i32_0 = arith.constant 0 : i32
    %c0_i32_1 = arith.constant 0 : i32
    return %c0_i32, %c0_i32_0 : i32, i32
  }
  func.func @transform_16(%arg0: i32) -> (i32, i32) {
    %c0_i32 = arith.constant 0 : i32
    %c0_i32_0 = arith.constant 0 : i32
    %c0_i32_1 = arith.constant 0 : i32
    return %c0_i32, %c0_i32_0 : i32, i32
  }
  func.func @transform_17(%arg0: i32) -> (i32, i32) {
    %c0_i32 = arith.constant 0 : i32
    %c0_i32_0 = arith.constant 0 : i32
    %c0_i32_1 = arith.constant 0 : i32
    return %c0_i32, %c0_i32_0 : i32, i32
  }
  func.func @transform_18(%arg0: i32) -> (i32, i32, i32) {
    %c0_i32 = arith.constant 0 : i32
    %c0_i32_0 = arith.constant 0 : i32
    %c0_i32_1 = arith.constant 0 : i32
    return %arg0, %c0_i32, %c0_i32_0 : i32, i32, i32
  }
}

module attributes {stable_mosaic.version = 11 : i64} {
  func.func @_resnet_block_kernel(%arg0: i32, %arg1: memref<1x16x256xf32, #tpu.memory_space<vmem>>, %arg2: memref<1x1x32xf32, #tpu.memory_space<vmem>>, %arg3: memref<9x8x16xbf16, #tpu.memory_space<vmem>>, %arg4: memref<8x1xf32, #tpu.memory_space<vmem>>, %arg5: memref<8x1xf32, #tpu.memory_space<vmem>>, %arg6: memref<8x1xf32, #tpu.memory_space<vmem>>, %arg7: memref<9x8x8xbf16, #tpu.memory_space<vmem>>, %arg8: memref<8x1xf32, #tpu.memory_space<vmem>>, %arg9: memref<8x1xf32, #tpu.memory_space<vmem>>, %arg10: memref<8x1xf32, #tpu.memory_space<vmem>>, %arg11: memref<8x32xf32, #tpu.memory_space<vmem>>, %arg12: memref<8x1xf32, #tpu.memory_space<vmem>>, %arg13: memref<8x32xf32, #tpu.memory_space<vmem>>, %arg14: memref<8x1xf32, #tpu.memory_space<vmem>>, %arg15: memref<8x8xf32, #tpu.memory_space<vmem>>, %arg16: memref<2x256xf32, #tpu.memory_space<vmem>>, %arg17: memref<8x16xbf16, #tpu.memory_space<vmem>>, %arg18: memref<8x1xf32, #tpu.memory_space<vmem>>, %arg19: memref<1x8x256xf32, #tpu.memory_space<vmem>>, %arg20: memref<16x290xbf16, #tpu.memory_space<vmem>>, %arg21: memref<8x290xbf16, #tpu.memory_space<vmem>>) attributes {dimension_semantics = [#tpu.dimension_semantics<parallel>], iteration_bounds = array<i64: 2>, scalar_prefetch = 0 : i64, scratch_operands = 2 : i64, tpu.core_type = #tpu.core_type<tc>, window_params = [{transform_indices = @transform_0, window_bounds = array<i64: 1, 16, 256>}, {transform_indices = @transform_1, window_bounds = array<i64: 1, 1, 32>}, {pipeline_mode = #tpu.pipeline_mode<synchronous>, transform_indices = @transform_2, window_bounds = array<i64: 9, 8, 16>}, {pipeline_mode = #tpu.pipeline_mode<synchronous>, transform_indices = @transform_3, window_bounds = array<i64: 8, 1>}, {pipeline_mode = #tpu.pipeline_mode<synchronous>, transform_indices = @transform_4, window_bounds = array<i64: 8, 1>}, {pipeline_mode = #tpu.pipeline_mode<synchronous>, transform_indices = @transform_5, window_bounds = array<i64: 8, 1>}, {pipeline_mode = #tpu.pipeline_mode<synchronous>, transform_indices = @transform_6, window_bounds = array<i64: 9, 8, 8>}, {pipeline_mode = #tpu.pipeline_mode<synchronous>, transform_indices = @transform_7, window_bounds = array<i64: 8, 1>}, {pipeline_mode = #tpu.pipeline_mode<synchronous>, transform_indices = @transform_8, window_bounds = array<i64: 8, 1>}, {pipeline_mode = #tpu.pipeline_mode<synchronous>, transform_indices = @transform_9, window_bounds = array<i64: 8, 1>}, {pipeline_mode = #tpu.pipeline_mode<synchronous>, transform_indices = @transform_10, window_bounds = array<i64: 8, 32>}, {pipeline_mode = #tpu.pipeline_mode<synchronous>, transform_indices = @transform_11, window_bounds = array<i64: 8, 1>}, {pipeline_mode = #tpu.pipeline_mode<synchronous>, transform_indices = @transform_12, window_bounds = array<i64: 8, 32>}, {pipeline_mode = #tpu.pipeline_mode<synchronous>, transform_indices = @transform_13, window_bounds = array<i64: 8, 1>}, {pipeline_mode = #tpu.pipeline_mode<synchronous>, transform_indices = @transform_14, window_bounds = array<i64: 8, 8>}, {pipeline_mode = #tpu.pipeline_mode<synchronous>, transform_indices = @transform_15, window_bounds = array<i64: 2, 256>}, {pipeline_mode = #tpu.pipeline_mode<synchronous>, transform_indices = @transform_16, window_bounds = array<i64: 8, 16>}, {pipeline_mode = #tpu.pipeline_mode<synchronous>, transform_indices = @transform_17, window_bounds = array<i64: 8, 1>}, {transform_indices = @transform_18, window_bounds = array<i64: 1, 8, 256>}]} {
    %cst = arith.constant 0.000000e+00 : bf16
    %0 = vector.broadcast %cst : bf16 to vector<16x17xbf16>
    %c0 = arith.constant 0 : index
    %c0_0 = arith.constant 0 : index
    %1 = vector.load %arg20[%c0, %c0_0] : memref<16x290xbf16, #tpu.memory_space<vmem>>, vector<16x17xbf16>
    tpu.vector_store %arg20[%c0, %c0_0], %0 {strides = array<i32>} : memref<16x290xbf16, #tpu.memory_space<vmem>>, vector<16x17xbf16>,
    %c0_1 = arith.constant 0 : index
    %c273 = arith.constant 273 : index
    %2 = vector.load %arg20[%c0_1, %c273] : memref<16x290xbf16, #tpu.memory_space<vmem>>, vector<16x17xbf16>
    tpu.vector_store %arg20[%c0_1, %c273], %0 {strides = array<i32>} : memref<16x290xbf16, #tpu.memory_space<vmem>>, vector<16x17xbf16>,
    %cst_2 = arith.constant 0.000000e+00 : bf16
    %3 = vector.broadcast %cst_2 : bf16 to vector<8x17xbf16>
    %c0_3 = arith.constant 0 : index
    %c0_4 = arith.constant 0 : index
    %4 = vector.load %arg21[%c0_3, %c0_4] : memref<8x290xbf16, #tpu.memory_space<vmem>>, vector<8x17xbf16>
    tpu.vector_store %arg21[%c0_3, %c0_4], %3 {strides = array<i32>} : memref<8x290xbf16, #tpu.memory_space<vmem>>, vector<8x17xbf16>,
    %c0_5 = arith.constant 0 : index
    %c273_6 = arith.constant 273 : index
    %5 = vector.load %arg21[%c0_5, %c273_6] : memref<8x290xbf16, #tpu.memory_space<vmem>>, vector<8x17xbf16>
    tpu.vector_store %arg21[%c0_5, %c273_6], %3 {strides = array<i32>} : memref<8x290xbf16, #tpu.memory_space<vmem>>, vector<8x17xbf16>,
    %c0_7 = arith.constant 0 : index
    %c0_8 = arith.constant 0 : index
    %c0_9 = arith.constant 0 : index
    %6 = vector.load %arg1[%c0_7, %c0_8, %c0_9] : memref<1x16x256xf32, #tpu.memory_space<vmem>>, vector<1x16x256xf32>
    %7 = vector.shape_cast %6 : vector<1x16x256xf32> to vector<16x256xf32>
    %8 = arith.truncf %7 : vector<16x256xf32> to vector<16x256xbf16>
    %c0_10 = arith.constant 0 : index
    %c17 = arith.constant 17 : index
    %9 = vector.load %arg20[%c0_10, %c17] : memref<16x290xbf16, #tpu.memory_space<vmem>>, vector<16x256xbf16>
    tpu.vector_store %arg20[%c0_10, %c17], %8 {strides = array<i32>} : memref<16x290xbf16, #tpu.memory_space<vmem>>, vector<16x256xbf16>,
    %c0_11 = arith.constant 0 : index
    %c0_12 = arith.constant 0 : index
    %c0_13 = arith.constant 0 : index
    %10 = vector.load %arg2[%c0_11, %c0_12, %c0_13] : memref<1x1x32xf32, #tpu.memory_space<vmem>>, vector<1x1x32xf32>
    %11 = vector.shape_cast %10 : vector<1x1x32xf32> to vector<1x32xf32>
    %cst_14 = arith.constant 0.000000e+00 : f32
    %12 = vector.broadcast %cst_14 : f32 to vector<1x32xf32>
    %13 = arith.subf %12, %11 : vector<1x32xf32>
    %14 = math.exp %13 : vector<1x32xf32>
    %cst_15 = arith.constant 1.000000e+00 : f32
    %15 = vector.broadcast %cst_15 : f32 to vector<1x32xf32>
    %16 = arith.addf %15, %14 : vector<1x32xf32>
    %17 = tpu.reciprocal %16 {approx = true} : vector<1x32xf32> -> vector<1x32xf32>
    %18 = arith.mulf %11, %17 : vector<1x32xf32>
    %c0_16 = arith.constant 0 : index
    %c0_17 = arith.constant 0 : index
    %19 = vector.load %arg11[%c0_16, %c0_17] : memref<8x32xf32, #tpu.memory_space<vmem>>, vector<8x32xf32>
    %20 = vector.broadcast %18 : vector<1x32xf32> to vector<8x32xf32>
    %21 = arith.mulf %19, %20 : vector<8x32xf32>
    %cst_18 = arith.constant dense<0.000000e+00> : vector<8xf32>
    %22 = vector.multi_reduction <add>, %21, %cst_18 [1] : vector<8x32xf32> to vector<8xf32>
    %23 = vector.shape_cast %22 : vector<8xf32> to vector<8x1xf32>
    %c0_19 = arith.constant 0 : index
    %c0_20 = arith.constant 0 : index
    %24 = vector.load %arg12[%c0_19, %c0_20] : memref<8x1xf32, #tpu.memory_space<vmem>>, vector<8x1xf32>
    %25 = arith.addf %23, %24 : vector<8x1xf32>
    %c0_21 = arith.constant 0 : index
    %c0_22 = arith.constant 0 : index
    %26 = vector.load %arg13[%c0_21, %c0_22] : memref<8x32xf32, #tpu.memory_space<vmem>>, vector<8x32xf32>
    %27 = vector.broadcast %18 : vector<1x32xf32> to vector<8x32xf32>
    %28 = arith.mulf %26, %27 : vector<8x32xf32>
    %cst_23 = arith.constant dense<0.000000e+00> : vector<8xf32>
    %29 = vector.multi_reduction <add>, %28, %cst_23 [1] : vector<8x32xf32> to vector<8xf32>
    %30 = vector.shape_cast %29 : vector<8xf32> to vector<8x1xf32>
    %c0_24 = arith.constant 0 : index
    %c0_25 = arith.constant 0 : index
    %31 = vector.load %arg14[%c0_24, %c0_25] : memref<8x1xf32, #tpu.memory_space<vmem>>, vector<8x1xf32>
    %32 = arith.addf %30, %31 : vector<8x1xf32>
    %cst_26 = arith.constant 0.000000e+00 : f32
    %33 = vector.broadcast %cst_26 : f32 to vector<8x256xf32>
    %cst_27 = arith.constant 0.000000e+00 : f32
    %34 = vector.broadcast %cst_27 : f32 to vector<8x256xf32>
    %c0_28 = arith.constant 0 : index
    %c0_29 = arith.constant 0 : index
    %35 = vector.load %arg20[%c0_28, %c0_29] : memref<16x290xbf16, #tpu.memory_space<vmem>>, vector<16x256xbf16>
    %c0_30 = arith.constant 0 : index
    %c0_31 = arith.constant 0 : index
    %c0_32 = arith.constant 0 : index
    %36 = vector.load %arg3[%c0_30, %c0_31, %c0_32] : memref<9x8x16xbf16, #tpu.memory_space<vmem>>, vector<1x8x16xbf16>
    %37 = vector.shape_cast %36 : vector<1x8x16xbf16> to vector<8x16xbf16>
    %cst_33 = arith.constant dense<0.000000e+00> : vector<8x256xf32>
    %38 = tpu.matmul %37, %35, %cst_33 {dimension_numbers = #tpu.dot_dimension_numbers<[1], [0], [0], [1], [0, 0, 1, 1], [], []>} : vector<8x16xbf16>, vector<16x256xbf16>, vector<8x256xf32> -> vector<8x256xf32>
    %39 = arith.addf %34, %38 : vector<8x256xf32>
    %c0_34 = arith.constant 0 : index
    %c16 = arith.constant 16 : index
    %40 = vector.load %arg20[%c0_34, %c16] : memref<16x290xbf16, #tpu.memory_space<vmem>>, vector<16x256xbf16>
    %c3 = arith.constant 3 : index
    %c0_35 = arith.constant 0 : index
    %c0_36 = arith.constant 0 : index
    %41 = vector.load %arg3[%c3, %c0_35, %c0_36] : memref<9x8x16xbf16, #tpu.memory_space<vmem>>, vector<1x8x16xbf16>
    %42 = vector.shape_cast %41 : vector<1x8x16xbf16> to vector<8x16xbf16>
    %cst_37 = arith.constant dense<0.000000e+00> : vector<8x256xf32>
    %43 = tpu.matmul %42, %40, %cst_37 {dimension_numbers = #tpu.dot_dimension_numbers<[1], [0], [0], [1], [0, 0, 1, 1], [], []>} : vector<8x16xbf16>, vector<16x256xbf16>, vector<8x256xf32> -> vector<8x256xf32>
    %44 = arith.addf %39, %43 : vector<8x256xf32>
    %c0_38 = arith.constant 0 : index
    %c32 = arith.constant 32 : index
    %45 = vector.load %arg20[%c0_38, %c32] : memref<16x290xbf16, #tpu.memory_space<vmem>>, vector<16x256xbf16>
    %c6 = arith.constant 6 : index
    %c0_39 = arith.constant 0 : index
    %c0_40 = arith.constant 0 : index
    %46 = vector.load %arg3[%c6, %c0_39, %c0_40] : memref<9x8x16xbf16, #tpu.memory_space<vmem>>, vector<1x8x16xbf16>
    %47 = vector.shape_cast %46 : vector<1x8x16xbf16> to vector<8x16xbf16>
    %cst_41 = arith.constant dense<0.000000e+00> : vector<8x256xf32>
    %48 = tpu.matmul %47, %45, %cst_41 {dimension_numbers = #tpu.dot_dimension_numbers<[1], [0], [0], [1], [0, 0, 1, 1], [], []>} : vector<8x16xbf16>, vector<16x256xbf16>, vector<8x256xf32> -> vector<8x256xf32>
    %49 = arith.addf %44, %48 : vector<8x256xf32>
    %c0_42 = arith.constant 0 : index
    %c0_43 = arith.constant 0 : index
    %50 = vector.load %arg16[%c0_42, %c0_43] : memref<2x256xf32, #tpu.memory_space<vmem>>, vector<1x256xf32>
    %51 = vector.broadcast %50 : vector<1x256xf32> to vector<8x256xf32>
    %52 = arith.mulf %49, %51 : vector<8x256xf32>
    %53 = arith.addf %33, %52 : vector<8x256xf32>
    %cst_44 = arith.constant 0.000000e+00 : f32
    %54 = vector.broadcast %cst_44 : f32 to vector<8x256xf32>
    %c0_45 = arith.constant 0 : index
    %c1 = arith.constant 1 : index
    %55 = vector.load %arg20[%c0_45, %c1] : memref<16x290xbf16, #tpu.memory_space<vmem>>, vector<16x256xbf16>
    %c1_46 = arith.constant 1 : index
    %c0_47 = arith.constant 0 : index
    %c0_48 = arith.constant 0 : index
    %56 = vector.load %arg3[%c1_46, %c0_47, %c0_48] : memref<9x8x16xbf16, #tpu.memory_space<vmem>>, vector<1x8x16xbf16>
    %57 = vector.shape_cast %56 : vector<1x8x16xbf16> to vector<8x16xbf16>
    %cst_49 = arith.constant dense<0.000000e+00> : vector<8x256xf32>
    %58 = tpu.matmul %57, %55, %cst_49 {dimension_numbers = #tpu.dot_dimension_numbers<[1], [0], [0], [1], [0, 0, 1, 1], [], []>} : vector<8x16xbf16>, vector<16x256xbf16>, vector<8x256xf32> -> vector<8x256xf32>
    %59 = arith.addf %54, %58 : vector<8x256xf32>
    %c0_50 = arith.constant 0 : index
    %c17_51 = arith.constant 17 : index
    %60 = vector.load %arg20[%c0_50, %c17_51] : memref<16x290xbf16, #tpu.memory_space<vmem>>, vector<16x256xbf16>
    %c4 = arith.constant 4 : index
    %c0_52 = arith.constant 0 : index
    %c0_53 = arith.constant 0 : index
    %61 = vector.load %arg3[%c4, %c0_52, %c0_53] : memref<9x8x16xbf16, #tpu.memory_space<vmem>>, vector<1x8x16xbf16>
    %62 = vector.shape_cast %61 : vector<1x8x16xbf16> to vector<8x16xbf16>
    %cst_54 = arith.constant dense<0.000000e+00> : vector<8x256xf32>
    %63 = tpu.matmul %62, %60, %cst_54 {dimension_numbers = #tpu.dot_dimension_numbers<[1], [0], [0], [1], [0, 0, 1, 1], [], []>} : vector<8x16xbf16>, vector<16x256xbf16>, vector<8x256xf32> -> vector<8x256xf32>
    %64 = arith.addf %59, %63 : vector<8x256xf32>
    %c0_55 = arith.constant 0 : index
    %c33 = arith.constant 33 : index
    %65 = vector.load %arg20[%c0_55, %c33] : memref<16x290xbf16, #tpu.memory_space<vmem>>, vector<16x256xbf16>
    %c7 = arith.constant 7 : index
    %c0_56 = arith.constant 0 : index
    %c0_57 = arith.constant 0 : index
    %66 = vector.load %arg3[%c7, %c0_56, %c0_57] : memref<9x8x16xbf16, #tpu.memory_space<vmem>>, vector<1x8x16xbf16>
    %67 = vector.shape_cast %66 : vector<1x8x16xbf16> to vector<8x16xbf16>
    %cst_58 = arith.constant dense<0.000000e+00> : vector<8x256xf32>
    %68 = tpu.matmul %67, %65, %cst_58 {dimension_numbers = #tpu.dot_dimension_numbers<[1], [0], [0], [1], [0, 0, 1, 1], [], []>} : vector<8x16xbf16>, vector<16x256xbf16>, vector<8x256xf32> -> vector<8x256xf32>
    %69 = arith.addf %64, %68 : vector<8x256xf32>
    %70 = arith.addf %53, %69 : vector<8x256xf32>
    %cst_59 = arith.constant 0.000000e+00 : f32
    %71 = vector.broadcast %cst_59 : f32 to vector<8x256xf32>
    %c0_60 = arith.constant 0 : index
    %c2 = arith.constant 2 : index
    %72 = vector.load %arg20[%c0_60, %c2] : memref<16x290xbf16, #tpu.memory_space<vmem>>, vector<16x256xbf16>
    %c2_61 = arith.constant 2 : index
    %c0_62 = arith.constant 0 : index
    %c0_63 = arith.constant 0 : index
    %73 = vector.load %arg3[%c2_61, %c0_62, %c0_63] : memref<9x8x16xbf16, #tpu.memory_space<vmem>>, vector<1x8x16xbf16>
    %74 = vector.shape_cast %73 : vector<1x8x16xbf16> to vector<8x16xbf16>
    %cst_64 = arith.constant dense<0.000000e+00> : vector<8x256xf32>
    %75 = tpu.matmul %74, %72, %cst_64 {dimension_numbers = #tpu.dot_dimension_numbers<[1], [0], [0], [1], [0, 0, 1, 1], [], []>} : vector<8x16xbf16>, vector<16x256xbf16>, vector<8x256xf32> -> vector<8x256xf32>
    %76 = arith.addf %71, %75 : vector<8x256xf32>
    %c0_65 = arith.constant 0 : index
    %c18 = arith.constant 18 : index
    %77 = vector.load %arg20[%c0_65, %c18] : memref<16x290xbf16, #tpu.memory_space<vmem>>, vector<16x256xbf16>
    %c5 = arith.constant 5 : index
    %c0_66 = arith.constant 0 : index
    %c0_67 = arith.constant 0 : index
    %78 = vector.load %arg3[%c5, %c0_66, %c0_67] : memref<9x8x16xbf16, #tpu.memory_space<vmem>>, vector<1x8x16xbf16>
    %79 = vector.shape_cast %78 : vector<1x8x16xbf16> to vector<8x16xbf16>
    %cst_68 = arith.constant dense<0.000000e+00> : vector<8x256xf32>
    %80 = tpu.matmul %79, %77, %cst_68 {dimension_numbers = #tpu.dot_dimension_numbers<[1], [0], [0], [1], [0, 0, 1, 1], [], []>} : vector<8x16xbf16>, vector<16x256xbf16>, vector<8x256xf32> -> vector<8x256xf32>
    %81 = arith.addf %76, %80 : vector<8x256xf32>
    %c0_69 = arith.constant 0 : index
    %c34 = arith.constant 34 : index
    %82 = vector.load %arg20[%c0_69, %c34] : memref<16x290xbf16, #tpu.memory_space<vmem>>, vector<16x256xbf16>
    %c8 = arith.constant 8 : index
    %c0_70 = arith.constant 0 : index
    %c0_71 = arith.constant 0 : index
    %83 = vector.load %arg3[%c8, %c0_70, %c0_71] : memref<9x8x16xbf16, #tpu.memory_space<vmem>>, vector<1x8x16xbf16>
    %84 = vector.shape_cast %83 : vector<1x8x16xbf16> to vector<8x16xbf16>
    %cst_72 = arith.constant dense<0.000000e+00> : vector<8x256xf32>
    %85 = tpu.matmul %84, %82, %cst_72 {dimension_numbers = #tpu.dot_dimension_numbers<[1], [0], [0], [1], [0, 0, 1, 1], [], []>} : vector<8x16xbf16>, vector<16x256xbf16>, vector<8x256xf32> -> vector<8x256xf32>
    %86 = arith.addf %81, %85 : vector<8x256xf32>
    %c1_73 = arith.constant 1 : index
    %c0_74 = arith.constant 0 : index
    %87 = vector.load %arg16[%c1_73, %c0_74] : memref<2x256xf32, #tpu.memory_space<vmem>>, vector<1x256xf32>
    %88 = vector.broadcast %87 : vector<1x256xf32> to vector<8x256xf32>
    %89 = arith.mulf %86, %88 : vector<8x256xf32>
    %90 = arith.addf %70, %89 : vector<8x256xf32>
    %c0_75 = arith.constant 0 : index
    %c0_76 = arith.constant 0 : index
    %91 = vector.load %arg4[%c0_75, %c0_76] : memref<8x1xf32, #tpu.memory_space<vmem>>, vector<8x1xf32>
    %92 = vector.broadcast %91 : vector<8x1xf32> to vector<8x256xf32>
    %93 = arith.addf %90, %92 : vector<8x256xf32>
    %cst_77 = arith.constant dense<0.000000e+00> : vector<8xf32>
    %94 = vector.multi_reduction <add>, %93, %cst_77 [1] : vector<8x256xf32> to vector<8xf32>
    %95 = vector.shape_cast %94 : vector<8xf32> to vector<8x1xf32>
    %96 = arith.mulf %93, %93 : vector<8x256xf32>
    %cst_78 = arith.constant dense<0.000000e+00> : vector<8xf32>
    %97 = vector.multi_reduction <add>, %96, %cst_78 [1] : vector<8x256xf32> to vector<8xf32>
    %98 = vector.shape_cast %97 : vector<8xf32> to vector<8x1xf32>
    %c0_79 = arith.constant 0 : index
    %c0_80 = arith.constant 0 : index
    %99 = vector.load %arg15[%c0_79, %c0_80] : memref<8x8xf32, #tpu.memory_space<vmem>>, vector<8x8xf32>
    %cst_81 = arith.constant dense<0.000000e+00> : vector<8x1xf32>
    %100 = tpu.matmul %99, %95, %cst_81 {dimension_numbers = #tpu.dot_dimension_numbers<[1], [0], [0], [1], [0, 0, 1, 1], [], []>} : vector<8x8xf32>, vector<8x1xf32>, vector<8x1xf32> -> vector<8x1xf32>
    %cst_82 = arith.constant 0.001953125 : f32
    %101 = vector.broadcast %cst_82 : f32 to vector<8x1xf32>
    %102 = arith.mulf %100, %101 : vector<8x1xf32>
    %cst_83 = arith.constant dense<0.000000e+00> : vector<8x1xf32>
    %103 = tpu.matmul %99, %98, %cst_83 {dimension_numbers = #tpu.dot_dimension_numbers<[1], [0], [0], [1], [0, 0, 1, 1], [], []>} : vector<8x8xf32>, vector<8x1xf32>, vector<8x1xf32> -> vector<8x1xf32>
    %cst_84 = arith.constant 0.001953125 : f32
    %104 = vector.broadcast %cst_84 : f32 to vector<8x1xf32>
    %105 = arith.mulf %103, %104 : vector<8x1xf32>
    %106 = arith.mulf %102, %102 : vector<8x1xf32>
    %107 = arith.subf %105, %106 : vector<8x1xf32>
    %cst_85 = arith.constant 9.99999974E-6 : f32
    %108 = vector.broadcast %cst_85 : f32 to vector<8x1xf32>
    %109 = arith.addf %107, %108 : vector<8x1xf32>
    %110 = math.rsqrt %109 : vector<8x1xf32>
    %c0_86 = arith.constant 0 : index
    %c0_87 = arith.constant 0 : index
    %111 = vector.load %arg5[%c0_86, %c0_87] : memref<8x1xf32, #tpu.memory_space<vmem>>, vector<8x1xf32>
    %112 = arith.mulf %110, %111 : vector<8x1xf32>
    %c0_88 = arith.constant 0 : index
    %c0_89 = arith.constant 0 : index
    %113 = vector.load %arg6[%c0_88, %c0_89] : memref<8x1xf32, #tpu.memory_space<vmem>>, vector<8x1xf32>
    %114 = arith.mulf %102, %112 : vector<8x1xf32>
    %115 = arith.subf %113, %114 : vector<8x1xf32>
    %116 = vector.broadcast %112 : vector<8x1xf32> to vector<8x256xf32>
    %117 = arith.mulf %93, %116 : vector<8x256xf32>
    %118 = vector.broadcast %115 : vector<8x1xf32> to vector<8x256xf32>
    %119 = arith.addf %117, %118 : vector<8x256xf32>
    %cst_90 = arith.constant 1.000000e+00 : f32
    %120 = vector.broadcast %cst_90 : f32 to vector<8x1xf32>
    %121 = arith.addf %25, %120 : vector<8x1xf32>
    %122 = vector.broadcast %121 : vector<8x1xf32> to vector<8x256xf32>
    %123 = arith.mulf %119, %122 : vector<8x256xf32>
    %124 = vector.broadcast %32 : vector<8x1xf32> to vector<8x256xf32>
    %125 = arith.addf %123, %124 : vector<8x256xf32>
    %cst_91 = arith.constant 0.000000e+00 : f32
    %126 = vector.broadcast %cst_91 : f32 to vector<8x256xf32>
    %127 = arith.subf %126, %125 : vector<8x256xf32>
    %128 = math.exp %127 : vector<8x256xf32>
    %cst_92 = arith.constant 1.000000e+00 : f32
    %129 = vector.broadcast %cst_92 : f32 to vector<8x256xf32>
    %130 = arith.addf %129, %128 : vector<8x256xf32>
    %131 = tpu.reciprocal %130 {approx = true} : vector<8x256xf32> -> vector<8x256xf32>
    %132 = arith.mulf %125, %131 : vector<8x256xf32>
    %133 = arith.truncf %132 : vector<8x256xf32> to vector<8x256xbf16>
    %c0_93 = arith.constant 0 : index
    %c17_94 = arith.constant 17 : index
    %134 = vector.load %arg21[%c0_93, %c17_94] : memref<8x290xbf16, #tpu.memory_space<vmem>>, vector<8x256xbf16>
    tpu.vector_store %arg21[%c0_93, %c17_94], %133 {strides = array<i32>} : memref<8x290xbf16, #tpu.memory_space<vmem>>, vector<8x256xbf16>,
    %cst_95 = arith.constant 0.000000e+00 : f32
    %135 = vector.broadcast %cst_95 : f32 to vector<8x256xf32>
    %cst_96 = arith.constant 0.000000e+00 : f32
    %136 = vector.broadcast %cst_96 : f32 to vector<8x256xf32>
    %c0_97 = arith.constant 0 : index
    %c0_98 = arith.constant 0 : index
    %137 = vector.load %arg21[%c0_97, %c0_98] : memref<8x290xbf16, #tpu.memory_space<vmem>>, vector<8x256xbf16>
    %c0_99 = arith.constant 0 : index
    %c0_100 = arith.constant 0 : index
    %c0_101 = arith.constant 0 : index
    %138 = vector.load %arg7[%c0_99, %c0_100, %c0_101] : memref<9x8x8xbf16, #tpu.memory_space<vmem>>, vector<1x8x8xbf16>
    %139 = vector.shape_cast %138 : vector<1x8x8xbf16> to vector<8x8xbf16>
    %cst_102 = arith.constant dense<0.000000e+00> : vector<8x256xf32>
    %140 = tpu.matmul %139, %137, %cst_102 {dimension_numbers = #tpu.dot_dimension_numbers<[1], [0], [0], [1], [0, 0, 1, 1], [], []>} : vector<8x8xbf16>, vector<8x256xbf16>, vector<8x256xf32> -> vector<8x256xf32>
    %141 = arith.addf %136, %140 : vector<8x256xf32>
    %c0_103 = arith.constant 0 : index
    %c16_104 = arith.constant 16 : index
    %142 = vector.load %arg21[%c0_103, %c16_104] : memref<8x290xbf16, #tpu.memory_space<vmem>>, vector<8x256xbf16>
    %c3_105 = arith.constant 3 : index
    %c0_106 = arith.constant 0 : index
    %c0_107 = arith.constant 0 : index
    %143 = vector.load %arg7[%c3_105, %c0_106, %c0_107] : memref<9x8x8xbf16, #tpu.memory_space<vmem>>, vector<1x8x8xbf16>
    %144 = vector.shape_cast %143 : vector<1x8x8xbf16> to vector<8x8xbf16>
    %cst_108 = arith.constant dense<0.000000e+00> : vector<8x256xf32>
    %145 = tpu.matmul %144, %142, %cst_108 {dimension_numbers = #tpu.dot_dimension_numbers<[1], [0], [0], [1], [0, 0, 1, 1], [], []>} : vector<8x8xbf16>, vector<8x256xbf16>, vector<8x256xf32> -> vector<8x256xf32>
    %146 = arith.addf %141, %145 : vector<8x256xf32>
    %c0_109 = arith.constant 0 : index
    %c32_110 = arith.constant 32 : index
    %147 = vector.load %arg21[%c0_109, %c32_110] : memref<8x290xbf16, #tpu.memory_space<vmem>>, vector<8x256xbf16>
    %c6_111 = arith.constant 6 : index
    %c0_112 = arith.constant 0 : index
    %c0_113 = arith.constant 0 : index
    %148 = vector.load %arg7[%c6_111, %c0_112, %c0_113] : memref<9x8x8xbf16, #tpu.memory_space<vmem>>, vector<1x8x8xbf16>
    %149 = vector.shape_cast %148 : vector<1x8x8xbf16> to vector<8x8xbf16>
    %cst_114 = arith.constant dense<0.000000e+00> : vector<8x256xf32>
    %150 = tpu.matmul %149, %147, %cst_114 {dimension_numbers = #tpu.dot_dimension_numbers<[1], [0], [0], [1], [0, 0, 1, 1], [], []>} : vector<8x8xbf16>, vector<8x256xbf16>, vector<8x256xf32> -> vector<8x256xf32>
    %151 = arith.addf %146, %150 : vector<8x256xf32>
    %c0_115 = arith.constant 0 : index
    %c0_116 = arith.constant 0 : index
    %152 = vector.load %arg16[%c0_115, %c0_116] : memref<2x256xf32, #tpu.memory_space<vmem>>, vector<1x256xf32>
    %153 = vector.broadcast %152 : vector<1x256xf32> to vector<8x256xf32>
    %154 = arith.mulf %151, %153 : vector<8x256xf32>
    %155 = arith.addf %135, %154 : vector<8x256xf32>
    %cst_117 = arith.constant 0.000000e+00 : f32
    %156 = vector.broadcast %cst_117 : f32 to vector<8x256xf32>
    %c0_118 = arith.constant 0 : index
    %c1_119 = arith.constant 1 : index
    %157 = vector.load %arg21[%c0_118, %c1_119] : memref<8x290xbf16, #tpu.memory_space<vmem>>, vector<8x256xbf16>
    %c1_120 = arith.constant 1 : index
    %c0_121 = arith.constant 0 : index
    %c0_122 = arith.constant 0 : index
    %158 = vector.load %arg7[%c1_120, %c0_121, %c0_122] : memref<9x8x8xbf16, #tpu.memory_space<vmem>>, vector<1x8x8xbf16>
    %159 = vector.shape_cast %158 : vector<1x8x8xbf16> to vector<8x8xbf16>
    %cst_123 = arith.constant dense<0.000000e+00> : vector<8x256xf32>
    %160 = tpu.matmul %159, %157, %cst_123 {dimension_numbers = #tpu.dot_dimension_numbers<[1], [0], [0], [1], [0, 0, 1, 1], [], []>} : vector<8x8xbf16>, vector<8x256xbf16>, vector<8x256xf32> -> vector<8x256xf32>
    %161 = arith.addf %156, %160 : vector<8x256xf32>
    %c0_124 = arith.constant 0 : index
    %c17_125 = arith.constant 17 : index
    %162 = vector.load %arg21[%c0_124, %c17_125] : memref<8x290xbf16, #tpu.memory_space<vmem>>, vector<8x256xbf16>
    %c4_126 = arith.constant 4 : index
    %c0_127 = arith.constant 0 : index
    %c0_128 = arith.constant 0 : index
    %163 = vector.load %arg7[%c4_126, %c0_127, %c0_128] : memref<9x8x8xbf16, #tpu.memory_space<vmem>>, vector<1x8x8xbf16>
    %164 = vector.shape_cast %163 : vector<1x8x8xbf16> to vector<8x8xbf16>
    %cst_129 = arith.constant dense<0.000000e+00> : vector<8x256xf32>
    %165 = tpu.matmul %164, %162, %cst_129 {dimension_numbers = #tpu.dot_dimension_numbers<[1], [0], [0], [1], [0, 0, 1, 1], [], []>} : vector<8x8xbf16>, vector<8x256xbf16>, vector<8x256xf32> -> vector<8x256xf32>
    %166 = arith.addf %161, %165 : vector<8x256xf32>
    %c0_130 = arith.constant 0 : index
    %c33_131 = arith.constant 33 : index
    %167 = vector.load %arg21[%c0_130, %c33_131] : memref<8x290xbf16, #tpu.memory_space<vmem>>, vector<8x256xbf16>
    %c7_132 = arith.constant 7 : index
    %c0_133 = arith.constant 0 : index
    %c0_134 = arith.constant 0 : index
    %168 = vector.load %arg7[%c7_132, %c0_133, %c0_134] : memref<9x8x8xbf16, #tpu.memory_space<vmem>>, vector<1x8x8xbf16>
    %169 = vector.shape_cast %168 : vector<1x8x8xbf16> to vector<8x8xbf16>
    %cst_135 = arith.constant dense<0.000000e+00> : vector<8x256xf32>
    %170 = tpu.matmul %169, %167, %cst_135 {dimension_numbers = #tpu.dot_dimension_numbers<[1], [0], [0], [1], [0, 0, 1, 1], [], []>} : vector<8x8xbf16>, vector<8x256xbf16>, vector<8x256xf32> -> vector<8x256xf32>
    %171 = arith.addf %166, %170 : vector<8x256xf32>
    %172 = arith.addf %155, %171 : vector<8x256xf32>
    %cst_136 = arith.constant 0.000000e+00 : f32
    %173 = vector.broadcast %cst_136 : f32 to vector<8x256xf32>
    %c0_137 = arith.constant 0 : index
    %c2_138 = arith.constant 2 : index
    %174 = vector.load %arg21[%c0_137, %c2_138] : memref<8x290xbf16, #tpu.memory_space<vmem>>, vector<8x256xbf16>
    %c2_139 = arith.constant 2 : index
    %c0_140 = arith.constant 0 : index
    %c0_141 = arith.constant 0 : index
    %175 = vector.load %arg7[%c2_139, %c0_140, %c0_141] : memref<9x8x8xbf16, #tpu.memory_space<vmem>>, vector<1x8x8xbf16>
    %176 = vector.shape_cast %175 : vector<1x8x8xbf16> to vector<8x8xbf16>
    %cst_142 = arith.constant dense<0.000000e+00> : vector<8x256xf32>
    %177 = tpu.matmul %176, %174, %cst_142 {dimension_numbers = #tpu.dot_dimension_numbers<[1], [0], [0], [1], [0, 0, 1, 1], [], []>} : vector<8x8xbf16>, vector<8x256xbf16>, vector<8x256xf32> -> vector<8x256xf32>
    %178 = arith.addf %173, %177 : vector<8x256xf32>
    %c0_143 = arith.constant 0 : index
    %c18_144 = arith.constant 18 : index
    %179 = vector.load %arg21[%c0_143, %c18_144] : memref<8x290xbf16, #tpu.memory_space<vmem>>, vector<8x256xbf16>
    %c5_145 = arith.constant 5 : index
    %c0_146 = arith.constant 0 : index
    %c0_147 = arith.constant 0 : index
    %180 = vector.load %arg7[%c5_145, %c0_146, %c0_147] : memref<9x8x8xbf16, #tpu.memory_space<vmem>>, vector<1x8x8xbf16>
    %181 = vector.shape_cast %180 : vector<1x8x8xbf16> to vector<8x8xbf16>
    %cst_148 = arith.constant dense<0.000000e+00> : vector<8x256xf32>
    %182 = tpu.matmul %181, %179, %cst_148 {dimension_numbers = #tpu.dot_dimension_numbers<[1], [0], [0], [1], [0, 0, 1, 1], [], []>} : vector<8x8xbf16>, vector<8x256xbf16>, vector<8x256xf32> -> vector<8x256xf32>
    %183 = arith.addf %178, %182 : vector<8x256xf32>
    %c0_149 = arith.constant 0 : index
    %c34_150 = arith.constant 34 : index
    %184 = vector.load %arg21[%c0_149, %c34_150] : memref<8x290xbf16, #tpu.memory_space<vmem>>, vector<8x256xbf16>
    %c8_151 = arith.constant 8 : index
    %c0_152 = arith.constant 0 : index
    %c0_153 = arith.constant 0 : index
    %185 = vector.load %arg7[%c8_151, %c0_152, %c0_153] : memref<9x8x8xbf16, #tpu.memory_space<vmem>>, vector<1x8x8xbf16>
    %186 = vector.shape_cast %185 : vector<1x8x8xbf16> to vector<8x8xbf16>
    %cst_154 = arith.constant dense<0.000000e+00> : vector<8x256xf32>
    %187 = tpu.matmul %186, %184, %cst_154 {dimension_numbers = #tpu.dot_dimension_numbers<[1], [0], [0], [1], [0, 0, 1, 1], [], []>} : vector<8x8xbf16>, vector<8x256xbf16>, vector<8x256xf32> -> vector<8x256xf32>
    %188 = arith.addf %183, %187 : vector<8x256xf32>
    %c1_155 = arith.constant 1 : index
    %c0_156 = arith.constant 0 : index
    %189 = vector.load %arg16[%c1_155, %c0_156] : memref<2x256xf32, #tpu.memory_space<vmem>>, vector<1x256xf32>
    %190 = vector.broadcast %189 : vector<1x256xf32> to vector<8x256xf32>
    %191 = arith.mulf %188, %190 : vector<8x256xf32>
    %192 = arith.addf %172, %191 : vector<8x256xf32>
    %c0_157 = arith.constant 0 : index
    %c0_158 = arith.constant 0 : index
    %193 = vector.load %arg8[%c0_157, %c0_158] : memref<8x1xf32, #tpu.memory_space<vmem>>, vector<8x1xf32>
    %194 = vector.broadcast %193 : vector<8x1xf32> to vector<8x256xf32>
    %195 = arith.addf %192, %194 : vector<8x256xf32>
    %cst_159 = arith.constant dense<0.000000e+00> : vector<8xf32>
    %196 = vector.multi_reduction <add>, %195, %cst_159 [1] : vector<8x256xf32> to vector<8xf32>
    %197 = vector.shape_cast %196 : vector<8xf32> to vector<8x1xf32>
    %198 = arith.mulf %195, %195 : vector<8x256xf32>
    %cst_160 = arith.constant dense<0.000000e+00> : vector<8xf32>
    %199 = vector.multi_reduction <add>, %198, %cst_160 [1] : vector<8x256xf32> to vector<8xf32>
    %200 = vector.shape_cast %199 : vector<8xf32> to vector<8x1xf32>
    %c0_161 = arith.constant 0 : index
    %c0_162 = arith.constant 0 : index
    %201 = vector.load %arg15[%c0_161, %c0_162] : memref<8x8xf32, #tpu.memory_space<vmem>>, vector<8x8xf32>
    %cst_163 = arith.constant dense<0.000000e+00> : vector<8x1xf32>
    %202 = tpu.matmul %201, %197, %cst_163 {dimension_numbers = #tpu.dot_dimension_numbers<[1], [0], [0], [1], [0, 0, 1, 1], [], []>} : vector<8x8xf32>, vector<8x1xf32>, vector<8x1xf32> -> vector<8x1xf32>
    %cst_164 = arith.constant 0.001953125 : f32
    %203 = vector.broadcast %cst_164 : f32 to vector<8x1xf32>
    %204 = arith.mulf %202, %203 : vector<8x1xf32>
    %cst_165 = arith.constant dense<0.000000e+00> : vector<8x1xf32>
    %205 = tpu.matmul %201, %200, %cst_165 {dimension_numbers = #tpu.dot_dimension_numbers<[1], [0], [0], [1], [0, 0, 1, 1], [], []>} : vector<8x8xf32>, vector<8x1xf32>, vector<8x1xf32> -> vector<8x1xf32>
    %cst_166 = arith.constant 0.001953125 : f32
    %206 = vector.broadcast %cst_166 : f32 to vector<8x1xf32>
    %207 = arith.mulf %205, %206 : vector<8x1xf32>
    %208 = arith.mulf %204, %204 : vector<8x1xf32>
    %209 = arith.subf %207, %208 : vector<8x1xf32>
    %cst_167 = arith.constant 9.99999974E-6 : f32
    %210 = vector.broadcast %cst_167 : f32 to vector<8x1xf32>
    %211 = arith.addf %209, %210 : vector<8x1xf32>
    %212 = math.rsqrt %211 : vector<8x1xf32>
    %c0_168 = arith.constant 0 : index
    %c0_169 = arith.constant 0 : index
    %213 = vector.load %arg9[%c0_168, %c0_169] : memref<8x1xf32, #tpu.memory_space<vmem>>, vector<8x1xf32>
    %214 = arith.mulf %212, %213 : vector<8x1xf32>
    %c0_170 = arith.constant 0 : index
    %c0_171 = arith.constant 0 : index
    %215 = vector.load %arg10[%c0_170, %c0_171] : memref<8x1xf32, #tpu.memory_space<vmem>>, vector<8x1xf32>
    %216 = arith.mulf %204, %214 : vector<8x1xf32>
    %217 = arith.subf %215, %216 : vector<8x1xf32>
    %218 = vector.broadcast %214 : vector<8x1xf32> to vector<8x256xf32>
    %219 = arith.mulf %195, %218 : vector<8x256xf32>
    %220 = vector.broadcast %217 : vector<8x1xf32> to vector<8x256xf32>
    %221 = arith.addf %219, %220 : vector<8x256xf32>
    %cst_172 = arith.constant 0.000000e+00 : f32
    %222 = vector.broadcast %cst_172 : f32 to vector<8x256xf32>
    %223 = arith.subf %222, %221 : vector<8x256xf32>
    %224 = math.exp %223 : vector<8x256xf32>
    %cst_173 = arith.constant 1.000000e+00 : f32
    %225 = vector.broadcast %cst_173 : f32 to vector<8x256xf32>
    %226 = arith.addf %225, %224 : vector<8x256xf32>
    %227 = tpu.reciprocal %226 {approx = true} : vector<8x256xf32> -> vector<8x256xf32>
    %228 = arith.mulf %221, %227 : vector<8x256xf32>
    %c0_174 = arith.constant 0 : index
    %c17_175 = arith.constant 17 : index
    %229 = vector.load %arg20[%c0_174, %c17_175] : memref<16x290xbf16, #tpu.memory_space<vmem>>, vector<16x256xbf16>
    %c0_176 = arith.constant 0 : index
    %c0_177 = arith.constant 0 : index
    %230 = vector.load %arg17[%c0_176, %c0_177] : memref<8x16xbf16, #tpu.memory_space<vmem>>, vector<8x16xbf16>
    %cst_178 = arith.constant dense<0.000000e+00> : vector<8x256xf32>
    %231 = tpu.matmul %230, %229, %cst_178 {dimension_numbers = #tpu.dot_dimension_numbers<[1], [0], [0], [1], [0, 0, 1, 1], [], []>} : vector<8x16xbf16>, vector<16x256xbf16>, vector<8x256xf32> -> vector<8x256xf32>
    %c0_179 = arith.constant 0 : index
    %c0_180 = arith.constant 0 : index
    %232 = vector.load %arg18[%c0_179, %c0_180] : memref<8x1xf32, #tpu.memory_space<vmem>>, vector<8x1xf32>
    %233 = vector.broadcast %232 : vector<8x1xf32> to vector<8x256xf32>
    %234 = arith.addf %231, %233 : vector<8x256xf32>
    %235 = arith.addf %228, %234 : vector<8x256xf32>
    %c0_181 = arith.constant 0 : index
    %c0_182 = arith.constant 0 : index
    %c0_183 = arith.constant 0 : index
    %236 = vector.load %arg19[%c0_181, %c0_182, %c0_183] : memref<1x8x256xf32, #tpu.memory_space<vmem>>, vector<1x8x256xf32>
    %237 = vector.shape_cast %236 : vector<1x8x256xf32> to vector<8x256xf32>
    %238 = vector.shape_cast %235 : vector<8x256xf32> to vector<1x8x256xf32>
    tpu.vector_store %arg19[%c0_181, %c0_182, %c0_183], %238 {strides = array<i32>} : memref<1x8x256xf32, #tpu.memory_space<vmem>>, vector<1x8x256xf32>,
    return
  }
  func.func @transform_0(%arg0: i32) -> (i32, i32, i32) {
    %c0_i32 = arith.constant 0 : i32
    %c0_i32_0 = arith.constant 0 : i32
    %c0_i32_1 = arith.constant 0 : i32
    return %arg0, %c0_i32, %c0_i32_0 : i32, i32, i32
  }
  func.func @transform_1(%arg0: i32) -> (i32, i32, i32) {
    %c0_i32 = arith.constant 0 : i32
    %c0_i32_0 = arith.constant 0 : i32
    %c0_i32_1 = arith.constant 0 : i32
    return %arg0, %c0_i32, %c0_i32_0 : i32, i32, i32
  }
  func.func @transform_2(%arg0: i32) -> (i32, i32, i32) {
    %c0_i32 = arith.constant 0 : i32
    %c0_i32_0 = arith.constant 0 : i32
    %c0_i32_1 = arith.constant 0 : i32
    %c0_i32_2 = arith.constant 0 : i32
    return %c0_i32, %c0_i32_0, %c0_i32_1 : i32, i32, i32
  }
  func.func @transform_3(%arg0: i32) -> (i32, i32) {
    %c0_i32 = arith.constant 0 : i32
    %c0_i32_0 = arith.constant 0 : i32
    %c0_i32_1 = arith.constant 0 : i32
    return %c0_i32, %c0_i32_0 : i32, i32
  }
  func.func @transform_4(%arg0: i32) -> (i32, i32) {
    %c0_i32 = arith.constant 0 : i32
    %c0_i32_0 = arith.constant 0 : i32
    %c0_i32_1 = arith.constant 0 : i32
    return %c0_i32, %c0_i32_0 : i32, i32
  }
  func.func @transform_5(%arg0: i32) -> (i32, i32) {
    %c0_i32 = arith.constant 0 : i32
    %c0_i32_0 = arith.constant 0 : i32
    %c0_i32_1 = arith.constant 0 : i32
    return %c0_i32, %c0_i32_0 : i32, i32
  }
  func.func @transform_6(%arg0: i32) -> (i32, i32, i32) {
    %c0_i32 = arith.constant 0 : i32
    %c0_i32_0 = arith.constant 0 : i32
    %c0_i32_1 = arith.constant 0 : i32
    %c0_i32_2 = arith.constant 0 : i32
    return %c0_i32, %c0_i32_0, %c0_i32_1 : i32, i32, i32
  }
  func.func @transform_7(%arg0: i32) -> (i32, i32) {
    %c0_i32 = arith.constant 0 : i32
    %c0_i32_0 = arith.constant 0 : i32
    %c0_i32_1 = arith.constant 0 : i32
    return %c0_i32, %c0_i32_0 : i32, i32
  }
  func.func @transform_8(%arg0: i32) -> (i32, i32) {
    %c0_i32 = arith.constant 0 : i32
    %c0_i32_0 = arith.constant 0 : i32
    %c0_i32_1 = arith.constant 0 : i32
    return %c0_i32, %c0_i32_0 : i32, i32
  }
  func.func @transform_9(%arg0: i32) -> (i32, i32) {
    %c0_i32 = arith.constant 0 : i32
    %c0_i32_0 = arith.constant 0 : i32
    %c0_i32_1 = arith.constant 0 : i32
    return %c0_i32, %c0_i32_0 : i32, i32
  }
  func.func @transform_10(%arg0: i32) -> (i32, i32) {
    %c0_i32 = arith.constant 0 : i32
    %c0_i32_0 = arith.constant 0 : i32
    %c0_i32_1 = arith.constant 0 : i32
    return %c0_i32, %c0_i32_0 : i32, i32
  }
  func.func @transform_11(%arg0: i32) -> (i32, i32) {
    %c0_i32 = arith.constant 0 : i32
    %c0_i32_0 = arith.constant 0 : i32
    %c0_i32_1 = arith.constant 0 : i32
    return %c0_i32, %c0_i32_0 : i32, i32
  }
  func.func @transform_12(%arg0: i32) -> (i32, i32) {
    %c0_i32 = arith.constant 0 : i32
    %c0_i32_0 = arith.constant 0 : i32
    %c0_i32_1 = arith.constant 0 : i32
    return %c0_i32, %c0_i32_0 : i32, i32
  }
  func.func @transform_13(%arg0: i32) -> (i32, i32) {
    %c0_i32 = arith.constant 0 : i32
    %c0_i32_0 = arith.constant 0 : i32
    %c0_i32_1 = arith.constant 0 : i32
    return %c0_i32, %c0_i32_0 : i32, i32
  }
  func.func @transform_14(%arg0: i32) -> (i32, i32) {
    %c0_i32 = arith.constant 0 : i32
    %c0_i32_0 = arith.constant 0 : i32
    %c0_i32_1 = arith.constant 0 : i32
    return %c0_i32, %c0_i32_0 : i32, i32
  }
  func.func @transform_15(%arg0: i32) -> (i32, i32) {
    %c0_i32 = arith.constant 0 : i32
    %c0_i32_0 = arith.constant 0 : i32
    %c0_i32_1 = arith.constant 0 : i32
    return %c0_i32, %c0_i32_0 : i32, i32
  }
  func.func @transform_16(%arg0: i32) -> (i32, i32) {
    %c0_i32 = arith.constant 0 : i32
    %c0_i32_0 = arith.constant 0 : i32
    %c0_i32_1 = arith.constant 0 : i32
    return %c0_i32, %c0_i32_0 : i32, i32
  }
  func.func @transform_17(%arg0: i32) -> (i32, i32) {
    %c0_i32 = arith.constant 0 : i32
    %c0_i32_0 = arith.constant 0 : i32
    %c0_i32_1 = arith.constant 0 : i32
    return %c0_i32, %c0_i32_0 : i32, i32
  }
  func.func @transform_18(%arg0: i32) -> (i32, i32, i32) {
    %c0_i32 = arith.constant 0 : i32
    %c0_i32_0 = arith.constant 0 : i32
    %c0_i32_1 = arith.constant 0 : i32
    return %arg0, %c0_i32, %c0_i32_0 : i32, i32, i32
  }
}

</mosaic_0001>

<bundles_post_ra>
// kernel: tpu_custom_call.1
= control target key start
LH: loop header
LB: loop body
LE: loop exit
PB: predicated region body
PF: predicated region fallthrough
CT: control target
= control target key end

     0   :  { %s3326_s0 = inlined_call_operand.vmem [shape: f32[2,16,256], index: 0, kind: input, shape index: {}]   ;;  %s3327_s1 = inlined_call_operand.hbm [shape: f32[2,1,32], index: 1, kind: input, shape index: {}]   ;;  %s3328_s2 = inlined_call_operand.vmem [shape: bf16[9,8,16], index: 2, kind: input, shape index: {}]   ;;  %s3329_s3 = inlined_call_operand.vmem [shape: f32[8,1], index: 3, kind: input, shape index: {}]   ;;  %s3330_s4 = inlined_call_operand.vmem [shape: f32[8,1], index: 4, kind: input, shape index: {}]   ;;  %s3331_s5 = inlined_call_operand.vmem [shape: f32[8,1], index: 5, kind: input, shape index: {}]   ;;  %s3332_s6 = inlined_call_operand.vmem [shape: bf16[9,8,8], index: 6, kind: input, shape index: {}]   ;;  %s3333_s7 = inlined_call_operand.vmem [shape: f32[8,1], index: 7, kind: input, shape index: {}]   ;;  %s3334_s8 = inlined_call_operand.vmem [shape: f32[8,1], index: 8, kind: input, shape index: {}]   ;;  %s3335_s9 = inlined_call_operand.vmem [shape: f32[8,1], index: 9, kind: input, shape index: {}]   ;;  %s3336_s10 = inlined_call_operand.vmem [shape: f32[8,32], index: 10, kind: input, shape index: {}]   ;;  %s3337_s11 = inlined_call_operand.vmem [shape: f32[8,1], index: 11, kind: input, shape index: {}]   ;;  %s3338_s12 = inlined_call_operand.vmem [shape: f32[8,32], index: 12, kind: input, shape index: {}]   ;;  %s3339_s13 = inlined_call_operand.vmem [shape: f32[8,1], index: 13, kind: input, shape index: {}]   ;;  %s3340_s14 = inlined_call_operand.vmem [shape: f32[8,8], index: 14, kind: input, shape index: {}]   ;;  %s3341_s15 = inlined_call_operand.vmem [shape: f32[2,256], index: 15, kind: input, shape index: {}]   ;;  %s3342_s16 = inlined_call_operand.vmem [shape: bf16[8,16], index: 16, kind: input, shape index: {}]   ;;  %s3343_s17 = inlined_call_operand.vmem [shape: f32[8,1], index: 17, kind: input, shape index: {}]   ;;  %s3344_s18 = inlined_call_operand.hbm [shape: f32[2,8,256], index: 18, kind: output, shape index: {}]  }
   0x1   :  { %3371 = sst [smem:[#allocation16_spill]] %s3326_s0 }
   0x2   :  { %3372 = sst [smem:[#allocation17_spill]] %s3327_s1 }
   0x3   :  { %3373 = sst [smem:[#allocation18_spill]] %s3328_s2 }
   0x4   :  { %3374 = sst [smem:[#allocation19_spill]] %s3329_s3 }
   0x5   :  { %3375 = sst [smem:[#allocation20_spill]] %s3344_s18 }
   0x6   :  { %23 = vsyncpa [#allocation5], 0 }
   0x7   :  { %25 = vsyncpa [#allocation5 + $0x1], 0 }
   0x8   :  { %26 = vsyncpa [#allocation6], 0 }
   0x9   :  { %28 = vsyncpa [#allocation6 + $0x1], 0  ;;  %s2814_s27 = smov 0   ;;  %s2816_s28 = smov 0  }
   0xa   :  { %s2818_s29 = smov 0   ;;  %s2820_s30 = smov 0  }
   0xb LB: > { %3376 = sst [smem:[#allocation10_spill]] %s2691_s27  ;;  %s2835_s0 = sadd.s32 4294967295, %s2703_s30   ;;  %s2703_s30 = sphi %s2820_s30, %s3407_s30   ;;  %s2699_s29 = sphi %s2818_s29, %s3409_s29   ;;  %s2695_s28 = sphi %s2816_s28, %s3411_s28   ;;  %s2691_s27 = sphi %s2814_s27, %s3410_s27  }
   0xc   : > { %3377 = sst [smem:[#allocation11_spill]] %s2699_s29  ;;  %s2390_s19 = sadd.s32 4294967294, %s2703_s30  }
   0xd   : > { %s2839_s1 = sadd.s32 1, %s2703_s30   ;;  %s67_s20 = sadd.s32 1, %s2699_s29 }
   0xe   : > { %3378 = sst [smem:[#allocation12_spill]] %s2839_s1  ;;  %s64_s21 = ssub.s32 %s2703_s30, %s2839_s1 }
   0xf   : > { %p74_p0 = scmp.ne.s32.totalorder %s2699_s29, %s2695_s28  ;;  %p65_p1 = scmp.eq.s32.totalorder %s64_s21, 0 }
  0x10   : > { %p75_p2 = scmp.eq.s32.totalorder %s2703_s30, 0  ;;  %p80_p3 = scmp.ne.s32.totalorder %s2695_s28, %s2691_s27 }
  0x11   : > { %p81_p4 = scmp.eq.s32.totalorder %s2835_s0, 0  ;;  %p440_p7 = scmp.eq.s32.totalorder %s2835_s0, 1 }
  0x12   : > { %s2851_s22 = scalar_select %p65_p1, %s2699_s29, %s67_s20  }
  0x13   : > { %p2853_p5 = por %p75_p2, %p74_p0  ;;  %p2857_p6 = por %p81_p4, %p80_p3 }
  0x14   : > { %3379 = sst [smem:[#allocation13_spill]] %s2851_s22  ;;  %p446_p8 = scmp.eq.s32.totalorder %s2390_s19, 1 }
  0x15   : > { %p2532_p10 = scmp.lt.s32.totalorder %s2703_s30, 2  ;;  %p2864_p11 = por %p440_p7, %p74_p0 }
  0x16   : > { %p2868_p12 = por %p446_p8, %p80_p3  ;;  %s522_s26 = sand.u32 1, %s2699_s29  }
  0x17   : > { %s3382_s24 = scalar_select %p2864_p11, 1, 0 }
  0x18   : > { %s3384_s25 = scalar_select %p2868_p12, 1, 0 }
  0x19   : > { %3383 = sst [smem:[#allocation14_spill]] %s3382_s24  ;;  %s2393_s20 = sshll.u32 %s2703_s30, 4 }
  0x1a   : > { %3385 = sst [smem:[#allocation15_spill]] %s3384_s25  ;;  %s3386_s1 = sld [smem:[#allocation17_spill]] }
  0x1b   : > { %s525_s19 = scalar_lea.vmem [#allocation4], %s522_s26  ;;  %p2883_p13 = pnand %p2532_p10, %p2853_p5 }
  0x1c   : > { %s532_s18 = sshll.u32 %s525_s19, 4  ;;  %s523_s22 = scalar_lea.sflag [#allocation5], %s522_s26  ;;  %s2879_s18 = int_to_ptr.vmem [resolvable:$true] %s532_s18 }
  0x1d   : > { %p2609_p3 = pneg %p2883_p13 }
  0x20   : > { %s2877_s27 = scalar_lea.hbm %s3386_s1, %s2393_s20  ;;  %s2612_s2 = scalar_lea.hbm %s3386_s1, 32 }
  0x21   : > { %s2607_s20 = scalar_lea.hbm %s2877_s27, 16  ;;  %p2613_p5 = scmp.lt.u32.totalorder %s2877_s27, %s3386_s1 }
  0x22   : > { %p2608_p2 = scmp.ne.s32.totalorder %s2877_s27, %s2607_s20  ;;  %p2614_p8 = scmp.lt.u32.totalorder %s2612_s2, %s2607_s20 }
  0x23   : > { %p2616_p9 = scmp.lt.u32.totalorder %s2607_s20, %s2877_s27 }
  0x24   : > { %p2610_p4 = pnand %p2609_p3, %p2608_p2  ;;  %p2615_p10 = por %p2614_p8, %p2613_p5 }
  0x26   : > { %p2611_p7 = pneg %p2610_p4  ;;  %p2617_p0 = por %p2616_p9, %p2615_p10 }
  0x28   : > { %p2618_p1 = pnand %p2617_p0, %p2611_p7 }
  0x2a   : > { %2621 = shalt.err (!%p2618_p1)
}
  0x2b   : > { %s2622_s26 = scalar_lea.vmem %s2879_s18, 16  ;;  %s2705_s21 = smov [#allocation4]  }
  0x2c   : > { %p2623_p2 = scmp.ne.s32.totalorder %s2879_s18, %s2622_s26  ;;  %s2627_s19 = sshll.u32 %s2705_s21, 4  ;;  %s2628_s19 = int_to_ptr.vmem [resolvable:$false] %s2627_s19 }
  0x2d   : > { %s2629_s29 = scalar_lea.vmem %s2628_s19, 32  ;;  %p2630_p11 = scmp.lt.s32.totalorder %s2879_s18, %s2628_s19 }
  0x2e   : > { %p2625_p4 = pnand %p2623_p2, %p2609_p3  ;;  %p2631_p5 = scmp.lt.s32.totalorder %s2629_s29, %s2622_s26 }
  0x30   : > { %p2626_p12 = pneg %p2625_p4  ;;  %p2632_p8 = por %p2631_p5, %p2630_p11 }
  0x32   : > { %p2633_p9 = pnand %p2632_p8, %p2626_p12 }
  0x34   : > { %2636 = shalt.err (!%p2633_p9)
}
  0x35   : > { %2527 = dma.hbm_to_vmem [thread:$0]  (!%p2883_p13), %s2877_s27, 16, %s2879_s18, %s523_s22  }
  0x36   : > { %p3388_p0 = scmp.lt.s32.totalorder %s2703_s30, 3  ;;  %p3389_p1 = scmp.ge.s32.totalorder %s2703_s30, 1 }
  0x38   : > { %p538_p3 = pnand %p3389_p1, %p3388_p0 }
  0x39   : > { %s2919_s25 = sand.u32 (!%p538_p3), 1, %s2695_s28  }
  0x3a   : > { %541 = sbr.rel (%p538_p3) target bundleno = 2223 (0x8af), region = 92  ;;  %s544_s20 = scalar_lea.sflag (!%p538_p3), [#allocation5], %s2919_s25 }
  0x3b   : > { %s546_s2 = scalar_lea.vmem (!%p538_p3), [#allocation4], %s2919_s25 }
  0x41   : > { %2682 = dma.done.wait (%p2857_p6), %s544_s20, 16  }
  0x42   : > { %2684 = vsyncadd (%p2857_p6), %s544_s20, 4294967280  ;;  %p603_p11 = scmp.lt.s32.totalorder %s2835_s0, 1  ;;  %vm609_vm0 = vcmask 138240   ;;  %v2706_v0 = vmov 0   ;;  %vm611_vm1 = vcmask 277640   ;;  %s3390_s22 = sld [smem:[#allocation16_spill]] }
  0x43   : > { %610 = vst.msk [vmem:[#allocation2] sm:$0xff] %vm609_vm0, %v2706_v0  ;;  %722 = vmatprep.mubr.bf16.mxu0 %v2706_v0  ;;  %900 = vmatprep.mubr.bf16.mxu1 %v2706_v0  ;;  %s2707_s21 = smov 17   ;;  %vm634_vm2 = vcmask 1047688   ;;  %s2708_s19 = smov 112   ;;  %vm681_vm3 = vcmask 916480   ;;  %vm686_vm4 = vcmask 130048  }
  0x44   : > { %s604_s18 = scalar_select %p603_p11, %s2835_s0, 1  ;;  %612 = vst.msk [vmem:[#allocation2 + $0x10] sm:$0xff] %vm611_vm1, %v2706_v0  ;;  %2578 = vset.pattern.permute.xlu0 %v2706_v0  ;;  %2579 = vset.pattern.permute.xlu1 %v2706_v0  ;;  %vm783_vm5 = vcmask 785408   ;;  %vm1035_vm6 = vcmask 900096   ;;  %vm860_vm7 = vcmask 908288   ;;  %vm1090_vm8 = vcmask 1031168  }
  0x45   : > { %s3360_s29 = smov 96   ;;  %s3362_s20 = smov 110   ;;  %vm915_vm9 = vcmask 1039360   ;;  %vm972_vm10 = vcmask 777216   ;;  %vm1147_vm11 = vcmask 769024   ;;  %v2716_v62 = vmov 0.0  }
  0x46   : > { %s2457_s27 = sshll.u32 %s604_s18, 5  ;;  %s3368_s18 = smov 111   ;;  %vm2717_vm12 = vmmov 0   ;;  %vm653_vm13 = vcmask 261120   ;;  %vm1232_vm14 = vcmask 64512   ;;  %vm613_vm15 = vcmask 134144  }
  0x47   : > { %s3366_s23 = smov 127   ;;  %s3358_s24 = smov 95   ;;  %vm615_vm1 = vcmask 273544   ;;  %614 = vst.msk [vmem:[#allocation3] sm:$0xf] %vm613_vm15, %v2706_v0 }
  0x48   : > { %s607_s26 = scalar_lea.vmem %s3390_s22, %s2457_s27  ;;  %s3356_s27 = smov 126   ;;  %616 = vst.msk [vmem:[#allocation3 + $0x8] sm:$0xf] %vm615_vm1, %v2706_v0 }
  0x49   : > { %v617_v1 = vld [vmem:[%s607_s26] sm:$0xff]  ;;  %v619_v2 = vld [vmem:[%s607_s26 + $0x10] sm:$0xff]  ;;  %v618_v3 = vld [vmem:[%s607_s26 + $0x8] sm:$0xff]  ;;  %s3364_s22 = smov 94   ;;  %s3391_s3 = sld [smem:[#allocation19_spill]] }
  0x4a   : > { %v621_v4 = vpack.c.bf16 %v619_v2, %v617_v1  ;;  %v620_v5 = vld [vmem:[%s607_s26 + $0x18] sm:$0xff]  ;;  %v647_v2 = vlaneseq  ;;  %s3395_s26 = smov 110  }
  0x4b   : > { %v622_v6 = vpack.c.bf16 %v620_v5, %v618_v3 }
  0x4c   : > { %625 = vrot.lane.b32.xlu0 %v621_v4, %s2707_s21 }
  0x4f   : > { %v1215_v12 = vld [vmem:[%s3391_s3] sm:$0xff] }
  0x50   : > { %627 = vrot.lane.b32.xlu0 %v622_v6, %s2707_s21 }
  0xbe   : > { %v626_v7 = vpop.permute.xlu0 %625 }
  0xbf   : > { %635 = vst.msk [vmem:[#allocation2] sm:$0xff] %vm634_vm2, %v626_v7  ;;  %vm1441_vm2 = vcmask 1043592  }
  0xc2   : > { %v628_v8 = vpop.permute.xlu0 %627 }
  0xc3   : > { %v2942_v9 = vsel %vm609_vm0, %v626_v7, %v628_v8  ;;  %637 = vst.msk [vmem:[#allocation2 + $0x10] sm:$0xff] %vm609_vm0, %v628_v8 }
  0xc4   : > { %677 = vrot.lane.b32.xlu1 %v2942_v9, %s2708_s19 }
  0xc6   : > { %v2947_v10 = vld [vmem:[#allocation2] sm:$0xff] }
  0xc7   : > { %675 = vrot.lane.b32.xlu0 %v2947_v10, %s2708_s19 }
  0xca   : > { %v2951_v11 = vld [vmem:[#allocation2 + $0x10] sm:$0xff] }
  0xcb   : > { %781 = vrot.lane.b32.xlu0 %v2951_v11, %s3360_s29  ;;  %679 = vrot.lane.b32.xlu1 %v2951_v11, %s2708_s19 }
  0xcf   : > { %1029 = vrot.lane.b32.xlu0 %v2947_v10, %s3362_s20  ;;  %777 = vrot.lane.b32.xlu1 %v2947_v10, %s3360_s29 }
  0xd3   : > { %858 = vrot.lane.b32.xlu0 %v2951_v11, %s3368_s18  ;;  %779 = vrot.lane.b32.xlu1 %v2942_v9, %s3360_s29  ;;  %s3396_s29 = smov 96  }
  0xd7   : > { %1031 = vrot.lane.b32.xlu0 %v2942_v9, %s3362_s20  ;;  %1033 = vrot.lane.b32.xlu1 %v2951_v11, %s3362_s20  ;;  %s3392_s20 = sld [smem:[#allocation18_spill]] }
  0xdb   : > { %1084 = vrot.lane.b32.xlu0 %v2947_v10, %s3356_s27  ;;  %854 = vrot.lane.b32.xlu1 %v2947_v10, %s3368_s18 }
  0xdd   : > { %v2398_v19 = vld [vmem:[%s3392_s20 + $0xc] sm:$0xf]  ;;  %v668_v27 = vld [vmem:[%s3392_s20] sm:$0xf]  ;;  %v2401_v38 = vld [vmem:[%s3392_s20 + $0x18] sm:$0xf] }
  0xde   : > { %v2404_v39 = vld [vmem:[%s3392_s20 + $0x10] sm:$0xf]  ;;  %v2403_v48 = vld [vmem:[%s3392_s20 + $0x4] sm:$0xf]  ;;  %v2410_v50 = vld [vmem:[%s3392_s20 + $0x14] sm:$0xf] }
  0xdf   : > { %913 = vrot.lane.b32.xlu0 %v2951_v11, %s3366_s23  ;;  %1088 = vrot.lane.b32.xlu1 %v2951_v11, %s3356_s27  ;;  %v2407_v57 = vld [vmem:[%s3392_s20 + $0x1c] sm:$0xf]  ;;  %v2409_v59 = vld [vmem:[%s3392_s20 + $0x8] sm:$0xf] }
  0xe0   : > { %v2413_v61 = vld [vmem:[%s3392_s20 + $0x20] sm:$0xf] }
  0xe3   : > { %1086 = vrot.lane.b32.xlu0 %v2942_v9, %s3356_s27  ;;  %856 = vrot.lane.b32.xlu1 %v2942_v9, %s3368_s18  ;;  %s3393_s18 = smov 111   ;;  %s3397_s27 = smov 126  }
  0xe7   : > { %966 = vrot.lane.b32.xlu0 %v2947_v10, %s3358_s24  ;;  %909 = vrot.lane.b32.xlu1 %v2947_v10, %s3366_s23 }
  0xeb   : > { %968 = vrot.lane.b32.xlu0 %v2942_v9, %s3358_s24  ;;  %911 = vrot.lane.b32.xlu1 %v2942_v9, %s3366_s23  ;;  %s3399_s23 = smov 94  }
  0xef   : > { %1145 = vrot.lane.b32.xlu0 %v2951_v11, %s3364_s22  ;;  %970 = vrot.lane.b32.xlu1 %v2951_v11, %s3358_s24 }
  0xf3   : > { %1143 = vrot.lane.b32.xlu1 %v2942_v9, %s3364_s22  ;;  %1218 = vperm.xlu0 %2578, %v1215_v12   ;;  %v648_v12 = vshrl.u32 %v647_v2, 7 }
  0xf7   : > { %1141 = vrot.lane.b32.xlu1 %v2947_v10, %s3364_s22 }
 0x136   : > { %v678_v14 = vpop.permute.xlu1 %677 }
 0x139   : > { %v676_v13 = vpop.permute.xlu0 %675 }
 0x13a   : > { %v682_v18 = vsel %vm681_vm3, %v676_v13, %v678_v14 }
 0x13d   : > { %v782_v15 = vpop.permute.xlu0 %781  ;;  %v680_v16 = vpop.permute.xlu1 %679 }
 0x13e   : > { %v683_v17 = vsel %vm681_vm3, %v678_v14, %v680_v16  ;;  %v3063_v14 = vsub.s32 0, %v648_v12 }
 0x13f   : > { %690 = vmatprep.subr.bf16.mxu0 %v683_v17  ;;  %v834_v17 = vld [vmem:[%s3341_s15] ss:$2 sm:$0x3] }
 0x140   : > { %691 = vmatpush1.bf16.msra.mxu0 %v682_v18  ;;  %v3068_v18 = vsub.s32 1, %v648_v12 }
 0x141   : > { %v1030_v20 = vpop.permute.xlu0 %1029  ;;  %v778_v21 = vpop.permute.xlu1 %777  ;;  %734 = vmatprep.subr.bf16.mxu0 %v2942_v9 }
 0x143   : > { %2399 = vmatmul.mubr.msk.bf16.vlgmr.msra.gmra.mrb[0].mxu0 %vm686_vm4, %v2398_v19 }
 0x144   : > { %735 = vmatpush1.bf16.msra.mxu0 %v2947_v10  ;;  %766 = vmatprep.mubr.bf16.mxu0 %v2706_v0 }
 0x145   : > { %v859_v22 = vpop.permute.xlu0 %858  ;;  %v780_v23 = vpop.permute.xlu1 %779 }
 0x146   : > { %v785_v24 = vsel %vm783_vm5, %v780_v23, %v782_v15  ;;  %v784_v30 = vsel %vm783_vm5, %v778_v21, %v780_v23  ;;  %v843_v23 = vrot.slane %v834_v17, %v3068_v18 }
 0x147   : > { %791 = vmatprep.subr.bf16.mxu0 %v785_v24 }
 0x149   : > { %v1032_v25 = vpop.permute.xlu0 %1031  ;;  %v1034_v26 = vpop.permute.xlu1 %1033 }
 0x14a   : > { %v1037_v31 = vsel %vm1035_vm6, %v1032_v25, %v1034_v26  ;;  %v1036_v42 = vsel %vm1035_vm6, %v1030_v20, %v1032_v25 }
 0x14d   : > { %v1085_v28 = vpop.permute.xlu0 %1084  ;;  %v855_v29 = vpop.permute.xlu1 %854 }
 0x14f   : > { %2400 = vmatmul.mubr.msk.bf16.vlgmr.msra.gmra.mrb[0].mxu0 %vm686_vm4, %v668_v27 }
 0x150   : > { %792 = vmatpush1.bf16.msra.mxu0 %v784_v30  ;;  %823 = vmatprep.mubr.bf16.mxu0 %v2706_v0 }
 0x151   : > { %v914_v32 = vpop.permute.xlu0 %913  ;;  %1043 = vmatprep.subr.bf16.mxu0 %v1037_v31  ;;  %v1089_v33 = vpop.permute.xlu1 %1088 }
 0x155   : > { %v1087_v34 = vpop.permute.xlu0 %1086  ;;  %v857_v35 = vpop.permute.xlu1 %856 }
 0x156   : > { %v862_v36 = vsel %vm860_vm7, %v857_v35, %v859_v22  ;;  %v861_v37 = vsel %vm860_vm7, %v855_v29, %v857_v35  ;;  %v1092_v43 = vsel %vm1090_vm8, %v1087_v34, %v1089_v33  ;;  %v1091_v53 = vsel %vm1090_vm8, %v1085_v28, %v1087_v34  ;;  %v2415_v34 = vld [vmem:[%s3341_s15 + $0x1] ss:$2 sm:$0x3] }
 0x157   : > { %868 = vmatprep.subr.bf16.mxu1 %v862_v36  ;;  %v839_v22 = vrot.slane %v834_v17, %v3063_v14  ;;  %v1204_v35 = vrot.slane %v2415_v34, %v3063_v14  ;;  %v1208_v36 = vrot.slane %v2415_v34, %v3068_v18 }
 0x158   : > { %869 = vmatpush1.bf16.msra.mxu1 %v861_v37 }
 0x159   : > { %v967_v40 = vpop.permute.xlu0 %966  ;;  %v910_v41 = vpop.permute.xlu1 %909 }
 0x15b   : > { %2402 = vmatmul.mubr.msk.bf16.vlgmr.msra.gmra.mrb[0].mxu0 %vm686_vm4, %v2401_v38  ;;  %2405 = vmatmul.mubr.msk.bf16.vlgmr.msra.gmra.mrb[0].mxu1 %vm686_vm4, %v2404_v39 }
 0x15c   : > { %1044 = vmatpush1.bf16.msra.mxu0 %v1036_v42  ;;  %955 = vmatprep.mubr.bf16.mxu1 %v2706_v0 }
 0x15d   : > { %1098 = vmatprep.subr.bf16.mxu0 %v1092_v43  ;;  %v912_v44 = vpop.permute.xlu1 %911  ;;  %1075 = vmatprep.mubr.bf16.mxu0 %v2706_v0  ;;  %v969_v47 = vpop.permute.xlu0 %968 }
 0x15e   : > { %v916_v45 = vsel %vm915_vm9, %v910_v41, %v912_v44  ;;  %v917_v46 = vsel %vm915_vm9, %v912_v44, %v914_v32  ;;  %v973_v52 = vsel %vm972_vm10, %v967_v40, %v969_v47 }
 0x15f   : > { %923 = vmatprep.subr.bf16.mxu1 %v917_v46 }
 0x160   : > { %924 = vmatpush1.bf16.msra.mxu1 %v916_v45 }
 0x161   : > { %v971_v49 = vpop.permute.xlu1 %970  ;;  %v1146_v54 = vpop.permute.xlu0 %1145 }
 0x162   : > { %v974_v51 = vsel %vm972_vm10, %v969_v47, %v971_v49 }
 0x163   : > { %2406 = vmatmul.mubr.msk.bf16.vlgmr.msra.gmra.mrb[4].mxu1 %vm686_vm4, %v2403_v48  ;;  %980 = vmatprep.subr.bf16.mxu1 %v974_v51 }
 0x164   : > { %2411 = vmatmul.mubr.msk.bf16.vlgmr.msra.gmra.mrb[4].mxu0 %vm686_vm4, %v2410_v50  ;;  %981 = vmatpush1.bf16.msra.mxu1 %v973_v52  ;;  %v638_v52 = vld [vmem:[%s546_s2] sm:$0x1]  ;;  %s3401_s2 = sld [smem:[#allocation20_spill]] }
 0x165   : > { %1099 = vmatpush1.bf16.msra.mxu0 %v1091_v53  ;;  %v1144_v55 = vpop.permute.xlu1 %1143  ;;  %1012 = vmatprep.mubr.bf16.mxu1 %v2706_v0  ;;  %v639_v53 = vsub.f32 0.0, %v638_v52 }
 0x166   : > { %v1149_v56 = vsel %vm1147_vm11, %v1144_v55, %v1146_v54  ;;  %1130 = vmatprep.mubr.bf16.mxu0 %v2706_v0  ;;  %2468 = vmatprep.subr.mxu1 %v2716_v62 }
 0x167   : > { %1155 = vmatprep.subr.bf16.mxu0 %v1149_v56  ;;  %v640_v54 = vmul.f32 1.442695, %v639_v53 }
 0x169   : > { %v1142_v58 = vpop.permute.xlu1 %1141  ;;  %2583 = vpow2.f32 %v640_v54 }
 0x16a   : > { %v1148_v60 = vsel %vm1147_vm11, %v1142_v58, %v1144_v55 }
 0x16b   : > { %2408 = vmatmul.mubr.msk.bf16.vlgmr.msra.gmra.mrb[8].mxu1 %vm686_vm4, %v2407_v57 }
 0x16c   : > { %2470 = vmatprep.mubr.msk.f32.mxu1 %vm2717_vm12, %v2716_v62 }
 0x170   : > { %2412 = vmatmul.mubr.msk.bf16.vlgmr.msra.gmra.mrb[4].mxu0 %vm686_vm4, %v2409_v59  ;;  %v645_v59 = vld [vmem:[%s3336_s10] sm:$0xff] }
 0x171   : > { %1156 = vmatpush1.bf16.msra.mxu0 %v1148_v60  ;;  %1187 = vmatprep.mubr.bf16.mxu0 %v2706_v0  ;;  %v659_v60 = vld [vmem:[%s3338_s12] sm:$0xff] }
 0x172   : > { %v1219_v42 = vpop.permute.xlu0 %1218 }
 0x173   : > { %v2584_v55 = vpop.eup %2583 }
 0x174   : > { %v642_v56 = vadd.f32 1.0, %v2584_v55 }
 0x176   : > { %2585 = vrcp.f32 %v642_v56 }
 0x17c   : > { %2414 = vmatmul.mubr.msk.bf16.vlgmr.msra.gmra.mrb[4].mxu0 %vm686_vm4, %v2413_v61 }
 0x17d   : > { %1699 = vmatprep.mubr.bf16.mxu0 %v2706_v0 }
 0x180   : > { %v2586_v57 = vpop.eup %2585 }
 0x181   : > { %v644_v58 = vmul.f32 %v2586_v57, %v638_v52 }
 0x183   : > { %v650_v61 = vrot.slane %v644_v58, %v3063_v14 }
 0x22e   : > { %v825_v63 = vpop.f32.mrb[0].mxu0  ;;  %v902_v1 = vpop.f32.mrb[0].mxu1 }
 0x22f   : > { %v827_v3 = vpop.f32.mrb[1].mxu0  ;;  %v904_v4 = vpop.f32.mrb[1].mxu1  ;;  %v846_v25 = vmul.f32 %v839_v22, %v825_v63  ;;  %v652_v63 = vmul.f32 %v650_v61, %v645_v59 }
 0x230   : > { %v829_v5 = vpop.f32.mrb[2].mxu0  ;;  %v906_v6 = vpop.f32.mrb[2].mxu1  ;;  %v847_v28 = vmul.f32 %v843_v23, %v827_v3  ;;  %v1382_v23 = vld [vmem:[%s3330_s4] sm:$0xff] }
 0x231   : > { %v830_v7 = vpop.f32.mrb[3].mxu0  ;;  %v907_v8 = vpop.f32.mrb[3].mxu1  ;;  %v654_v2 = vsel %vm653_vm13, %v652_v63, 0.0 }
 0x236   : > { %v957_v13 = vpop.f32.mrb[4].mxu1 }
 0x237   : > { %v958_v15 = vadd.f32 %v957_v13, %v902_v1  ;;  %v959_v16 = vpop.f32.mrb[5].mxu1  ;;  %v660_v1 = vmul.f32 %v659_v60, %v650_v61 }
 0x238   : > { %v960_v19 = vadd.f32 %v959_v16, %v904_v4  ;;  %v961_v20 = vpop.f32.mrb[6].mxu1  ;;  %v3101_v4 = vld [vmem:[%s3340_s14] sm:$0xff] }
 0x239   : > { %v962_v21 = vpop.f32.mrb[7].mxu1  ;;  %v661_v3 = vsel %vm653_vm13, %v660_v1, 0.0  ;;  %vm1442_vm13 = vcmask 1047556  }
 0x23a   : > { %v657_v21 = vld [vmem:[%s3337_s11] sm:$0xff]  ;;  %vm1443_vm1 = vmor %vm1442_vm13, %vm1441_vm2 }
 0x23e   : > { %v1014_v24 = vpop.f32.mrb[8].mxu1 }
 0x23f   : > { %v1021_v26 = vadd.f32 %v1014_v24, %v958_v15  ;;  %v1016_v27 = vpop.f32.mrb[9].mxu1 }
 0x240   : > { %v1022_v29 = vadd.f32 %v1016_v27, %v960_v19  ;;  %v1018_v30 = vpop.f32.mrb[10].mxu1  ;;  %v1384_v27 = vld [vmem:[%s3331_s5] sm:$0xff] }
 0x241   : > { %v1023_v31 = vadd.f32 %v1021_v26, %v846_v25  ;;  %v1019_v32 = vpop.f32.mrb[11].mxu1  ;;  %v664_v30 = vld [vmem:[%s3339_s13] sm:$0xff] }
 0x242   : > { %v1024_v33 = vadd.f32 %v1022_v29, %v847_v28 }
 0x24f   : > { %v1189_v37 = vpop.f32.mrb[4].mxu0 }
 0x250   : > { %v1211_v38 = vmul.f32 %v1204_v35, %v1189_v37  ;;  %v1191_v39 = vpop.f32.mrb[5].mxu0 }
 0x251   : > { %v1212_v40 = vmul.f32 %v1208_v36, %v1191_v39  ;;  %v1193_v41 = vpop.f32.mrb[6].mxu0 }
 0x252   : > { %v1213_v43 = vadd.f32 %v1211_v38, %v1023_v31  ;;  %v1194_v44 = vpop.f32.mrb[7].mxu0 }
 0x253   : > { %v1214_v45 = vadd.f32 %v1212_v40, %v1024_v33 }
 0x254   : > { %v3077_v46 = vadd.f32 %v1219_v42, %v1213_v43 }
 0x255   : > { %v3079_v47 = vadd.f32 %v1219_v42, %v1214_v45 }
 0x256   : > { %v1226_v48 = vmul.f32 %v3077_v46, %v3077_v46 }
 0x257   : > { %v1223_v49 = vadd.f32 %v3079_v47, %v3077_v46  ;;  %v1227_v50 = vmul.f32 %v3079_v47, %v3079_v47 }
 0x259   : > { %1224 = vadd.xlane.f32.xlu1 %v1223_v49  ;;  %v1228_v51 = vadd.f32 %v1227_v50, %v1226_v48 }
 0x25b   : > { %1229 = vadd.xlane.f32.xlu0 %v1228_v51 }
 0x25d   : > { %655 = vadd.xlane.f32.xlu1 %v654_v2 }
 0x25f   : > { %662 = vadd.xlane.f32.xlu0 %v661_v3 }
 0x2e6   : > { %v1225_v5 = vpop.xlane.xlu1 %1224 }
 0x2e7   : > { %2469 = vmatpush3.msra.mxu1 %v1225_v5  ;;  %v2028_v5 = vld [vmem:[%s3333_s7] sm:$0xff] }
 0x2e8   : > { %v1230_v6 = vpop.xlane.xlu0 %1229  ;;  %2471 = vmatmul.mubr.msk.f32.vlgmr.msra.gmra.mrb[12].mxu1 %vm1232_vm14, %v3101_v4  ;;  %2473 = vmatprep.subr.mxu1 %v2716_v62 }
 0x2e9   : > { %2474 = vmatpush3.msra.mxu1 %v1230_v6  ;;  %2475 = vmatprep.mubr.msk.f32.mxu1 %vm2717_vm12, %v2716_v62 }
 0x2ea   : > { %v656_v22 = vpop.xlane.xlu1 %655 }
 0x2eb   : > { %v658_v24 = vadd.f32 %v657_v21, %v656_v22 }
 0x2ec   : > { %2476 = vmatmul.mubr.msk.f32.vlgmr.msra.gmra.mrb[14].mxu1 %vm1232_vm14, %v3101_v4  ;;  %v663_v31 = vpop.xlane.xlu0 %662 }
 0x2ed   : > { %1509 = vmatprep.mubr.bf16.mxu1 %v2706_v0  ;;  %v1401_v28 = vadd.f32 1.0, %v658_v24  ;;  %v665_v33 = vadd.f32 %v664_v30, %v663_v31  ;;  %v2419_v24 = vld [vmem:[%s3332_s6 + $0xc] sm:$0xf] }
 0x3bb   : > { %v1302_v7 = vpop.f32.mrb[12].mxu1 }
 0x3bc   : > { %v1306_v8 = vmul.f32 0.001953125, %v1302_v7  ;;  %v2472_v12 = vpop.f32.mrb[13].mxu1 }
 0x3be   : > { %v1378_v15 = vmul.f32 %v1306_v8, %v1306_v8 }
 0x3bf   : > { %v1373_v13 = vpop.f32.mrb[14].mxu1 }
 0x3c0   : > { %v1377_v16 = vmul.f32 0.001953125, %v1373_v13  ;;  %v2477_v17 = vpop.f32.mrb[15].mxu1 }
 0x3c1   : > { %v2431_v17 = vld [vmem:[%s3332_s6 + $0x10] sm:$0xf] }
 0x3c2   : > { %v1379_v19 = vsub.f32 %v1377_v16, %v1378_v15 }
 0x3c4   : > { %v1380_v20 = vadd.f32 1e-05, %v1379_v19 }
 0x3c6   : > { %2587 = vrsqrt.f32 %v1380_v20 }
 0x3d0   : > { %v2588_v25 = vpop.eup %2587 }
 0x3d1   : > { %v1383_v26 = vmul.f32 %v2588_v25, %v1382_v23 }
 0x3d3   : > { %1389 = vperm.xlu1 %2579, %v1383_v26   ;;  %v1385_v29 = vmul.f32 %v1383_v26, %v1306_v8 }
 0x3d5   : > { %v1386_v32 = vsub.f32 %v1384_v27, %v1385_v29 }
 0x3d7   : > { %1396 = vperm.xlu0 %2578, %v1386_v32   ;;  %1404 = vperm.xlu1 %2579, %v1401_v28  }
 0x3db   : > { %1411 = vperm.xlu1 %2579, %v665_v33   ;;  %v2430_v33 = vld [vmem:[%s3332_s6 + $0x4] sm:$0xf] }
 0x452   : > { %v1390_v34 = vpop.permute.xlu1 %1389 }
 0x453   : > { %v1392_v35 = vmul.f32 %v1390_v34, %v3077_v46  ;;  %v1393_v36 = vmul.f32 %v1390_v34, %v3079_v47 }
 0x456   : > { %v1397_v37 = vpop.permute.xlu0 %1396  ;;  %v1405_v38 = vpop.permute.xlu1 %1404 }
 0x457   : > { %v1399_v39 = vadd.f32 %v1397_v37, %v1392_v35  ;;  %v1400_v40 = vadd.f32 %v1397_v37, %v1393_v36 }
 0x459   : > { %v1407_v41 = vmul.f32 %v1405_v38, %v1399_v39  ;;  %v1408_v42 = vmul.f32 %v1405_v38, %v1400_v40  ;;  %v1447_v39 = vld [vmem:[%s3332_s6] sm:$0xf] }
 0x45a   : > { %v1412_v43 = vpop.permute.xlu1 %1411 }
 0x45b   : > { %v1414_v44 = vadd.f32 %v1412_v43, %v1407_v41  ;;  %v1415_v45 = vadd.f32 %v1412_v43, %v1408_v42  ;;  %v2440_v42 = vld [vmem:[%s3332_s6 + $0x14] sm:$0xf] }
 0x45d   : > { %v1416_v48 = vsub.f32 0.0, %v1414_v44  ;;  %v1417_v49 = vsub.f32 0.0, %v1415_v45 }
 0x45f   : > { %v1418_v50 = vmul.f32 1.442695, %v1416_v48  ;;  %v1420_v51 = vmul.f32 1.442695, %v1417_v49 }
 0x461   : > { %2589 = vpow2.f32 %v1418_v50 }
 0x462   : > { %2591 = vpow2.f32 %v1420_v51 }
 0x46b   : > { %v2590_v52 = vpop.eup %2589 }
 0x46c   : > { %v2592_v53 = vpop.eup %2591  ;;  %v1422_v46 = vadd.f32 1.0, %v2590_v52 }
 0x46d   : > { %v1423_v54 = vadd.f32 1.0, %v2592_v53 }
 0x46e   : > { %2593 = vrcp.f32 %v1422_v46 }
 0x46f   : > { %2595 = vrcp.f32 %v1423_v54  ;;  %v2427_v54 = vld [vmem:[%s3332_s6 + $0x18] sm:$0xf] }
 0x478   : > { %v2594_v47 = vpop.eup %2593 }
 0x479   : > { %v2596_v55 = vpop.eup %2595  ;;  %v1426_v56 = vmul.f32 %v2594_v47, %v1414_v44 }
 0x47a   : > { %v1427_v57 = vmul.f32 %v2596_v55, %v1415_v45 }
 0x47c   : > { %v2458_v58 = vpack.c.bf16 %v1427_v57, %v1426_v56  ;;  %v2439_v57 = vld [vmem:[%s3332_s6 + $0x8] sm:$0xf] }
 0x47e   : > { %1435 = vrot.lane.b32.xlu0 %v2458_v58, %s2707_s21  ;;  %s3394_s21 = smov 127  }
 0x4f0   : > { %v1436_v59 = vpop.permute.xlu0 %1435 }
 0x4f1   : > { %v1437_v60 = vrot.slane %v1436_v59, 4 }
 0x4f3   : > { %v1438_v61 = vsel %vm609_vm0, %v1437_v60, %v1436_v59  ;;  %1445 = vst.msk [vmem:[#allocation3 + $0x8] sm:$0xf] %vm613_vm15, %v1437_v60  ;;  %vm1470_vm0 = vcmask 1043456  }
 0x4f4   : > { %1444 = vst.msk [vmem:[#allocation3] sm:$0xff] %vm1443_vm1, %v1438_v61 }
 0x4fa   : > { %v2582_v63 = vld [vmem:[#allocation3 + $0x8] ss:$0 sps:$4 sm:$0xff]  }
 0x4fb   : > { %v1446_v1 = vld [vmem:[#allocation3] sm:$0xff]  ;;  %1463 = vrot.lane.b32.xlu0 %v2582_v63, %s2708_s19  ;;  %1654 = vrot.lane.b32.xlu1 %v2582_v63, %s3393_s18 }
 0x4fc   : > { %v2420_v2 = vcombine.low %v1446_v1, %v1446_v1  ;;  %v2421_v3 = vcombine.high %v1446_v1, %v1446_v1 }
 0x4fe   : > { %v1522_v27 = vsel %vm1470_vm0, %v2420_v2, 0 }
 0x4ff   : > { %1652 = vrot.lane.b32.xlu0 %v2421_v3, %s3393_s18  ;;  %1650 = vrot.lane.b32.xlu1 %v2420_v2, %s3393_s18 }
 0x503   : > { %1459 = vrot.lane.b32.xlu0 %v2420_v2, %s2708_s19  ;;  %1461 = vrot.lane.b32.xlu1 %v2421_v3, %s2708_s19  ;;  %s3398_s19 = smov 95  }
 0x507   : > { %1710 = vrot.lane.b32.xlu0 %v2421_v3, %s3394_s21  ;;  %1708 = vrot.lane.b32.xlu1 %v2420_v2, %s3394_s21 }
 0x50b   : > { %1838 = vrot.lane.b32.xlu0 %v2582_v63, %s3395_s26  ;;  %1712 = vrot.lane.b32.xlu1 %v2582_v63, %s3394_s21  ;;  %s2297_s21 = scalar_lea.sflag [#allocation6], %s2919_s25 }
 0x50f   : > { %1834 = vrot.lane.b32.xlu0 %v2420_v2, %s3395_s26  ;;  %1836 = vrot.lane.b32.xlu1 %v2421_v3, %s3395_s26  ;;  %s2395_s26 = sshll.u32 %s2919_s25, 4 }
 0x513   : > { %1574 = vrot.lane.b32.xlu0 %v2582_v63, %s3396_s29  ;;  %1896 = vrot.lane.b32.xlu1 %v2582_v63, %s3397_s27 }
 0x517   : > { %1894 = vrot.lane.b32.xlu0 %v2421_v3, %s3397_s27  ;;  %1892 = vrot.lane.b32.xlu1 %v2420_v2, %s3397_s27  ;;  %s602_s27 = scalar_lea.vmem [#allocation7], %s2395_s26  ;;  %s2718_s26 = smov [#allocation7]  }
 0x518   : > { %s2641_s1 = sshll.u32 %s2718_s26, 4  ;;  %s2642_s1 = int_to_ptr.vmem [resolvable:$false] %s2641_s1 }
 0x519   : > { %s2643_s3 = scalar_lea.vmem %s2642_s1, 512 }
 0x51b   : > { %1570 = vrot.lane.b32.xlu0 %v2420_v2, %s3396_s29  ;;  %1572 = vrot.lane.b32.xlu1 %v2421_v3, %s3396_s29  ;;  %s3400_s29 = sld [smem:[#allocation14_spill]] }
 0x51f   : > { %1770 = vrot.lane.b32.xlu0 %v2421_v3, %s3398_s19  ;;  %1772 = vrot.lane.b32.xlu1 %v2582_v63, %s3398_s19 }
 0x521   : > { %p3402_p12 = scmp.ne.s32.totalorder %s3400_s29, 0 }
 0x523   : > { %1952 = vrot.lane.b32.xlu0 %v2420_v2, %s3399_s23  ;;  %1768 = vrot.lane.b32.xlu1 %v2420_v2, %s3398_s19  ;;  %s2311_s19 = sshll.u32 %s602_s27, 4  ;;  %s3284_s19 = int_to_ptr.vmem [resolvable:$true] %s2311_s19 }
 0x524   : > { %p2644_p10 = scmp.lt.s32.totalorder %s3284_s19, %s2642_s1 }
 0x527   : > { %1956 = vrot.lane.b32.xlu0 %v2582_v63, %s3399_s23  ;;  %1954 = vrot.lane.b32.xlu1 %v2421_v3, %s3399_s23  ;;  %v2436_v63 = vld [vmem:[%s3332_s6 + $0x1c] sm:$0xf] }
 0x52b   : > { %2031 = vperm.xlu1 %2579, %v2028_v5  }
 0x56d   : > { %v1464_v6 = vpop.permute.xlu0 %1463  ;;  %v1655_v7 = vpop.permute.xlu1 %1654 }
 0x571   : > { %v1653_v8 = vpop.permute.xlu0 %1652  ;;  %v1651_v12 = vpop.permute.xlu1 %1650 }
 0x572   : > { %v1657_v13 = vsel %vm860_vm7, %v1653_v8, %v1655_v7  ;;  %v1656_v15 = vsel %vm860_vm7, %v1651_v12, %v1653_v8  ;;  %v2445_v7 = vld [vmem:[%s3332_s6 + $0x20] sm:$0xf] }
 0x573   : > { %v1662_v16 = vsel %vm1470_vm0, %v1656_v15, 0  ;;  %2432 = vmatprep.subr.msk.bf16.mxu0 %vm1470_vm0, %v1657_v13 }
 0x574   : > { %1668 = vmatpush1.bf16.msra.mxu0 %v1662_v16 }
 0x575   : > { %v1460_v19 = vpop.permute.xlu0 %1459  ;;  %v1462_v20 = vpop.permute.xlu1 %1461 }
 0x576   : > { %v1465_v21 = vsel %vm681_vm3, %v1460_v19, %v1462_v20  ;;  %v1466_v22 = vsel %vm681_vm3, %v1462_v20, %v1464_v6 }
 0x577   : > { %v1472_v23 = vsel %vm1470_vm0, %v1465_v21, 0  ;;  %2423 = vmatprep.subr.msk.bf16.mxu1 %vm1470_vm0, %v1466_v22  ;;  %2433 = vmatmul.mubr.msk.bf16.vlgmr.msra.gmra.mrb[8].mxu0 %vm1232_vm14, %v2431_v17 }
 0x578   : > { %1478 = vmatpush1.bf16.msra.mxu1 %v1472_v23  ;;  %1757 = vmatprep.mubr.bf16.mxu0 %v2706_v0 }
 0x579   : > { %v1711_v25 = vpop.permute.xlu0 %1710  ;;  %2425 = vmatprep.subr.msk.bf16.mxu1 %vm1470_vm0, %v2421_v3  ;;  %v1709_v26 = vpop.permute.xlu1 %1708 }
 0x57a   : > { %v1714_v28 = vsel %vm915_vm9, %v1709_v26, %v1711_v25 }
 0x57b   : > { %2424 = vmatmul.mubr.msk.bf16.vlgmr.msra.gmra.mrb[16].mxu1 %vm1232_vm14, %v2419_v24  ;;  %v1720_v32 = vsel %vm1470_vm0, %v1714_v28, 0 }
 0x57c   : > { %1528 = vmatpush1.bf16.msra.mxu1 %v1522_v27  ;;  %1559 = vmatprep.mubr.bf16.mxu1 %v2706_v0 }
 0x57d   : > { %v1839_v29 = vpop.permute.xlu0 %1838  ;;  %v1713_v30 = vpop.permute.xlu1 %1712 }
 0x57e   : > { %v1715_v31 = vsel %vm915_vm9, %v1711_v25, %v1713_v30  ;;  %v1630_v25 = vld [vmem:[%s3341_s15] ss:$2 sm:$0x3] }
 0x57f   : > { %2434 = vmatprep.subr.msk.bf16.mxu0 %vm1470_vm0, %v1715_v31  ;;  %v1635_v28 = vrot.slane %v1630_v25, %v3063_v14 }
 0x580   : > { %1726 = vmatpush1.bf16.msra.mxu0 %v1720_v32 }
 0x581   : > { %v1835_v34 = vpop.permute.xlu0 %1834  ;;  %v1837_v35 = vpop.permute.xlu1 %1836 }
 0x582   : > { %v1840_v36 = vsel %vm1035_vm6, %v1835_v34, %v1837_v35  ;;  %v1841_v37 = vsel %vm1035_vm6, %v1837_v35, %v1839_v29  ;;  %v1639_v29 = vrot.slane %v1630_v25, %v3068_v18 }
 0x583   : > { %v1846_v38 = vsel %vm1470_vm0, %v1840_v36, 0  ;;  %2435 = vmatmul.mubr.msk.bf16.vlgmr.msra.gmra.mrb[12].mxu0 %vm1232_vm14, %v2430_v33  ;;  %2441 = vmatprep.subr.msk.bf16.mxu0 %vm1470_vm0, %v1841_v37  ;;  %v2448_v37 = vld [vmem:[%s3341_s15 + $0x1] ss:$2 sm:$0x3] }
 0x584   : > { %1852 = vmatpush1.bf16.msra.mxu0 %v1846_v38  ;;  %1883 = vmatprep.mubr.bf16.mxu0 %v2706_v0 }
 0x585   : > { %v1575_v40 = vpop.permute.xlu0 %1574  ;;  %v1897_v41 = vpop.permute.xlu1 %1896 }
 0x587   : > { %2426 = vmatmul.mubr.msk.bf16.vlgmr.msra.gmra.mrb[16].mxu1 %vm1232_vm14, %v1447_v39 }
 0x588   : > { %1619 = vmatprep.mubr.bf16.mxu1 %v2706_v0 }
 0x589   : > { %v1895_v43 = vpop.permute.xlu0 %1894  ;;  %v1893_v44 = vpop.permute.xlu1 %1892 }
 0x58a   : > { %v1899_v45 = vsel %vm1090_vm8, %v1895_v43, %v1897_v41  ;;  %v1898_v48 = vsel %vm1090_vm8, %v1893_v44, %v1895_v43  ;;  %v2017_v41 = vrot.slane %v2448_v37, %v3063_v14 }
 0x58b   : > { %v1904_v49 = vsel %vm1470_vm0, %v1898_v48, 0  ;;  %2442 = vmatmul.mubr.msk.bf16.vlgmr.msra.gmra.mrb[16].mxu0 %vm1232_vm14, %v2440_v42  ;;  %2443 = vmatprep.subr.msk.bf16.mxu0 %vm1470_vm0, %v1899_v45  ;;  %v2021_v42 = vrot.slane %v2448_v37, %v3068_v18 }
 0x58c   : > { %1910 = vmatpush1.bf16.msra.mxu0 %v1904_v49  ;;  %1941 = vmatprep.mubr.bf16.mxu0 %v2706_v0 }
 0x58d   : > { %v1571_v50 = vpop.permute.xlu0 %1570  ;;  %v1573_v51 = vpop.permute.xlu1 %1572 }
 0x58e   : > { %v1576_v52 = vsel %vm783_vm5, %v1571_v50, %v1573_v51  ;;  %v1577_v53 = vsel %vm783_vm5, %v1573_v51, %v1575_v40 }
 0x58f   : > { %v1582_v46 = vsel %vm1470_vm0, %v1576_v52, 0  ;;  %2428 = vmatprep.subr.msk.bf16.mxu1 %vm1470_vm0, %v1577_v53 }
 0x590   : > { %1588 = vmatpush1.bf16.msra.mxu1 %v1582_v46 }
 0x591   : > { %v1771_v47 = vpop.permute.xlu0 %1770  ;;  %v1773_v55 = vpop.permute.xlu1 %1772 }
 0x592   : > { %v1775_v56 = vsel %vm972_vm10, %v1771_v47, %v1773_v55 }
 0x593   : > { %2429 = vmatmul.mubr.msk.bf16.vlgmr.msra.gmra.mrb[16].mxu1 %vm1232_vm14, %v2427_v54  ;;  %2437 = vmatprep.subr.msk.bf16.mxu1 %vm1470_vm0, %v1775_v56 }
 0x594   : > { %1817 = vmatprep.mubr.bf16.mxu1 %v2706_v0 }
 0x595   : > { %v1953_v58 = vpop.permute.xlu0 %1952  ;;  %v1769_v59 = vpop.permute.xlu1 %1768 }
 0x596   : > { %v1774_v60 = vsel %vm972_vm10, %v1769_v59, %v1771_v47 }
 0x597   : > { %v1780_v61 = vsel %vm1470_vm0, %v1774_v60, 0  ;;  %2444 = vmatmul.mubr.msk.bf16.vlgmr.msra.gmra.mrb[16].mxu0 %vm1232_vm14, %v2439_v57  ;;  %v2228_v60 = vld [vmem:[%s3342_s16] sm:$0xf] }
 0x598   : > { %1786 = vmatpush1.bf16.msra.mxu1 %v1780_v61  ;;  %2001 = vmatprep.mubr.bf16.mxu0 %v2706_v0 }
 0x599   : > { %v1957_v1 = vpop.permute.xlu0 %1956  ;;  %v1955_v2 = vpop.permute.xlu1 %1954  ;;  %2478 = vmatprep.subr.mxu1 %v2716_v62 }
 0x59a   : > { %v1958_v3 = vsel %vm1147_vm11, %v1953_v58, %v1955_v2  ;;  %v1959_v5 = vsel %vm1147_vm11, %v1955_v2, %v1957_v1 }
 0x59b   : > { %v1964_v6 = vsel %vm1470_vm0, %v1958_v3, 0  ;;  %2438 = vmatmul.mubr.msk.bf16.vlgmr.msra.gmra.mrb[20].mxu1 %vm1232_vm14, %v2436_v63  ;;  %2446 = vmatprep.subr.msk.bf16.mxu0 %vm1470_vm0, %v1959_v5 }
 0x59c   : > { %1970 = vmatpush1.bf16.msra.mxu0 %v1964_v6  ;;  %2480 = vmatprep.mubr.msk.f32.mxu1 %vm2717_vm12, %v2716_v62  ;;  %v2194_v6 = vld [vmem:[%s3334_s8] sm:$0xff] }
 0x5a3   : > { %2447 = vmatmul.mubr.msk.bf16.vlgmr.msra.gmra.mrb[16].mxu0 %vm1232_vm14, %v2445_v7 }
 0x5aa   : > { %v2032_v52 = vpop.permute.xlu1 %2031 }
 0x64a   : > { %v1701_v8 = vpop.f32.mrb[8].mxu0 }
 0x64b   : > { %v1703_v12 = vpop.f32.mrb[9].mxu0 }
 0x64c   : > { %v1705_v13 = vpop.f32.mrb[10].mxu0 }
 0x64d   : > { %v1706_v15 = vpop.f32.mrb[11].mxu0 }
 0x656   : > { %v1759_v16 = vpop.f32.mrb[12].mxu0 }
 0x657   : > { %v1760_v17 = vadd.f32 %v1759_v16, %v1701_v8  ;;  %v1761_v19 = vpop.f32.mrb[13].mxu0  ;;  %v2229_v16 = vld [vmem:[%s3343_s17] sm:$0xff] }
 0x658   : > { %v1762_v20 = vadd.f32 %v1761_v19, %v1703_v12  ;;  %v1763_v21 = vpop.f32.mrb[14].mxu0  ;;  %v2196_v12 = vld [vmem:[%s3335_s9] sm:$0xff] }
 0x659   : > { %v1764_v22 = vpop.f32.mrb[15].mxu0 }
 0x666   : > { %v1621_v23 = vpop.f32.mrb[16].mxu1 }
 0x667   : > { %v1623_v24 = vpop.f32.mrb[17].mxu1  ;;  %v1642_v31 = vmul.f32 %v1635_v28, %v1621_v23 }
 0x668   : > { %v1625_v26 = vpop.f32.mrb[18].mxu1  ;;  %v1643_v34 = vmul.f32 %v1639_v29, %v1623_v24 }
 0x669   : > { %v1626_v27 = vpop.f32.mrb[19].mxu1 }
 0x66e   : > { %v1819_v30 = vpop.f32.mrb[20].mxu1 }
 0x66f   : > { %v1826_v32 = vadd.f32 %v1819_v30, %v1760_v17  ;;  %v1821_v33 = vpop.f32.mrb[21].mxu1 }
 0x670   : > { %v1827_v35 = vadd.f32 %v1821_v33, %v1762_v20  ;;  %v1823_v36 = vpop.f32.mrb[22].mxu1 }
 0x671   : > { %v1828_v38 = vadd.f32 %v1826_v32, %v1642_v31  ;;  %v1824_v39 = vpop.f32.mrb[23].mxu1 }
 0x672   : > { %v1829_v40 = vadd.f32 %v1827_v35, %v1643_v34 }
 0x676   : > { %v2003_v43 = vpop.f32.mrb[16].mxu0 }
 0x677   : > { %v2024_v44 = vmul.f32 %v2017_v41, %v2003_v43  ;;  %v2005_v45 = vpop.f32.mrb[17].mxu0 }
 0x678   : > { %v2025_v48 = vmul.f32 %v2021_v42, %v2005_v45  ;;  %v2007_v49 = vpop.f32.mrb[18].mxu0 }
 0x679   : > { %v2026_v50 = vadd.f32 %v2024_v44, %v1828_v38  ;;  %v2008_v51 = vpop.f32.mrb[19].mxu0 }
 0x67a   : > { %v2027_v53 = vadd.f32 %v2025_v48, %v1829_v40 }
 0x67b   : > { %v2034_v46 = vadd.f32 %v2032_v52, %v2026_v50 }
 0x67c   : > { %v2035_v54 = vadd.f32 %v2032_v52, %v2027_v53 }
 0x67d   : > { %v2039_v47 = vmul.f32 %v2034_v46, %v2034_v46 }
 0x67e   : > { %v2036_v55 = vadd.f32 %v2035_v54, %v2034_v46  ;;  %v2040_v56 = vmul.f32 %v2035_v54, %v2035_v54 }
 0x680   : > { %2037 = vadd.xlane.f32.xlu0 %v2036_v55  ;;  %v2041_v57 = vadd.f32 %v2040_v56, %v2039_v47 }
 0x682   : > { %2042 = vadd.xlane.f32.xlu1 %v2041_v57 }
 0x693   : > { %2242 = vrot.lane.b32.xlu1 %v2951_v11, %s3393_s18 }
 0x696   : > { %2240 = vrot.lane.b32.xlu0 %v2942_v9, %s3393_s18 }
 0x69a   : > { %2238 = vrot.lane.b32.xlu0 %v2947_v10, %s3393_s18  ;;  %s2459_s18 = sshll.u32 %s2835_s0, 8  ;;  %s2637_s0 = scalar_lea.vmem %s3284_s19, 256 }
 0x69b   : > { %s3282_s24 = scalar_lea.hbm %s3401_s2, %s2459_s18  ;;  %p2638_p6 = scmp.ne.s32.totalorder %s3284_s19, %s2637_s0 }
 0x69c   : > { %p2645_p2 = scmp.lt.s32.totalorder %s2643_s3, %s2637_s0 }
 0x69d   : > { %p2639_p13 = pnand %p2638_p6, %p3402_p12 }
 0x69e   : > { %p2646_p4 = por %p2645_p2, %p2644_p10 }
 0x69f   : > { %p2640_p7 = pneg %p2639_p13 }
 0x6a1   : > { %p2647_p5 = pnand %p2646_p4, %p2640_p7 }
 0x70d   : > { %v2038_v14 = vpop.xlane.xlu0 %2037 }
 0x70e   : > { %2479 = vmatpush3.msra.mxu1 %v2038_v14 }
 0x70f   : > { %v2043_v18 = vpop.xlane.xlu1 %2042  ;;  %2481 = vmatmul.mubr.msk.f32.vlgmr.msra.gmra.mrb[24].mxu1 %vm1232_vm14, %v3101_v4  ;;  %2483 = vmatprep.subr.mxu1 %v2716_v62 }
 0x710   : > { %2484 = vmatpush3.msra.mxu1 %v2043_v18  ;;  %2485 = vmatprep.mubr.msk.f32.mxu1 %vm2717_vm12, %v2716_v62 }
 0x711   : > { %v2241_v58 = vpop.permute.xlu0 %2240 }
 0x713   : > { %v2243_v11 = vpop.permute.xlu1 %2242  ;;  %2486 = vmatmul.mubr.msk.f32.vlgmr.msra.gmra.mrb[26].mxu1 %vm1232_vm14, %v3101_v4 }
 0x714   : > { %v2245_v9 = vsel %vm860_vm7, %v2241_v58, %v2243_v11  ;;  %2283 = vmatprep.mubr.bf16.mxu1 %v2706_v0 }
 0x715   : > { %2251 = vmatprep.subr.bf16.mxu1 %v2245_v9  ;;  %v2239_v10 = vpop.permute.xlu0 %2238 }
 0x716   : > { %v2244_v59 = vsel %vm860_vm7, %v2239_v10, %v2241_v58 }
 0x717   : > { %2252 = vmatpush1.bf16.msra.mxu1 %v2244_v59 }
 0x71a   : > { %2451 = vmatmul.mubr.msk.bf16.vlgmr.msra.gmra.mrb[28].mxu1 %vm686_vm4, %v2228_v60 }
 0x7e2   : > { %v2114_v62 = vpop.f32.mrb[24].mxu1 }
 0x7e3   : > { %v2118_v61 = vmul.f32 0.001953125, %v2114_v62  ;;  %v2482_v63 = vpop.f32.mrb[25].mxu1 }
 0x7e5   : > { %v2190_v4 = vmul.f32 %v2118_v61, %v2118_v61 }
 0x7e6   : > { %v2185_v1 = vpop.f32.mrb[26].mxu1 }
 0x7e7   : > { %v2189_v2 = vmul.f32 0.001953125, %v2185_v1  ;;  %v2487_v3 = vpop.f32.mrb[27].mxu1 }
 0x7e9   : > { %v2191_v5 = vsub.f32 %v2189_v2, %v2190_v4 }
 0x7eb   : > { %v2192_v0 = vadd.f32 1e-05, %v2191_v5 }
 0x7ed   : > { %2597 = vrsqrt.f32 %v2192_v0  ;;  %v2285_v15 = vpop.f32.mrb[28].mxu1 }
 0x7ee   : > { %v2287_v19 = vpop.f32.mrb[29].mxu1 }
 0x7ef   : > { %v2289_v20 = vpop.f32.mrb[30].mxu1 }
 0x7f0   : > { %v2290_v21 = vpop.f32.mrb[31].mxu1 }
 0x7f7   : > { %v2598_v7 = vpop.eup %2597 }
 0x7f8   : > { %v2195_v8 = vmul.f32 %v2598_v7, %v2194_v6 }
 0x7fa   : > { %2201 = vperm.xlu1 %2579, %v2195_v8   ;;  %v2197_v13 = vmul.f32 %v2195_v8, %v2118_v61 }
 0x7fc   : > { %v2198_v17 = vsub.f32 %v2196_v12, %v2197_v13 }
 0x7fe   : > { %2232 = vperm.xlu1 %2579, %v2229_v16   ;;  %2208 = vperm.xlu0 %2578, %v2198_v17  }
 0x879   : > { %v2202_v22 = vpop.permute.xlu1 %2201 }
 0x87a   : > { %v2204_v23 = vmul.f32 %v2202_v22, %v2034_v46  ;;  %v2205_v24 = vmul.f32 %v2202_v22, %v2035_v54 }
 0x87d   : > { %v2209_v25 = vpop.permute.xlu0 %2208  ;;  %v2233_v36 = vpop.permute.xlu1 %2232 }
 0x87e   : > { %v2211_v26 = vadd.f32 %v2209_v25, %v2204_v23  ;;  %v2212_v27 = vadd.f32 %v2209_v25, %v2205_v24  ;;  %v2286_v39 = vadd.f32 %v2285_v15, %v2233_v36  ;;  %v2288_v42 = vadd.f32 %v2287_v19, %v2233_v36 }
 0x880   : > { %v2213_v28 = vsub.f32 0.0, %v2211_v26  ;;  %v2214_v29 = vsub.f32 0.0, %v2212_v27 }
 0x882   : > { %v2215_v30 = vmul.f32 1.442695, %v2213_v28  ;;  %v2217_v31 = vmul.f32 1.442695, %v2214_v29 }
 0x884   : > { %2599 = vpow2.f32 %v2215_v30 }
 0x885   : > { %2601 = vpow2.f32 %v2217_v31 }
 0x88e   : > { %v2600_v32 = vpop.eup %2599 }
 0x88f   : > { %v2602_v33 = vpop.eup %2601  ;;  %v2219_v34 = vadd.f32 1.0, %v2600_v32 }
 0x890   : > { %v2220_v35 = vadd.f32 1.0, %v2602_v33 }
 0x891   : > { %2603 = vrcp.f32 %v2219_v34 }
 0x892   : > { %2605 = vrcp.f32 %v2220_v35 }
 0x89b   : > { %v2604_v37 = vpop.eup %2603 }
 0x89c   : > { %v2606_v38 = vpop.eup %2605  ;;  %v2223_v40 = vmul.f32 %v2604_v37, %v2211_v26 }
 0x89d   : > { %v2224_v41 = vmul.f32 %v2606_v38, %v2212_v27 }
 0x89e   : > { %v2292_v43 = vadd.f32 %v2286_v39, %v2223_v40 }
 0x89f   : > { %v2293_v44 = vadd.f32 %v2288_v42, %v2224_v41 }
 0x8a0   : > { %2294 = vst [vmem:[%s602_s27] sm:$0xff] %v2292_v43 }
 0x8a1   : > { %2295 = vst [vmem:[%s602_s27 + $0x8] sm:$0xff] %v2293_v44 }
 0x8a2   : > { %2650 = shalt.err (!%p2647_p5)
}
 0x8a3   : > { %s2651_s25 = scalar_lea.hbm %s3282_s24, 256  ;;  %s2655_s23 = scalar_lea.hbm %s3401_s2, 512 }
 0x8a4   : > { %p2652_p8 = scmp.ne.s32.totalorder %s3282_s24, %s2651_s25  ;;  %p2656_p1 = scmp.lt.u32.totalorder %s3282_s24, %s3401_s2 }
 0x8a5   : > { %p2657_p3 = scmp.lt.u32.totalorder %s2655_s23, %s2651_s25  ;;  %p2659_p6 = scmp.lt.u32.totalorder %s2651_s25, %s3282_s24 }
 0x8a6   : > { %p2653_p9 = pnand %p2652_p8, %p3402_p12 }
 0x8a7   : > { %p2658_p11 = por %p2657_p3, %p2656_p1 }
 0x8a8   : > { %p2654_p0 = pneg %p2653_p9 }
 0x8a9   : > { %p2660_p13 = por %p2659_p6, %p2658_p11 }
 0x8ab   : > { %p2661_p7 = pnand %p2660_p13, %p2654_p0 }
 0x8ad   : > { %2664 = shalt.err (!%p2661_p7)
}
 0x8ae   : > { %2522 = dma.vmem_to_hbm [thread:$0]  (%p3402_p12), %s3284_s19, 256, %s3282_s24, %s2297_s21  }
 0x8af PF: > { %s3403_s3 = sld [smem:[#allocation10_spill]]  ;;  %s3404_s0 = sld [smem:[#allocation15_spill]] }
 0x8b0   : > { %p3406_p2 = scmp.ge.s32.totalorder %s2703_s30, 2 }
 0x8b5   : > { %s2323_s26 = sand.u32 1, %s3403_s3   ;;  %p3405_p10 = scmp.ne.s32.totalorder %s3404_s0, 0 }
 0x8b6   : > { %s2324_s18 = scalar_lea.sflag [#allocation6], %s2323_s26 }
 0x8b7   : > { %p2529_p4 = pnand %p3406_p2, %p3405_p10 }
 0x8b9   : > { %2686 = dma.done.wait (!%p2529_p4), %s2324_s18, 256  }
 0x8ba   : > { %2688 = vsyncadd (!%p2529_p4), %s2324_s18, 4294967040  ;;  %s3407_s30 = sld [smem:[#allocation12_spill]]  ;;  %s3408_s25 = sld [smem:[#allocation11_spill]] }
 0x8bb   : > { %s3409_s29 = sld [smem:[#allocation13_spill]]  ;;  %s3410_s27 = smov %s2695_s28 }
 0x8c0   : > { %p31_p5 = scmp.ge.s32.totalorder %s3407_s30, 4   ;;  %s3411_s28 = smov %s3408_s25 }
 0x8c2   :  { %33 = sbr.rel (!%p31_p5) target bundleno = 11 (0xb), region = 157 }
 0x8c9   :  { %2329 = vsyncpa [#allocation5], 1 }
 0x8ca   :  { %2331 = vsyncpa [#allocation5 + $0x1], 1 }
 0x8cb   :  { %2332 = vsyncpa [#allocation6], 1 }
 0x8cc   :  { %2334 = vsyncpa [#allocation6 + $0x1], 1 }

// kernel: tpu_custom_call.1
= control target key start
LH: loop header
LB: loop body
LE: loop exit
PB: predicated region body
PF: predicated region fallthrough
CT: control target
= control target key end

     0   :  { %s3326_s0 = inlined_call_operand.vmem [shape: f32[2,16,256], index: 0, kind: input, shape index: {}]   ;;  %s3327_s1 = inlined_call_operand.hbm [shape: f32[2,1,32], index: 1, kind: input, shape index: {}]   ;;  %s3328_s2 = inlined_call_operand.vmem [shape: bf16[9,8,16], index: 2, kind: input, shape index: {}]   ;;  %s3329_s3 = inlined_call_operand.vmem [shape: f32[8,1], index: 3, kind: input, shape index: {}]   ;;  %s3330_s4 = inlined_call_operand.vmem [shape: f32[8,1], index: 4, kind: input, shape index: {}]   ;;  %s3331_s5 = inlined_call_operand.vmem [shape: f32[8,1], index: 5, kind: input, shape index: {}]   ;;  %s3332_s6 = inlined_call_operand.vmem [shape: bf16[9,8,8], index: 6, kind: input, shape index: {}]   ;;  %s3333_s7 = inlined_call_operand.vmem [shape: f32[8,1], index: 7, kind: input, shape index: {}]   ;;  %s3334_s8 = inlined_call_operand.vmem [shape: f32[8,1], index: 8, kind: input, shape index: {}]   ;;  %s3335_s9 = inlined_call_operand.vmem [shape: f32[8,1], index: 9, kind: input, shape index: {}]   ;;  %s3336_s10 = inlined_call_operand.vmem [shape: f32[8,32], index: 10, kind: input, shape index: {}]   ;;  %s3337_s11 = inlined_call_operand.vmem [shape: f32[8,1], index: 11, kind: input, shape index: {}]   ;;  %s3338_s12 = inlined_call_operand.vmem [shape: f32[8,32], index: 12, kind: input, shape index: {}]   ;;  %s3339_s13 = inlined_call_operand.vmem [shape: f32[8,1], index: 13, kind: input, shape index: {}]   ;;  %s3340_s14 = inlined_call_operand.vmem [shape: f32[8,8], index: 14, kind: input, shape index: {}]   ;;  %s3341_s15 = inlined_call_operand.vmem [shape: f32[2,256], index: 15, kind: input, shape index: {}]   ;;  %s3342_s16 = inlined_call_operand.vmem [shape: bf16[8,16], index: 16, kind: input, shape index: {}]   ;;  %s3343_s17 = inlined_call_operand.vmem [shape: f32[8,1], index: 17, kind: input, shape index: {}]   ;;  %s3344_s18 = inlined_call_operand.hbm [shape: f32[2,8,256], index: 18, kind: output, shape index: {}]  }
   0x1   :  { %3371 = sst [smem:[#allocation16_spill]] %s3326_s0 }
   0x2   :  { %3372 = sst [smem:[#allocation17_spill]] %s3327_s1 }
   0x3   :  { %3373 = sst [smem:[#allocation18_spill]] %s3328_s2 }
   0x4   :  { %3374 = sst [smem:[#allocation19_spill]] %s3329_s3 }
   0x5   :  { %3375 = sst [smem:[#allocation20_spill]] %s3344_s18 }
   0x6   :  { %23 = vsyncpa [#allocation5], 0 }
   0x7   :  { %25 = vsyncpa [#allocation5 + $0x1], 0 }
   0x8   :  { %26 = vsyncpa [#allocation6], 0 }
   0x9   :  { %28 = vsyncpa [#allocation6 + $0x1], 0  ;;  %s2814_s27 = smov 0   ;;  %s2816_s28 = smov 0  }
   0xa   :  { %s2818_s29 = smov 0   ;;  %s2820_s30 = smov 0  }
   0xb LB: > { %3376 = sst [smem:[#allocation10_spill]] %s2691_s27  ;;  %s2835_s0 = sadd.s32 4294967295, %s2703_s30   ;;  %s2703_s30 = sphi %s2820_s30, %s3407_s30   ;;  %s2699_s29 = sphi %s2818_s29, %s3409_s29   ;;  %s2695_s28 = sphi %s2816_s28, %s3411_s28   ;;  %s2691_s27 = sphi %s2814_s27, %s3410_s27  }
   0xc   : > { %3377 = sst [smem:[#allocation11_spill]] %s2699_s29  ;;  %s2390_s19 = sadd.s32 4294967294, %s2703_s30  }
   0xd   : > { %s2839_s1 = sadd.s32 1, %s2703_s30   ;;  %s67_s20 = sadd.s32 1, %s2699_s29 }
   0xe   : > { %3378 = sst [smem:[#allocation12_spill]] %s2839_s1  ;;  %s64_s21 = ssub.s32 %s2703_s30, %s2839_s1 }
   0xf   : > { %p74_p0 = scmp.ne.s32.totalorder %s2699_s29, %s2695_s28  ;;  %p65_p1 = scmp.eq.s32.totalorder %s64_s21, 0 }
  0x10   : > { %p75_p2 = scmp.eq.s32.totalorder %s2703_s30, 0  ;;  %p80_p3 = scmp.ne.s32.totalorder %s2695_s28, %s2691_s27 }
  0x11   : > { %p81_p4 = scmp.eq.s32.totalorder %s2835_s0, 0  ;;  %p440_p7 = scmp.eq.s32.totalorder %s2835_s0, 1 }
  0x12   : > { %s2851_s22 = scalar_select %p65_p1, %s2699_s29, %s67_s20  }
  0x13   : > { %p2853_p5 = por %p75_p2, %p74_p0  ;;  %p2857_p6 = por %p81_p4, %p80_p3 }
  0x14   : > { %3379 = sst [smem:[#allocation13_spill]] %s2851_s22  ;;  %p446_p8 = scmp.eq.s32.totalorder %s2390_s19, 1 }
  0x15   : > { %p2532_p10 = scmp.lt.s32.totalorder %s2703_s30, 2  ;;  %p2864_p11 = por %p440_p7, %p74_p0 }
  0x16   : > { %p2868_p12 = por %p446_p8, %p80_p3  ;;  %s522_s26 = sand.u32 1, %s2699_s29  }
  0x17   : > { %s3382_s24 = scalar_select %p2864_p11, 1, 0 }
  0x18   : > { %s3384_s25 = scalar_select %p2868_p12, 1, 0 }
  0x19   : > { %3383 = sst [smem:[#allocation14_spill]] %s3382_s24  ;;  %s2393_s20 = sshll.u32 %s2703_s30, 4 }
  0x1a   : > { %3385 = sst [smem:[#allocation15_spill]] %s3384_s25  ;;  %s3386_s1 = sld [smem:[#allocation17_spill]] }
  0x1b   : > { %s525_s19 = scalar_lea.vmem [#allocation4], %s522_s26  ;;  %p2883_p13 = pnand %p2532_p10, %p2853_p5 }
  0x1c   : > { %s532_s18 = sshll.u32 %s525_s19, 4  ;;  %s523_s22 = scalar_lea.sflag [#allocation5], %s522_s26  ;;  %s2879_s18 = int_to_ptr.vmem [resolvable:$true] %s532_s18 }
  0x1d   : > { %p2609_p3 = pneg %p2883_p13 }
  0x20   : > { %s2877_s27 = scalar_lea.hbm %s3386_s1, %s2393_s20  ;;  %s2612_s2 = scalar_lea.hbm %s3386_s1, 32 }
  0x21   : > { %s2607_s20 = scalar_lea.hbm %s2877_s27, 16  ;;  %p2613_p5 = scmp.lt.u32.totalorder %s2877_s27, %s3386_s1 }
  0x22   : > { %p2608_p2 = scmp.ne.s32.totalorder %s2877_s27, %s2607_s20  ;;  %p2614_p8 = scmp.lt.u32.totalorder %s2612_s2, %s2607_s20 }
  0x23   : > { %p2616_p9 = scmp.lt.u32.totalorder %s2607_s20, %s2877_s27 }
  0x24   : > { %p2610_p4 = pnand %p2609_p3, %p2608_p2  ;;  %p2615_p10 = por %p2614_p8, %p2613_p5 }
  0x26   : > { %p2611_p7 = pneg %p2610_p4  ;;  %p2617_p0 = por %p2616_p9, %p2615_p10 }
  0x28   : > { %p2618_p1 = pnand %p2617_p0, %p2611_p7 }
  0x2a   : > { %2621 = shalt.err (!%p2618_p1)
}
  0x2b   : > { %s2622_s26 = scalar_lea.vmem %s2879_s18, 16  ;;  %s2705_s21 = smov [#allocation4]  }
  0x2c   : > { %p2623_p2 = scmp.ne.s32.totalorder %s2879_s18, %s2622_s26  ;;  %s2627_s19 = sshll.u32 %s2705_s21, 4  ;;  %s2628_s19 = int_to_ptr.vmem [resolvable:$false] %s2627_s19 }
  0x2d   : > { %s2629_s29 = scalar_lea.vmem %s2628_s19, 32  ;;  %p2630_p11 = scmp.lt.s32.totalorder %s2879_s18, %s2628_s19 }
  0x2e   : > { %p2625_p4 = pnand %p2623_p2, %p2609_p3  ;;  %p2631_p5 = scmp.lt.s32.totalorder %s2629_s29, %s2622_s26 }
  0x30   : > { %p2626_p12 = pneg %p2625_p4  ;;  %p2632_p8 = por %p2631_p5, %p2630_p11 }
  0x32   : > { %p2633_p9 = pnand %p2632_p8, %p2626_p12 }
  0x34   : > { %2636 = shalt.err (!%p2633_p9)
}
  0x35   : > { %2527 = dma.hbm_to_vmem [thread:$0]  (!%p2883_p13), %s2877_s27, 16, %s2879_s18, %s523_s22  }
  0x36   : > { %p3388_p0 = scmp.lt.s32.totalorder %s2703_s30, 3  ;;  %p3389_p1 = scmp.ge.s32.totalorder %s2703_s30, 1 }
  0x38   : > { %p538_p3 = pnand %p3389_p1, %p3388_p0 }
  0x39   : > { %s2919_s25 = sand.u32 (!%p538_p3), 1, %s2695_s28  }
  0x3a   : > { %541 = sbr.rel (%p538_p3) target bundleno = 2223 (0x8af), region = 92  ;;  %s544_s20 = scalar_lea.sflag (!%p538_p3), [#allocation5], %s2919_s25 }
  0x3b   : > { %s546_s2 = scalar_lea.vmem (!%p538_p3), [#allocation4], %s2919_s25 }
  0x41   : > { %2682 = dma.done.wait (%p2857_p6), %s544_s20, 16  }
  0x42   : > { %2684 = vsyncadd (%p2857_p6), %s544_s20, 4294967280  ;;  %p603_p11 = scmp.lt.s32.totalorder %s2835_s0, 1  ;;  %vm609_vm0 = vcmask 138240   ;;  %v2706_v0 = vmov 0   ;;  %vm611_vm1 = vcmask 277640   ;;  %s3390_s22 = sld [smem:[#allocation16_spill]] }
  0x43   : > { %610 = vst.msk [vmem:[#allocation2] sm:$0xff] %vm609_vm0, %v2706_v0  ;;  %722 = vmatprep.mubr.bf16.mxu0 %v2706_v0  ;;  %900 = vmatprep.mubr.bf16.mxu1 %v2706_v0  ;;  %s2707_s21 = smov 17   ;;  %vm634_vm2 = vcmask 1047688   ;;  %s2708_s19 = smov 112   ;;  %vm681_vm3 = vcmask 916480   ;;  %vm686_vm4 = vcmask 130048  }
  0x44   : > { %s604_s18 = scalar_select %p603_p11, %s2835_s0, 1  ;;  %612 = vst.msk [vmem:[#allocation2 + $0x10] sm:$0xff] %vm611_vm1, %v2706_v0  ;;  %2578 = vset.pattern.permute.xlu0 %v2706_v0  ;;  %2579 = vset.pattern.permute.xlu1 %v2706_v0  ;;  %vm783_vm5 = vcmask 785408   ;;  %vm1035_vm6 = vcmask 900096   ;;  %vm860_vm7 = vcmask 908288   ;;  %vm1090_vm8 = vcmask 1031168  }
  0x45   : > { %s3360_s29 = smov 96   ;;  %s3362_s20 = smov 110   ;;  %vm915_vm9 = vcmask 1039360   ;;  %vm972_vm10 = vcmask 777216   ;;  %vm1147_vm11 = vcmask 769024   ;;  %v2716_v62 = vmov 0.0  }
  0x46   : > { %s2457_s27 = sshll.u32 %s604_s18, 5  ;;  %s3368_s18 = smov 111   ;;  %vm2717_vm12 = vmmov 0   ;;  %vm653_vm13 = vcmask 261120   ;;  %vm1232_vm14 = vcmask 64512   ;;  %vm613_vm15 = vcmask 134144  }
  0x47   : > { %s3366_s23 = smov 127   ;;  %s3358_s24 = smov 95   ;;  %vm615_vm1 = vcmask 273544   ;;  %614 = vst.msk [vmem:[#allocation3] sm:$0xf] %vm613_vm15, %v2706_v0 }
  0x48   : > { %s607_s26 = scalar_lea.vmem %s3390_s22, %s2457_s27  ;;  %s3356_s27 = smov 126   ;;  %616 = vst.msk [vmem:[#allocation3 + $0x8] sm:$0xf] %vm615_vm1, %v2706_v0 }
  0x49   : > { %v617_v1 = vld [vmem:[%s607_s26] sm:$0xff]  ;;  %v619_v2 = vld [vmem:[%s607_s26 + $0x10] sm:$0xff]  ;;  %v618_v3 = vld [vmem:[%s607_s26 + $0x8] sm:$0xff]  ;;  %s3364_s22 = smov 94   ;;  %s3391_s3 = sld [smem:[#allocation19_spill]] }
  0x4a   : > { %v621_v4 = vpack.c.bf16 %v619_v2, %v617_v1  ;;  %v620_v5 = vld [vmem:[%s607_s26 + $0x18] sm:$0xff]  ;;  %v647_v2 = vlaneseq  ;;  %s3395_s26 = smov 110  }
  0x4b   : > { %v622_v6 = vpack.c.bf16 %v620_v5, %v618_v3 }
  0x4c   : > { %625 = vrot.lane.b32.xlu0 %v621_v4, %s2707_s21 }
  0x4f   : > { %v1215_v12 = vld [vmem:[%s3391_s3] sm:$0xff] }
  0x50   : > { %627 = vrot.lane.b32.xlu0 %v622_v6, %s2707_s21 }
  0xbe   : > { %v626_v7 = vpop.permute.xlu0 %625 }
  0xbf   : > { %635 = vst.msk [vmem:[#allocation2] sm:$0xff] %vm634_vm2, %v626_v7  ;;  %vm1441_vm2 = vcmask 1043592  }
  0xc2   : > { %v628_v8 = vpop.permute.xlu0 %627 }
  0xc3   : > { %v2942_v9 = vsel %vm609_vm0, %v626_v7, %v628_v8  ;;  %637 = vst.msk [vmem:[#allocation2 + $0x10] sm:$0xff] %vm609_vm0, %v628_v8 }
  0xc4   : > { %677 = vrot.lane.b32.xlu1 %v2942_v9, %s2708_s19 }
  0xc6   : > { %v2947_v10 = vld [vmem:[#allocation2] sm:$0xff] }
  0xc7   : > { %675 = vrot.lane.b32.xlu0 %v2947_v10, %s2708_s19 }
  0xca   : > { %v2951_v11 = vld [vmem:[#allocation2 + $0x10] sm:$0xff] }
  0xcb   : > { %781 = vrot.lane.b32.xlu0 %v2951_v11, %s3360_s29  ;;  %679 = vrot.lane.b32.xlu1 %v2951_v11, %s2708_s19 }
  0xcf   : > { %1029 = vrot.lane.b32.xlu0 %v2947_v10, %s3362_s20  ;;  %777 = vrot.lane.b32.xlu1 %v2947_v10, %s3360_s29 }
  0xd3   : > { %858 = vrot.lane.b32.xlu0 %v2951_v11, %s3368_s18  ;;  %779 = vrot.lane.b32.xlu1 %v2942_v9, %s3360_s29  ;;  %s3396_s29 = smov 96  }
  0xd7   : > { %1031 = vrot.lane.b32.xlu0 %v2942_v9, %s3362_s20  ;;  %1033 = vrot.lane.b32.xlu1 %v2951_v11, %s3362_s20  ;;  %s3392_s20 = sld [smem:[#allocation18_spill]] }
  0xdb   : > { %1084 = vrot.lane.b32.xlu0 %v2947_v10, %s3356_s27  ;;  %854 = vrot.lane.b32.xlu1 %v2947_v10, %s3368_s18 }
  0xdd   : > { %v2398_v19 = vld [vmem:[%s3392_s20 + $0xc] sm:$0xf]  ;;  %v668_v27 = vld [vmem:[%s3392_s20] sm:$0xf]  ;;  %v2401_v38 = vld [vmem:[%s3392_s20 + $0x18] sm:$0xf] }
  0xde   : > { %v2404_v39 = vld [vmem:[%s3392_s20 + $0x10] sm:$0xf]  ;;  %v2403_v48 = vld [vmem:[%s3392_s20 + $0x4] sm:$0xf]  ;;  %v2410_v50 = vld [vmem:[%s3392_s20 + $0x14] sm:$0xf] }
  0xdf   : > { %913 = vrot.lane.b32.xlu0 %v2951_v11, %s3366_s23  ;;  %1088 = vrot.lane.b32.xlu1 %v2951_v11, %s3356_s27  ;;  %v2407_v57 = vld [vmem:[%s3392_s20 + $0x1c] sm:$0xf]  ;;  %v2409_v59 = vld [vmem:[%s3392_s20 + $0x8] sm:$0xf] }
  0xe0   : > { %v2413_v61 = vld [vmem:[%s3392_s20 + $0x20] sm:$0xf] }
  0xe3   : > { %1086 = vrot.lane.b32.xlu0 %v2942_v9, %s3356_s27  ;;  %856 = vrot.lane.b32.xlu1 %v2942_v9, %s3368_s18  ;;  %s3393_s18 = smov 111   ;;  %s3397_s27 = smov 126  }
  0xe7   : > { %966 = vrot.lane.b32.xlu0 %v2947_v10, %s3358_s24  ;;  %909 = vrot.lane.b32.xlu1 %v2947_v10, %s3366_s23 }
  0xeb   : > { %968 = vrot.lane.b32.xlu0 %v2942_v9, %s3358_s24  ;;  %911 = vrot.lane.b32.xlu1 %v2942_v9, %s3366_s23  ;;  %s3399_s23 = smov 94  }
  0xef   : > { %1145 = vrot.lane.b32.xlu0 %v2951_v11, %s3364_s22  ;;  %970 = vrot.lane.b32.xlu1 %v2951_v11, %s3358_s24 }
  0xf3   : > { %1143 = vrot.lane.b32.xlu1 %v2942_v9, %s3364_s22  ;;  %1218 = vperm.xlu0 %2578, %v1215_v12   ;;  %v648_v12 = vshrl.u32 %v647_v2, 7 }
  0xf7   : > { %1141 = vrot.lane.b32.xlu1 %v2947_v10, %s3364_s22 }
 0x136   : > { %v678_v14 = vpop.permute.xlu1 %677 }
 0x139   : > { %v676_v13 = vpop.permute.xlu0 %675 }
 0x13a   : > { %v682_v18 = vsel %vm681_vm3, %v676_v13, %v678_v14 }
 0x13d   : > { %v782_v15 = vpop.permute.xlu0 %781  ;;  %v680_v16 = vpop.permute.xlu1 %679 }
 0x13e   : > { %v683_v17 = vsel %vm681_vm3, %v678_v14, %v680_v16  ;;  %v3063_v14 = vsub.s32 0, %v648_v12 }
 0x13f   : > { %690 = vmatprep.subr.bf16.mxu0 %v683_v17  ;;  %v834_v17 = vld [vmem:[%s3341_s15] ss:$2 sm:$0x3] }
 0x140   : > { %691 = vmatpush1.bf16.msra.mxu0 %v682_v18  ;;  %v3068_v18 = vsub.s32 1, %v648_v12 }
 0x141   : > { %v1030_v20 = vpop.permute.xlu0 %1029  ;;  %v778_v21 = vpop.permute.xlu1 %777  ;;  %734 = vmatprep.subr.bf16.mxu0 %v2942_v9 }
 0x143   : > { %2399 = vmatmul.mubr.msk.bf16.vlgmr.msra.gmra.mrb[0].mxu0 %vm686_vm4, %v2398_v19 }
 0x144   : > { %735 = vmatpush1.bf16.msra.mxu0 %v2947_v10  ;;  %766 = vmatprep.mubr.bf16.mxu0 %v2706_v0 }
 0x145   : > { %v859_v22 = vpop.permute.xlu0 %858  ;;  %v780_v23 = vpop.permute.xlu1 %779 }
 0x146   : > { %v785_v24 = vsel %vm783_vm5, %v780_v23, %v782_v15  ;;  %v784_v30 = vsel %vm783_vm5, %v778_v21, %v780_v23  ;;  %v843_v23 = vrot.slane %v834_v17, %v3068_v18 }
 0x147   : > { %791 = vmatprep.subr.bf16.mxu0 %v785_v24 }
 0x149   : > { %v1032_v25 = vpop.permute.xlu0 %1031  ;;  %v1034_v26 = vpop.permute.xlu1 %1033 }
 0x14a   : > { %v1037_v31 = vsel %vm1035_vm6, %v1032_v25, %v1034_v26  ;;  %v1036_v42 = vsel %vm1035_vm6, %v1030_v20, %v1032_v25 }
 0x14d   : > { %v1085_v28 = vpop.permute.xlu0 %1084  ;;  %v855_v29 = vpop.permute.xlu1 %854 }
 0x14f   : > { %2400 = vmatmul.mubr.msk.bf16.vlgmr.msra.gmra.mrb[0].mxu0 %vm686_vm4, %v668_v27 }
 0x150   : > { %792 = vmatpush1.bf16.msra.mxu0 %v784_v30  ;;  %823 = vmatprep.mubr.bf16.mxu0 %v2706_v0 }
 0x151   : > { %v914_v32 = vpop.permute.xlu0 %913  ;;  %1043 = vmatprep.subr.bf16.mxu0 %v1037_v31  ;;  %v1089_v33 = vpop.permute.xlu1 %1088 }
 0x155   : > { %v1087_v34 = vpop.permute.xlu0 %1086  ;;  %v857_v35 = vpop.permute.xlu1 %856 }
 0x156   : > { %v862_v36 = vsel %vm860_vm7, %v857_v35, %v859_v22  ;;  %v861_v37 = vsel %vm860_vm7, %v855_v29, %v857_v35  ;;  %v1092_v43 = vsel %vm1090_vm8, %v1087_v34, %v1089_v33  ;;  %v1091_v53 = vsel %vm1090_vm8, %v1085_v28, %v1087_v34  ;;  %v2415_v34 = vld [vmem:[%s3341_s15 + $0x1] ss:$2 sm:$0x3] }
 0x157   : > { %868 = vmatprep.subr.bf16.mxu1 %v862_v36  ;;  %v839_v22 = vrot.slane %v834_v17, %v3063_v14  ;;  %v1204_v35 = vrot.slane %v2415_v34, %v3063_v14  ;;  %v1208_v36 = vrot.slane %v2415_v34, %v3068_v18 }
 0x158   : > { %869 = vmatpush1.bf16.msra.mxu1 %v861_v37 }
 0x159   : > { %v967_v40 = vpop.permute.xlu0 %966  ;;  %v910_v41 = vpop.permute.xlu1 %909 }
 0x15b   : > { %2402 = vmatmul.mubr.msk.bf16.vlgmr.msra.gmra.mrb[0].mxu0 %vm686_vm4, %v2401_v38  ;;  %2405 = vmatmul.mubr.msk.bf16.vlgmr.msra.gmra.mrb[0].mxu1 %vm686_vm4, %v2404_v39 }
 0x15c   : > { %1044 = vmatpush1.bf16.msra.mxu0 %v1036_v42  ;;  %955 = vmatprep.mubr.bf16.mxu1 %v2706_v0 }
 0x15d   : > { %1098 = vmatprep.subr.bf16.mxu0 %v1092_v43  ;;  %v912_v44 = vpop.permute.xlu1 %911  ;;  %1075 = vmatprep.mubr.bf16.mxu0 %v2706_v0  ;;  %v969_v47 = vpop.permute.xlu0 %968 }
 0x15e   : > { %v916_v45 = vsel %vm915_vm9, %v910_v41, %v912_v44  ;;  %v917_v46 = vsel %vm915_vm9, %v912_v44, %v914_v32  ;;  %v973_v52 = vsel %vm972_vm10, %v967_v40, %v969_v47 }
 0x15f   : > { %923 = vmatprep.subr.bf16.mxu1 %v917_v46 }
 0x160   : > { %924 = vmatpush1.bf16.msra.mxu1 %v916_v45 }
 0x161   : > { %v971_v49 = vpop.permute.xlu1 %970  ;;  %v1146_v54 = vpop.permute.xlu0 %1145 }
 0x162   : > { %v974_v51 = vsel %vm972_vm10, %v969_v47, %v971_v49 }
 0x163   : > { %2406 = vmatmul.mubr.msk.bf16.vlgmr.msra.gmra.mrb[4].mxu1 %vm686_vm4, %v2403_v48  ;;  %980 = vmatprep.subr.bf16.mxu1 %v974_v51 }
 0x164   : > { %2411 = vmatmul.mubr.msk.bf16.vlgmr.msra.gmra.mrb[4].mxu0 %vm686_vm4, %v2410_v50  ;;  %981 = vmatpush1.bf16.msra.mxu1 %v973_v52  ;;  %v638_v52 = vld [vmem:[%s546_s2] sm:$0x1]  ;;  %s3401_s2 = sld [smem:[#allocation20_spill]] }
 0x165   : > { %1099 = vmatpush1.bf16.msra.mxu0 %v1091_v53  ;;  %v1144_v55 = vpop.permute.xlu1 %1143  ;;  %1012 = vmatprep.mubr.bf16.mxu1 %v2706_v0  ;;  %v639_v53 = vsub.f32 0.0, %v638_v52 }
 0x166   : > { %v1149_v56 = vsel %vm1147_vm11, %v1144_v55, %v1146_v54  ;;  %1130 = vmatprep.mubr.bf16.mxu0 %v2706_v0  ;;  %2468 = vmatprep.subr.mxu1 %v2716_v62 }
 0x167   : > { %1155 = vmatprep.subr.bf16.mxu0 %v1149_v56  ;;  %v640_v54 = vmul.f32 1.442695, %v639_v53 }
 0x169   : > { %v1142_v58 = vpop.permute.xlu1 %1141  ;;  %2583 = vpow2.f32 %v640_v54 }
 0x16a   : > { %v1148_v60 = vsel %vm1147_vm11, %v1142_v58, %v1144_v55 }
 0x16b   : > { %2408 = vmatmul.mubr.msk.bf16.vlgmr.msra.gmra.mrb[8].mxu1 %vm686_vm4, %v2407_v57 }
 0x16c   : > { %2470 = vmatprep.mubr.msk.f32.mxu1 %vm2717_vm12, %v2716_v62 }
 0x170   : > { %2412 = vmatmul.mubr.msk.bf16.vlgmr.msra.gmra.mrb[4].mxu0 %vm686_vm4, %v2409_v59  ;;  %v645_v59 = vld [vmem:[%s3336_s10] sm:$0xff] }
 0x171   : > { %1156 = vmatpush1.bf16.msra.mxu0 %v1148_v60  ;;  %1187 = vmatprep.mubr.bf16.mxu0 %v2706_v0  ;;  %v659_v60 = vld [vmem:[%s3338_s12] sm:$0xff] }
 0x172   : > { %v1219_v42 = vpop.permute.xlu0 %1218 }
 0x173   : > { %v2584_v55 = vpop.eup %2583 }
 0x174   : > { %v642_v56 = vadd.f32 1.0, %v2584_v55 }
 0x176   : > { %2585 = vrcp.f32 %v642_v56 }
 0x17c   : > { %2414 = vmatmul.mubr.msk.bf16.vlgmr.msra.gmra.mrb[4].mxu0 %vm686_vm4, %v2413_v61 }
 0x17d   : > { %1699 = vmatprep.mubr.bf16.mxu0 %v2706_v0 }
 0x180   : > { %v2586_v57 = vpop.eup %2585 }
 0x181   : > { %v644_v58 = vmul.f32 %v2586_v57, %v638_v52 }
 0x183   : > { %v650_v61 = vrot.slane %v644_v58, %v3063_v14 }
 0x22e   : > { %v825_v63 = vpop.f32.mrb[0].mxu0  ;;  %v902_v1 = vpop.f32.mrb[0].mxu1 }
 0x22f   : > { %v827_v3 = vpop.f32.mrb[1].mxu0  ;;  %v904_v4 = vpop.f32.mrb[1].mxu1  ;;  %v846_v25 = vmul.f32 %v839_v22, %v825_v63  ;;  %v652_v63 = vmul.f32 %v650_v61, %v645_v59 }
 0x230   : > { %v829_v5 = vpop.f32.mrb[2].mxu0  ;;  %v906_v6 = vpop.f32.mrb[2].mxu1  ;;  %v847_v28 = vmul.f32 %v843_v23, %v827_v3  ;;  %v1382_v23 = vld [vmem:[%s3330_s4] sm:$0xff] }
 0x231   : > { %v830_v7 = vpop.f32.mrb[3].mxu0  ;;  %v907_v8 = vpop.f32.mrb[3].mxu1  ;;  %v654_v2 = vsel %vm653_vm13, %v652_v63, 0.0 }
 0x236   : > { %v957_v13 = vpop.f32.mrb[4].mxu1 }
 0x237   : > { %v958_v15 = vadd.f32 %v957_v13, %v902_v1  ;;  %v959_v16 = vpop.f32.mrb[5].mxu1  ;;  %v660_v1 = vmul.f32 %v659_v60, %v650_v61 }
 0x238   : > { %v960_v19 = vadd.f32 %v959_v16, %v904_v4  ;;  %v961_v20 = vpop.f32.mrb[6].mxu1  ;;  %v3101_v4 = vld [vmem:[%s3340_s14] sm:$0xff] }
 0x239   : > { %v962_v21 = vpop.f32.mrb[7].mxu1  ;;  %v661_v3 = vsel %vm653_vm13, %v660_v1, 0.0  ;;  %vm1442_vm13 = vcmask 1047556  }
 0x23a   : > { %v657_v21 = vld [vmem:[%s3337_s11] sm:$0xff]  ;;  %vm1443_vm1 = vmor %vm1442_vm13, %vm1441_vm2 }
 0x23e   : > { %v1014_v24 = vpop.f32.mrb[8].mxu1 }
 0x23f   : > { %v1021_v26 = vadd.f32 %v1014_v24, %v958_v15  ;;  %v1016_v27 = vpop.f32.mrb[9].mxu1 }
 0x240   : > { %v1022_v29 = vadd.f32 %v1016_v27, %v960_v19  ;;  %v1018_v30 = vpop.f32.mrb[10].mxu1  ;;  %v1384_v27 = vld [vmem:[%s3331_s5] sm:$0xff] }
 0x241   : > { %v1023_v31 = vadd.f32 %v1021_v26, %v846_v25  ;;  %v1019_v32 = vpop.f32.mrb[11].mxu1  ;;  %v664_v30 = vld [vmem:[%s3339_s13] sm:$0xff] }
 0x242   : > { %v1024_v33 = vadd.f32 %v1022_v29, %v847_v28 }
 0x24f   : > { %v1189_v37 = vpop.f32.mrb[4].mxu0 }
 0x250   : > { %v1211_v38 = vmul.f32 %v1204_v35, %v1189_v37  ;;  %v1191_v39 = vpop.f32.mrb[5].mxu0 }
 0x251   : > { %v1212_v40 = vmul.f32 %v1208_v36, %v1191_v39  ;;  %v1193_v41 = vpop.f32.mrb[6].mxu0 }
 0x252   : > { %v1213_v43 = vadd.f32 %v1211_v38, %v1023_v31  ;;  %v1194_v44 = vpop.f32.mrb[7].mxu0 }
 0x253   : > { %v1214_v45 = vadd.f32 %v1212_v40, %v1024_v33 }
 0x254   : > { %v3077_v46 = vadd.f32 %v1219_v42, %v1213_v43 }
 0x255   : > { %v3079_v47 = vadd.f32 %v1219_v42, %v1214_v45 }
 0x256   : > { %v1226_v48 = vmul.f32 %v3077_v46, %v3077_v46 }
 0x257   : > { %v1223_v49 = vadd.f32 %v3079_v47, %v3077_v46  ;;  %v1227_v50 = vmul.f32 %v3079_v47, %v3079_v47 }
 0x259   : > { %1224 = vadd.xlane.f32.xlu1 %v1223_v49  ;;  %v1228_v51 = vadd.f32 %v1227_v50, %v1226_v48 }
 0x25b   : > { %1229 = vadd.xlane.f32.xlu0 %v1228_v51 }
 0x25d   : > { %655 = vadd.xlane.f32.xlu1 %v654_v2 }
 0x25f   : > { %662 = vadd.xlane.f32.xlu0 %v661_v3 }
 0x2e6   : > { %v1225_v5 = vpop.xlane.xlu1 %1224 }
 0x2e7   : > { %2469 = vmatpush3.msra.mxu1 %v1225_v5  ;;  %v2028_v5 = vld [vmem:[%s3333_s7] sm:$0xff] }
 0x2e8   : > { %v1230_v6 = vpop.xlane.xlu0 %1229  ;;  %2471 = vmatmul.mubr.msk.f32.vlgmr.msra.gmra.mrb[12].mxu1 %vm1232_vm14, %v3101_v4  ;;  %2473 = vmatprep.subr.mxu1 %v2716_v62 }
 0x2e9   : > { %2474 = vmatpush3.msra.mxu1 %v1230_v6  ;;  %2475 = vmatprep.mubr.msk.f32.mxu1 %vm2717_vm12, %v2716_v62 }
 0x2ea   : > { %v656_v22 = vpop.xlane.xlu1 %655 }
 0x2eb   : > { %v658_v24 = vadd.f32 %v657_v21, %v656_v22 }
 0x2ec   : > { %2476 = vmatmul.mubr.msk.f32.vlgmr.msra.gmra.mrb[14].mxu1 %vm1232_vm14, %v3101_v4  ;;  %v663_v31 = vpop.xlane.xlu0 %662 }
 0x2ed   : > { %1509 = vmatprep.mubr.bf16.mxu1 %v2706_v0  ;;  %v1401_v28 = vadd.f32 1.0, %v658_v24  ;;  %v665_v33 = vadd.f32 %v664_v30, %v663_v31  ;;  %v2419_v24 = vld [vmem:[%s3332_s6 + $0xc] sm:$0xf] }
 0x3bb   : > { %v1302_v7 = vpop.f32.mrb[12].mxu1 }
 0x3bc   : > { %v1306_v8 = vmul.f32 0.001953125, %v1302_v7  ;;  %v2472_v12 = vpop.f32.mrb[13].mxu1 }
 0x3be   : > { %v1378_v15 = vmul.f32 %v1306_v8, %v1306_v8 }
 0x3bf   : > { %v1373_v13 = vpop.f32.mrb[14].mxu1 }
 0x3c0   : > { %v1377_v16 = vmul.f32 0.001953125, %v1373_v13  ;;  %v2477_v17 = vpop.f32.mrb[15].mxu1 }
 0x3c1   : > { %v2431_v17 = vld [vmem:[%s3332_s6 + $0x10] sm:$0xf] }
 0x3c2   : > { %v1379_v19 = vsub.f32 %v1377_v16, %v1378_v15 }
 0x3c4   : > { %v1380_v20 = vadd.f32 1e-05, %v1379_v19 }
 0x3c6   : > { %2587 = vrsqrt.f32 %v1380_v20 }
 0x3d0   : > { %v2588_v25 = vpop.eup %2587 }
 0x3d1   : > { %v1383_v26 = vmul.f32 %v2588_v25, %v1382_v23 }
 0x3d3   : > { %1389 = vperm.xlu1 %2579, %v1383_v26   ;;  %v1385_v29 = vmul.f32 %v1383_v26, %v1306_v8 }
 0x3d5   : > { %v1386_v32 = vsub.f32 %v1384_v27, %v1385_v29 }
 0x3d7   : > { %1396 = vperm.xlu0 %2578, %v1386_v32   ;;  %1404 = vperm.xlu1 %2579, %v1401_v28  }
 0x3db   : > { %1411 = vperm.xlu1 %2579, %v665_v33   ;;  %v2430_v33 = vld [vmem:[%s3332_s6 + $0x4] sm:$0xf] }
 0x452   : > { %v1390_v34 = vpop.permute.xlu1 %1389 }
 0x453   : > { %v1392_v35 = vmul.f32 %v1390_v34, %v3077_v46  ;;  %v1393_v36 = vmul.f32 %v1390_v34, %v3079_v47 }
 0x456   : > { %v1397_v37 = vpop.permute.xlu0 %1396  ;;  %v1405_v38 = vpop.permute.xlu1 %1404 }
 0x457   : > { %v1399_v39 = vadd.f32 %v1397_v37, %v1392_v35  ;;  %v1400_v40 = vadd.f32 %v1397_v37, %v1393_v36 }
 0x459   : > { %v1407_v41 = vmul.f32 %v1405_v38, %v1399_v39  ;;  %v1408_v42 = vmul.f32 %v1405_v38, %v1400_v40  ;;  %v1447_v39 = vld [vmem:[%s3332_s6] sm:$0xf] }
 0x45a   : > { %v1412_v43 = vpop.permute.xlu1 %1411 }
 0x45b   : > { %v1414_v44 = vadd.f32 %v1412_v43, %v1407_v41  ;;  %v1415_v45 = vadd.f32 %v1412_v43, %v1408_v42  ;;  %v2440_v42 = vld [vmem:[%s3332_s6 + $0x14] sm:$0xf] }
 0x45d   : > { %v1416_v48 = vsub.f32 0.0, %v1414_v44  ;;  %v1417_v49 = vsub.f32 0.0, %v1415_v45 }
 0x45f   : > { %v1418_v50 = vmul.f32 1.442695, %v1416_v48  ;;  %v1420_v51 = vmul.f32 1.442695, %v1417_v49 }
 0x461   : > { %2589 = vpow2.f32 %v1418_v50 }
 0x462   : > { %2591 = vpow2.f32 %v1420_v51 }
 0x46b   : > { %v2590_v52 = vpop.eup %2589 }
 0x46c   : > { %v2592_v53 = vpop.eup %2591  ;;  %v1422_v46 = vadd.f32 1.0, %v2590_v52 }
 0x46d   : > { %v1423_v54 = vadd.f32 1.0, %v2592_v53 }
 0x46e   : > { %2593 = vrcp.f32 %v1422_v46 }
 0x46f   : > { %2595 = vrcp.f32 %v1423_v54  ;;  %v2427_v54 = vld [vmem:[%s3332_s6 + $0x18] sm:$0xf] }
 0x478   : > { %v2594_v47 = vpop.eup %2593 }
 0x479   : > { %v2596_v55 = vpop.eup %2595  ;;  %v1426_v56 = vmul.f32 %v2594_v47, %v1414_v44 }
 0x47a   : > { %v1427_v57 = vmul.f32 %v2596_v55, %v1415_v45 }
 0x47c   : > { %v2458_v58 = vpack.c.bf16 %v1427_v57, %v1426_v56  ;;  %v2439_v57 = vld [vmem:[%s3332_s6 + $0x8] sm:$0xf] }
 0x47e   : > { %1435 = vrot.lane.b32.xlu0 %v2458_v58, %s2707_s21  ;;  %s3394_s21 = smov 127  }
 0x4f0   : > { %v1436_v59 = vpop.permute.xlu0 %1435 }
 0x4f1   : > { %v1437_v60 = vrot.slane %v1436_v59, 4 }
 0x4f3   : > { %v1438_v61 = vsel %vm609_vm0, %v1437_v60, %v1436_v59  ;;  %1445 = vst.msk [vmem:[#allocation3 + $0x8] sm:$0xf] %vm613_vm15, %v1437_v60  ;;  %vm1470_vm0 = vcmask 1043456  }
 0x4f4   : > { %1444 = vst.msk [vmem:[#allocation3] sm:$0xff] %vm1443_vm1, %v1438_v61 }
 0x4fa   : > { %v2582_v63 = vld [vmem:[#allocation3 + $0x8] ss:$0 sps:$4 sm:$0xff]  }
 0x4fb   : > { %v1446_v1 = vld [vmem:[#allocation3] sm:$0xff]  ;;  %1463 = vrot.lane.b32.xlu0 %v2582_v63, %s2708_s19  ;;  %1654 = vrot.lane.b32.xlu1 %v2582_v63, %s3393_s18 }
 0x4fc   : > { %v2420_v2 = vcombine.low %v1446_v1, %v1446_v1  ;;  %v2421_v3 = vcombine.high %v1446_v1, %v1446_v1 }
 0x4fe   : > { %v1522_v27 = vsel %vm1470_vm0, %v2420_v2, 0 }
 0x4ff   : > { %1652 = vrot.lane.b32.xlu0 %v2421_v3, %s3393_s18  ;;  %1650 = vrot.lane.b32.xlu1 %v2420_v2, %s3393_s18 }
 0x503   : > { %1459 = vrot.lane.b32.xlu0 %v2420_v2, %s2708_s19  ;;  %1461 = vrot.lane.b32.xlu1 %v2421_v3, %s2708_s19  ;;  %s3398_s19 = smov 95  }
 0x507   : > { %1710 = vrot.lane.b32.xlu0 %v2421_v3, %s3394_s21  ;;  %1708 = vrot.lane.b32.xlu1 %v2420_v2, %s3394_s21 }
 0x50b   : > { %1838 = vrot.lane.b32.xlu0 %v2582_v63, %s3395_s26  ;;  %1712 = vrot.lane.b32.xlu1 %v2582_v63, %s3394_s21  ;;  %s2297_s21 = scalar_lea.sflag [#allocation6], %s2919_s25 }
 0x50f   : > { %1834 = vrot.lane.b32.xlu0 %v2420_v2, %s3395_s26  ;;  %1836 = vrot.lane.b32.xlu1 %v2421_v3, %s3395_s26  ;;  %s2395_s26 = sshll.u32 %s2919_s25, 4 }
 0x513   : > { %1574 = vrot.lane.b32.xlu0 %v2582_v63, %s3396_s29  ;;  %1896 = vrot.lane.b32.xlu1 %v2582_v63, %s3397_s27 }
 0x517   : > { %1894 = vrot.lane.b32.xlu0 %v2421_v3, %s3397_s27  ;;  %1892 = vrot.lane.b32.xlu1 %v2420_v2, %s3397_s27  ;;  %s602_s27 = scalar_lea.vmem [#allocation7], %s2395_s26  ;;  %s2718_s26 = smov [#allocation7]  }
 0x518   : > { %s2641_s1 = sshll.u32 %s2718_s26, 4  ;;  %s2642_s1 = int_to_ptr.vmem [resolvable:$false] %s2641_s1 }
 0x519   : > { %s2643_s3 = scalar_lea.vmem %s2642_s1, 512 }
 0x51b   : > { %1570 = vrot.lane.b32.xlu0 %v2420_v2, %s3396_s29  ;;  %1572 = vrot.lane.b32.xlu1 %v2421_v3, %s3396_s29  ;;  %s3400_s29 = sld [smem:[#allocation14_spill]] }
 0x51f   : > { %1770 = vrot.lane.b32.xlu0 %v2421_v3, %s3398_s19  ;;  %1772 = vrot.lane.b32.xlu1 %v2582_v63, %s3398_s19 }
 0x521   : > { %p3402_p12 = scmp.ne.s32.totalorder %s3400_s29, 0 }
 0x523   : > { %1952 = vrot.lane.b32.xlu0 %v2420_v2, %s3399_s23  ;;  %1768 = vrot.lane.b32.xlu1 %v2420_v2, %s3398_s19  ;;  %s2311_s19 = sshll.u32 %s602_s27, 4  ;;  %s3284_s19 = int_to_ptr.vmem [resolvable:$true] %s2311_s19 }
 0x524   : > { %p2644_p10 = scmp.lt.s32.totalorder %s3284_s19, %s2642_s1 }
 0x527   : > { %1956 = vrot.lane.b32.xlu0 %v2582_v63, %s3399_s23  ;;  %1954 = vrot.lane.b32.xlu1 %v2421_v3, %s3399_s23  ;;  %v2436_v63 = vld [vmem:[%s3332_s6 + $0x1c] sm:$0xf] }
 0x52b   : > { %2031 = vperm.xlu1 %2579, %v2028_v5  }
 0x56d   : > { %v1464_v6 = vpop.permute.xlu0 %1463  ;;  %v1655_v7 = vpop.permute.xlu1 %1654 }
 0x571   : > { %v1653_v8 = vpop.permute.xlu0 %1652  ;;  %v1651_v12 = vpop.permute.xlu1 %1650 }
 0x572   : > { %v1657_v13 = vsel %vm860_vm7, %v1653_v8, %v1655_v7  ;;  %v1656_v15 = vsel %vm860_vm7, %v1651_v12, %v1653_v8  ;;  %v2445_v7 = vld [vmem:[%s3332_s6 + $0x20] sm:$0xf] }
 0x573   : > { %v1662_v16 = vsel %vm1470_vm0, %v1656_v15, 0  ;;  %2432 = vmatprep.subr.msk.bf16.mxu0 %vm1470_vm0, %v1657_v13 }
 0x574   : > { %1668 = vmatpush1.bf16.msra.mxu0 %v1662_v16 }
 0x575   : > { %v1460_v19 = vpop.permute.xlu0 %1459  ;;  %v1462_v20 = vpop.permute.xlu1 %1461 }
 0x576   : > { %v1465_v21 = vsel %vm681_vm3, %v1460_v19, %v1462_v20  ;;  %v1466_v22 = vsel %vm681_vm3, %v1462_v20, %v1464_v6 }
 0x577   : > { %v1472_v23 = vsel %vm1470_vm0, %v1465_v21, 0  ;;  %2423 = vmatprep.subr.msk.bf16.mxu1 %vm1470_vm0, %v1466_v22  ;;  %2433 = vmatmul.mubr.msk.bf16.vlgmr.msra.gmra.mrb[8].mxu0 %vm1232_vm14, %v2431_v17 }
 0x578   : > { %1478 = vmatpush1.bf16.msra.mxu1 %v1472_v23  ;;  %1757 = vmatprep.mubr.bf16.mxu0 %v2706_v0 }
 0x579   : > { %v1711_v25 = vpop.permute.xlu0 %1710  ;;  %2425 = vmatprep.subr.msk.bf16.mxu1 %vm1470_vm0, %v2421_v3  ;;  %v1709_v26 = vpop.permute.xlu1 %1708 }
 0x57a   : > { %v1714_v28 = vsel %vm915_vm9, %v1709_v26, %v1711_v25 }
 0x57b   : > { %2424 = vmatmul.mubr.msk.bf16.vlgmr.msra.gmra.mrb[16].mxu1 %vm1232_vm14, %v2419_v24  ;;  %v1720_v32 = vsel %vm1470_vm0, %v1714_v28, 0 }
 0x57c   : > { %1528 = vmatpush1.bf16.msra.mxu1 %v1522_v27  ;;  %1559 = vmatprep.mubr.bf16.mxu1 %v2706_v0 }
 0x57d   : > { %v1839_v29 = vpop.permute.xlu0 %1838  ;;  %v1713_v30 = vpop.permute.xlu1 %1712 }
 0x57e   : > { %v1715_v31 = vsel %vm915_vm9, %v1711_v25, %v1713_v30  ;;  %v1630_v25 = vld [vmem:[%s3341_s15] ss:$2 sm:$0x3] }
 0x57f   : > { %2434 = vmatprep.subr.msk.bf16.mxu0 %vm1470_vm0, %v1715_v31  ;;  %v1635_v28 = vrot.slane %v1630_v25, %v3063_v14 }
 0x580   : > { %1726 = vmatpush1.bf16.msra.mxu0 %v1720_v32 }
 0x581   : > { %v1835_v34 = vpop.permute.xlu0 %1834  ;;  %v1837_v35 = vpop.permute.xlu1 %1836 }
 0x582   : > { %v1840_v36 = vsel %vm1035_vm6, %v1835_v34, %v1837_v35  ;;  %v1841_v37 = vsel %vm1035_vm6, %v1837_v35, %v1839_v29  ;;  %v1639_v29 = vrot.slane %v1630_v25, %v3068_v18 }
 0x583   : > { %v1846_v38 = vsel %vm1470_vm0, %v1840_v36, 0  ;;  %2435 = vmatmul.mubr.msk.bf16.vlgmr.msra.gmra.mrb[12].mxu0 %vm1232_vm14, %v2430_v33  ;;  %2441 = vmatprep.subr.msk.bf16.mxu0 %vm1470_vm0, %v1841_v37  ;;  %v2448_v37 = vld [vmem:[%s3341_s15 + $0x1] ss:$2 sm:$0x3] }
 0x584   : > { %1852 = vmatpush1.bf16.msra.mxu0 %v1846_v38  ;;  %1883 = vmatprep.mubr.bf16.mxu0 %v2706_v0 }
 0x585   : > { %v1575_v40 = vpop.permute.xlu0 %1574  ;;  %v1897_v41 = vpop.permute.xlu1 %1896 }
 0x587   : > { %2426 = vmatmul.mubr.msk.bf16.vlgmr.msra.gmra.mrb[16].mxu1 %vm1232_vm14, %v1447_v39 }
 0x588   : > { %1619 = vmatprep.mubr.bf16.mxu1 %v2706_v0 }
 0x589   : > { %v1895_v43 = vpop.permute.xlu0 %1894  ;;  %v1893_v44 = vpop.permute.xlu1 %1892 }
 0x58a   : > { %v1899_v45 = vsel %vm1090_vm8, %v1895_v43, %v1897_v41  ;;  %v1898_v48 = vsel %vm1090_vm8, %v1893_v44, %v1895_v43  ;;  %v2017_v41 = vrot.slane %v2448_v37, %v3063_v14 }
 0x58b   : > { %v1904_v49 = vsel %vm1470_vm0, %v1898_v48, 0  ;;  %2442 = vmatmul.mubr.msk.bf16.vlgmr.msra.gmra.mrb[16].mxu0 %vm1232_vm14, %v2440_v42  ;;  %2443 = vmatprep.subr.msk.bf16.mxu0 %vm1470_vm0, %v1899_v45  ;;  %v2021_v42 = vrot.slane %v2448_v37, %v3068_v18 }
 0x58c   : > { %1910 = vmatpush1.bf16.msra.mxu0 %v1904_v49  ;;  %1941 = vmatprep.mubr.bf16.mxu0 %v2706_v0 }
 0x58d   : > { %v1571_v50 = vpop.permute.xlu0 %1570  ;;  %v1573_v51 = vpop.permute.xlu1 %1572 }
 0x58e   : > { %v1576_v52 = vsel %vm783_vm5, %v1571_v50, %v1573_v51  ;;  %v1577_v53 = vsel %vm783_vm5, %v1573_v51, %v1575_v40 }
 0x58f   : > { %v1582_v46 = vsel %vm1470_vm0, %v1576_v52, 0  ;;  %2428 = vmatprep.subr.msk.bf16.mxu1 %vm1470_vm0, %v1577_v53 }
 0x590   : > { %1588 = vmatpush1.bf16.msra.mxu1 %v1582_v46 }
 0x591   : > { %v1771_v47 = vpop.permute.xlu0 %1770  ;;  %v1773_v55 = vpop.permute.xlu1 %1772 }
 0x592   : > { %v1775_v56 = vsel %vm972_vm10, %v1771_v47, %v1773_v55 }
 0x593   : > { %2429 = vmatmul.mubr.msk.bf16.vlgmr.msra.gmra.mrb[16].mxu1 %vm1232_vm14, %v2427_v54  ;;  %2437 = vmatprep.subr.msk.bf16.mxu1 %vm1470_vm0, %v1775_v56 }
 0x594   : > { %1817 = vmatprep.mubr.bf16.mxu1 %v2706_v0 }
 0x595   : > { %v1953_v58 = vpop.permute.xlu0 %1952  ;;  %v1769_v59 = vpop.permute.xlu1 %1768 }
 0x596   : > { %v1774_v60 = vsel %vm972_vm10, %v1769_v59, %v1771_v47 }
 0x597   : > { %v1780_v61 = vsel %vm1470_vm0, %v1774_v60, 0  ;;  %2444 = vmatmul.mubr.msk.bf16.vlgmr.msra.gmra.mrb[16].mxu0 %vm1232_vm14, %v2439_v57  ;;  %v2228_v60 = vld [vmem:[%s3342_s16] sm:$0xf] }
 0x598   : > { %1786 = vmatpush1.bf16.msra.mxu1 %v1780_v61  ;;  %2001 = vmatprep.mubr.bf16.mxu0 %v2706_v0 }
 0x599   : > { %v1957_v1 = vpop.permute.xlu0 %1956  ;;  %v1955_v2 = vpop.permute.xlu1 %1954  ;;  %2478 = vmatprep.subr.mxu1 %v2716_v62 }
 0x59a   : > { %v1958_v3 = vsel %vm1147_vm11, %v1953_v58, %v1955_v2  ;;  %v1959_v5 = vsel %vm1147_vm11, %v1955_v2, %v1957_v1 }
 0x59b   : > { %v1964_v6 = vsel %vm1470_vm0, %v1958_v3, 0  ;;  %2438 = vmatmul.mubr.msk.bf16.vlgmr.msra.gmra.mrb[20].mxu1 %vm1232_vm14, %v2436_v63  ;;  %2446 = vmatprep.subr.msk.bf16.mxu0 %vm1470_vm0, %v1959_v5 }
 0x59c   : > { %1970 = vmatpush1.bf16.msra.mxu0 %v1964_v6  ;;  %2480 = vmatprep.mubr.msk.f32.mxu1 %vm2717_vm12, %v2716_v62  ;;  %v2194_v6 = vld [vmem:[%s3334_s8] sm:$0xff] }
 0x5a3   : > { %2447 = vmatmul.mubr.msk.bf16.vlgmr.msra.gmra.mrb[16].mxu0 %vm1232_vm14, %v2445_v7 }
 0x5aa   : > { %v2032_v52 = vpop.permute.xlu1 %2031 }
 0x64a   : > { %v1701_v8 = vpop.f32.mrb[8].mxu0 }
 0x64b   : > { %v1703_v12 = vpop.f32.mrb[9].mxu0 }
 0x64c   : > { %v1705_v13 = vpop.f32.mrb[10].mxu0 }
 0x64d   : > { %v1706_v15 = vpop.f32.mrb[11].mxu0 }
 0x656   : > { %v1759_v16 = vpop.f32.mrb[12].mxu0 }
 0x657   : > { %v1760_v17 = vadd.f32 %v1759_v16, %v1701_v8  ;;  %v1761_v19 = vpop.f32.mrb[13].mxu0  ;;  %v2229_v16 = vld [vmem:[%s3343_s17] sm:$0xff] }
 0x658   : > { %v1762_v20 = vadd.f32 %v1761_v19, %v1703_v12  ;;  %v1763_v21 = vpop.f32.mrb[14].mxu0  ;;  %v2196_v12 = vld [vmem:[%s3335_s9] sm:$0xff] }
 0x659   : > { %v1764_v22 = vpop.f32.mrb[15].mxu0 }
 0x666   : > { %v1621_v23 = vpop.f32.mrb[16].mxu1 }
 0x667   : > { %v1623_v24 = vpop.f32.mrb[17].mxu1  ;;  %v1642_v31 = vmul.f32 %v1635_v28, %v1621_v23 }
 0x668   : > { %v1625_v26 = vpop.f32.mrb[18].mxu1  ;;  %v1643_v34 = vmul.f32 %v1639_v29, %v1623_v24 }
 0x669   : > { %v1626_v27 = vpop.f32.mrb[19].mxu1 }
 0x66e   : > { %v1819_v30 = vpop.f32.mrb[20].mxu1 }
 0x66f   : > { %v1826_v32 = vadd.f32 %v1819_v30, %v1760_v17  ;;  %v1821_v33 = vpop.f32.mrb[21].mxu1 }
 0x670   : > { %v1827_v35 = vadd.f32 %v1821_v33, %v1762_v20  ;;  %v1823_v36 = vpop.f32.mrb[22].mxu1 }
 0x671   : > { %v1828_v38 = vadd.f32 %v1826_v32, %v1642_v31  ;;  %v1824_v39 = vpop.f32.mrb[23].mxu1 }
 0x672   : > { %v1829_v40 = vadd.f32 %v1827_v35, %v1643_v34 }
 0x676   : > { %v2003_v43 = vpop.f32.mrb[16].mxu0 }
 0x677   : > { %v2024_v44 = vmul.f32 %v2017_v41, %v2003_v43  ;;  %v2005_v45 = vpop.f32.mrb[17].mxu0 }
 0x678   : > { %v2025_v48 = vmul.f32 %v2021_v42, %v2005_v45  ;;  %v2007_v49 = vpop.f32.mrb[18].mxu0 }
 0x679   : > { %v2026_v50 = vadd.f32 %v2024_v44, %v1828_v38  ;;  %v2008_v51 = vpop.f32.mrb[19].mxu0 }
 0x67a   : > { %v2027_v53 = vadd.f32 %v2025_v48, %v1829_v40 }
 0x67b   : > { %v2034_v46 = vadd.f32 %v2032_v52, %v2026_v50 }
 0x67c   : > { %v2035_v54 = vadd.f32 %v2032_v52, %v2027_v53 }
 0x67d   : > { %v2039_v47 = vmul.f32 %v2034_v46, %v2034_v46 }
 0x67e   : > { %v2036_v55 = vadd.f32 %v2035_v54, %v2034_v46  ;;  %v2040_v56 = vmul.f32 %v2035_v54, %v2035_v54 }
 0x680   : > { %2037 = vadd.xlane.f32.xlu0 %v2036_v55  ;;  %v2041_v57 = vadd.f32 %v2040_v56, %v2039_v47 }
 0x682   : > { %2042 = vadd.xlane.f32.xlu1 %v2041_v57 }
 0x693   : > { %2242 = vrot.lane.b32.xlu1 %v2951_v11, %s3393_s18 }
 0x696   : > { %2240 = vrot.lane.b32.xlu0 %v2942_v9, %s3393_s18 }
 0x69a   : > { %2238 = vrot.lane.b32.xlu0 %v2947_v10, %s3393_s18  ;;  %s2459_s18 = sshll.u32 %s2835_s0, 8  ;;  %s2637_s0 = scalar_lea.vmem %s3284_s19, 256 }
 0x69b   : > { %s3282_s24 = scalar_lea.hbm %s3401_s2, %s2459_s18  ;;  %p2638_p6 = scmp.ne.s32.totalorder %s3284_s19, %s2637_s0 }
 0x69c   : > { %p2645_p2 = scmp.lt.s32.totalorder %s2643_s3, %s2637_s0 }
 0x69d   : > { %p2639_p13 = pnand %p2638_p6, %p3402_p12 }
 0x69e   : > { %p2646_p4 = por %p2645_p2, %p2644_p10 }
 0x69f   : > { %p2640_p7 = pneg %p2639_p13 }
 0x6a1   : > { %p2647_p5 = pnand %p2646_p4, %p2640_p7 }
 0x70d   : > { %v2038_v14 = vpop.xlane.xlu0 %2037 }
 0x70e   : > { %2479 = vmatpush3.msra.mxu1 %v2038_v14 }
 0x70f   : > { %v2043_v18 = vpop.xlane.xlu1 %2042  ;;  %2481 = vmatmul.mubr.msk.f32.vlgmr.msra.gmra.mrb[24].mxu1 %vm1232_vm14, %v3101_v4  ;;  %2483 = vmatprep.subr.mxu1 %v2716_v62 }
 0x710   : > { %2484 = vmatpush3.msra.mxu1 %v2043_v18  ;;  %2485 = vmatprep.mubr.msk.f32.mxu1 %vm2717_vm12, %v2716_v62 }
 0x711   : > { %v2241_v58 = vpop.permute.xlu0 %2240 }
 0x713   : > { %v2243_v11 = vpop.permute.xlu1 %2242  ;;  %2486 = vmatmul.mubr.msk.f32.vlgmr.msra.gmra.mrb[26].mxu1 %vm1232_vm14, %v3101_v4 }
 0x714   : > { %v2245_v9 = vsel %vm860_vm7, %v2241_v58, %v2243_v11  ;;  %2283 = vmatprep.mubr.bf16.mxu1 %v2706_v0 }
 0x715   : > { %2251 = vmatprep.subr.bf16.mxu1 %v2245_v9  ;;  %v2239_v10 = vpop.permute.xlu0 %2238 }
 0x716   : > { %v2244_v59 = vsel %vm860_vm7, %v2239_v10, %v2241_v58 }
 0x717   : > { %2252 = vmatpush1.bf16.msra.mxu1 %v2244_v59 }
 0x71a   : > { %2451 = vmatmul.mubr.msk.bf16.vlgmr.msra.gmra.mrb[28].mxu1 %vm686_vm4, %v2228_v60 }
 0x7e2   : > { %v2114_v62 = vpop.f32.mrb[24].mxu1 }
 0x7e3   : > { %v2118_v61 = vmul.f32 0.001953125, %v2114_v62  ;;  %v2482_v63 = vpop.f32.mrb[25].mxu1 }
 0x7e5   : > { %v2190_v4 = vmul.f32 %v2118_v61, %v2118_v61 }
 0x7e6   : > { %v2185_v1 = vpop.f32.mrb[26].mxu1 }
 0x7e7   : > { %v2189_v2 = vmul.f32 0.001953125, %v2185_v1  ;;  %v2487_v3 = vpop.f32.mrb[27].mxu1 }
 0x7e9   : > { %v2191_v5 = vsub.f32 %v2189_v2, %v2190_v4 }
 0x7eb   : > { %v2192_v0 = vadd.f32 1e-05, %v2191_v5 }
 0x7ed   : > { %2597 = vrsqrt.f32 %v2192_v0  ;;  %v2285_v15 = vpop.f32.mrb[28].mxu1 }
 0x7ee   : > { %v2287_v19 = vpop.f32.mrb[29].mxu1 }
 0x7ef   : > { %v2289_v20 = vpop.f32.mrb[30].mxu1 }
 0x7f0   : > { %v2290_v21 = vpop.f32.mrb[31].mxu1 }
 0x7f7   : > { %v2598_v7 = vpop.eup %2597 }
 0x7f8   : > { %v2195_v8 = vmul.f32 %v2598_v7, %v2194_v6 }
 0x7fa   : > { %2201 = vperm.xlu1 %2579, %v2195_v8   ;;  %v2197_v13 = vmul.f32 %v2195_v8, %v2118_v61 }
 0x7fc   : > { %v2198_v17 = vsub.f32 %v2196_v12, %v2197_v13 }
 0x7fe   : > { %2232 = vperm.xlu1 %2579, %v2229_v16   ;;  %2208 = vperm.xlu0 %2578, %v2198_v17  }
 0x879   : > { %v2202_v22 = vpop.permute.xlu1 %2201 }
 0x87a   : > { %v2204_v23 = vmul.f32 %v2202_v22, %v2034_v46  ;;  %v2205_v24 = vmul.f32 %v2202_v22, %v2035_v54 }
 0x87d   : > { %v2209_v25 = vpop.permute.xlu0 %2208  ;;  %v2233_v36 = vpop.permute.xlu1 %2232 }
 0x87e   : > { %v2211_v26 = vadd.f32 %v2209_v25, %v2204_v23  ;;  %v2212_v27 = vadd.f32 %v2209_v25, %v2205_v24  ;;  %v2286_v39 = vadd.f32 %v2285_v15, %v2233_v36  ;;  %v2288_v42 = vadd.f32 %v2287_v19, %v2233_v36 }
 0x880   : > { %v2213_v28 = vsub.f32 0.0, %v2211_v26  ;;  %v2214_v29 = vsub.f32 0.0, %v2212_v27 }
 0x882   : > { %v2215_v30 = vmul.f32 1.442695, %v2213_v28  ;;  %v2217_v31 = vmul.f32 1.442695, %v2214_v29 }
 0x884   : > { %2599 = vpow2.f32 %v2215_v30 }
 0x885   : > { %2601 = vpow2.f32 %v2217_v31 }
 0x88e   : > { %v2600_v32 = vpop.eup %2599 }
 0x88f   : > { %v2602_v33 = vpop.eup %2601  ;;  %v2219_v34 = vadd.f32 1.0, %v2600_v32 }
 0x890   : > { %v2220_v35 = vadd.f32 1.0, %v2602_v33 }
 0x891   : > { %2603 = vrcp.f32 %v2219_v34 }
 0x892   : > { %2605 = vrcp.f32 %v2220_v35 }
 0x89b   : > { %v2604_v37 = vpop.eup %2603 }
 0x89c   : > { %v2606_v38 = vpop.eup %2605  ;;  %v2223_v40 = vmul.f32 %v2604_v37, %v2211_v26 }
 0x89d   : > { %v2224_v41 = vmul.f32 %v2606_v38, %v2212_v27 }
 0x89e   : > { %v2292_v43 = vadd.f32 %v2286_v39, %v2223_v40 }
 0x89f   : > { %v2293_v44 = vadd.f32 %v2288_v42, %v2224_v41 }
 0x8a0   : > { %2294 = vst [vmem:[%s602_s27] sm:$0xff] %v2292_v43 }
 0x8a1   : > { %2295 = vst [vmem:[%s602_s27 + $0x8] sm:$0xff] %v2293_v44 }
 0x8a2   : > { %2650 = shalt.err (!%p2647_p5)
}
 0x8a3   : > { %s2651_s25 = scalar_lea.hbm %s3282_s24, 256  ;;  %s2655_s23 = scalar_lea.hbm %s3401_s2, 512 }
 0x8a4   : > { %p2652_p8 = scmp.ne.s32.totalorder %s3282_s24, %s2651_s25  ;;  %p2656_p1 = scmp.lt.u32.totalorder %s3282_s24, %s3401_s2 }
 0x8a5   : > { %p2657_p3 = scmp.lt.u32.totalorder %s2655_s23, %s2651_s25  ;;  %p2659_p6 = scmp.lt.u32.totalorder %s2651_s25, %s3282_s24 }
 0x8a6   : > { %p2653_p9 = pnand %p2652_p8, %p3402_p12 }
 0x8a7   : > { %p2658_p11 = por %p2657_p3, %p2656_p1 }
 0x8a8   : > { %p2654_p0 = pneg %p2653_p9 }
 0x8a9   : > { %p2660_p13 = por %p2659_p6, %p2658_p11 }
 0x8ab   : > { %p2661_p7 = pnand %p2660_p13, %p2654_p0 }
 0x8ad   : > { %2664 = shalt.err (!%p2661_p7)
}
 0x8ae   : > { %2522 = dma.vmem_to_hbm [thread:$0]  (%p3402_p12), %s3284_s19, 256, %s3282_s24, %s2297_s21  }
 0x8af PF: > { %s3403_s3 = sld [smem:[#allocation10_spill]]  ;;  %s3404_s0 = sld [smem:[#allocation15_spill]] }
 0x8b0   : > { %p3406_p2 = scmp.ge.s32.totalorder %s2703_s30, 2 }
 0x8b5   : > { %s2323_s26 = sand.u32 1, %s3403_s3   ;;  %p3405_p10 = scmp.ne.s32.totalorder %s3404_s0, 0 }
 0x8b6   : > { %s2324_s18 = scalar_lea.sflag [#allocation6], %s2323_s26 }
 0x8b7   : > { %p2529_p4 = pnand %p3406_p2, %p3405_p10 }
 0x8b9   : > { %2686 = dma.done.wait (!%p2529_p4), %s2324_s18, 256  }
 0x8ba   : > { %2688 = vsyncadd (!%p2529_p4), %s2324_s18, 4294967040  ;;  %s3407_s30 = sld [smem:[#allocation12_spill]]  ;;  %s3408_s25 = sld [smem:[#allocation11_spill]] }
 0x8bb   : > { %s3409_s29 = sld [smem:[#allocation13_spill]]  ;;  %s3410_s27 = smov %s2695_s28 }
 0x8c0   : > { %p31_p5 = scmp.ge.s32.totalorder %s3407_s30, 4   ;;  %s3411_s28 = smov %s3408_s25 }
 0x8c2   :  { %33 = sbr.rel (!%p31_p5) target bundleno = 11 (0xb), region = 157 }
 0x8c9   :  { %2329 = vsyncpa [#allocation5], 1 }
 0x8ca   :  { %2331 = vsyncpa [#allocation5 + $0x1], 1 }
 0x8cb   :  { %2332 = vsyncpa [#allocation6], 1 }
 0x8cc   :  { %2334 = vsyncpa [#allocation6 + $0x1], 1 }

</bundles_post_ra>
